<compile_context>
chip_gen: v7x
topology: tpu7x:2x2x1
jax: 0.10.0
libtpu: 0.0.40
codegen_flags: <defaults>
</compile_context>

<pallas_src>
import functools

import jax
import jax.numpy as jnp
from jax.experimental import pallas as pl
from jax.experimental.pallas import tpu as pltpu


def _fused_maskblock_kernel(*refs, depth, wp, margin, bp):
    """All MaskBlock layers fused; whole batch in one invocation.

    refs = (x_ref, mask_ref,
            w_0, b_0, a_0, ..., w_{d-1}, b_{d-1}, a_{d-1},
            o_ref, act_ref)

    x_ref   : (Cin, B*P)       input in padded-plane layout, P=(H+2)*(W+2)
    mask_ref: (1,  B*P)        1.0 at interior pixels, 0.0 on the pad ring
    w_i     : (9, Cout, Cin)   per-tap channel-mix weights (beta folded in)
    b_i     : (Cout, 1)        bias * beta
    a_i     : (Cout, 1)        PReLU negative slope
    o_ref   : (Cout, B*P)      output, padded-plane layout
    act_ref : (Cmax, B*P + 2*margin)  VMEM staging buffer for shifted reads
    """
    x_ref, mask_ref = refs[0], refs[1]
    layer_refs = refs[2:2 + 3 * depth]
    o_ref = refs[2 + 3 * depth]
    act_ref = refs[3 + 3 * depth]

    mask = mask_ref[...] > 0.5                        # (1, bp) bool

    # Margins must be exactly zero: they provide the conv's zero padding at
    # the flat-plane boundaries.
    act_ref[...] = jnp.zeros(act_ref.shape, act_ref.dtype)

    cur = x_ref[...].astype(jnp.float32)              # (cin0, bp)

    for i in range(depth):                            # static unroll
        w_ref, b_ref, a_ref = layer_refs[3 * i:3 * i + 3]
        cout, cin = w_ref.shape[1], w_ref.shape[2]

        # Stage the current (zero-ring) activation so taps become lane shifts.
        act_ref[0:cin, margin:margin + bp] = cur

        acc = jnp.zeros((cout, bp), jnp.float32)
        t = 0
        for dy in range(3):
            for dx in range(3):
                start = margin + (dy - 1) * wp + (dx - 1)
                patch = act_ref[0:cin, start:start + bp]      # (cin, bp)
                wt = w_ref[t]                                 # (cout, cin)
                for ci in range(cin):
                    # (1, bp) * (cout, 1) -> (cout, bp) : pure VPU FMA
                    acc = acc + patch[ci:ci + 1, :] * wt[:, ci:ci + 1]
                t += 1

        acc = acc + b_ref[...]                        # bias (beta folded in)
        if i:                                         # residual only for i > 0
            acc = acc + cur
        acc = jnp.where(acc >= 0.0, acc, a_ref[...] * acc)    # PReLU
        cur = jnp.where(mask, acc, 0.0)               # keep pad ring at zero

    o_ref[...] = cur.astype(o_ref.dtype)


def mask_block_forward(x_nchw, params):
    """MaskBlock.forward.  x_nchw: (B, Cin, H, W).  Returns (y[:, :1], y[:, 1:4])."""
    B, Cin, H, W = x_nchw.shape
    Hp, Wp = H + 2, W + 2
    P = Hp * Wp
    BP = B * P
    margin = Wp + 1                                   # max |flat tap offset|
    depth = len(params)
    Cout = params[-1][0].shape[-1]
    cmax = max([Cin] + [p[0].shape[-1] for p in params])

    # ---- one-time input prep (tiny; NCHW kept) ----------------------------
    xp = jnp.pad(x_nchw, ((0, 0), (0, 0), (1, 1), (1, 1)))
    x_flat = jnp.transpose(xp, (1, 0, 2, 3)).reshape(Cin, BP)   # (Cin, B*P)

    mask = jnp.zeros((B, Hp, Wp), jnp.float32).at[:, 1:-1, 1:-1].set(1.0)
    mask = mask.reshape(1, BP)

    # ---- per-layer params: fold beta into w and b --------------------------
    inputs = [x_flat, mask]
    in_specs = [
        pl.BlockSpec((Cin, BP), lambda i: (0, 0)),
        pl.BlockSpec((1, BP), lambda i: (0, 0)),
    ]
    prev_c = Cin
    for li, (w, b, beta, alpha) in enumerate(params):
        cin_l, cout_l = w.shape[2], w.shape[3]
        assert cin_l == prev_c, "layer input channels must chain"
        if li:
            assert cin_l == cout_l, "residual path requires Cin == Cout"
        w_scaled = w * beta.reshape(1, 1, 1, -1)                 # (3,3,ci,co)
        w_taps = jnp.transpose(w_scaled, (0, 1, 3, 2)).reshape(9, cout_l, cin_l)
        b_col = (b * beta).reshape(cout_l, 1)
        a_col = alpha.reshape(cout_l, 1)
        inputs += [w_taps, b_col, a_col]
        in_specs += [
            pl.BlockSpec((9, cout_l, cin_l), lambda i: (0, 0, 0)),
            pl.BlockSpec((cout_l, 1), lambda i: (0, 0)),
            pl.BlockSpec((cout_l, 1), lambda i: (0, 0)),
        ]
        prev_c = cout_l

    out_flat = pl.pallas_call(
        functools.partial(_fused_maskblock_kernel,
                          depth=depth, wp=Wp, margin=margin, bp=BP),
        out_shape=jax.ShapeDtypeStruct((Cout, BP), x_nchw.dtype),
        grid=(1,),
        in_specs=in_specs,
        out_specs=pl.BlockSpec((Cout, BP), lambda i: (0, 0)),
        scratch_shapes=[pltpu.VMEM((cmax, BP + 2 * margin), jnp.float32)],
        compiler_params=pltpu.CompilerParams(
            dimension_semantics=("arbitrary",)),
    )(*inputs)

    out = jnp.transpose(out_flat.reshape(Cout, B, Hp, Wp), (1, 0, 2, 3))
    out = out[:, :, 1:-1, 1:-1]                                  # (B,Cout,H,W)
    return out[:, :1, ...], out[:, 1:4, ...]


def make_params(key, in_dim, out_dim, depth):
    """Deterministic parameter init (shapes mirror the PyTorch module)."""
    params = []
    for i in range(depth):
        cin = out_dim if i else in_dim
        key, kw, kb, ka, kbeta = jax.random.split(key, 5)
        w = jax.random.normal(kw, (3, 3, cin, out_dim), jnp.float32) * 0.1   # HWIO
        b = jax.random.normal(kb, (out_dim,), jnp.float32) * 0.05
        beta = jnp.ones((out_dim,), jnp.float32) + \
            jax.random.normal(kbeta, (out_dim,), jnp.float32) * 0.05
        alpha = jnp.full((out_dim,), 0.25, jnp.float32) + \
            jax.random.normal(ka, (out_dim,), jnp.float32) * 0.01
        params.append((w, b, beta, alpha))
    return params


def reference_forward(x_nchw, params):
    """Pure-JAX reference (lax conv) for correctness checking."""
    x = x_nchw
    for i, (w, b, beta, alpha) in enumerate(params):
        y = jax.lax.conv_general_dilated(
            x, w, window_strides=(1, 1), padding=((1, 1), (1, 1)),
            dimension_numbers=("NCHW", "HWIO", "NCHW"))
        y = (y + b.reshape(1, -1, 1, 1)) * beta.reshape(1, -1, 1, 1)
        if i:
            y = y + x
        x = jnp.where(y >= 0, y, alpha.reshape(1, -1, 1, 1) * y)
    return x[:, :1, ...], x[:, 1:4, ...]


if __name__ == "__main__":
    B, in_dim, out_dim, H, W = 2, 4, 4, 16, 16
    depth = 2  # exercises both the non-residual (i=0) and residual (i>0) paths

    key = jax.random.PRNGKey(0)
    key, kx = jax.random.split(key)
    x = jax.random.normal(kx, (B, in_dim, H, W), jnp.float32)

    params = make_params(key, in_dim, out_dim, depth)

    out1, out2 = mask_block_forward(x, params)
    jax.block_until_ready((out1, out2))

    ref1, ref2 = reference_forward(x, params)
    assert out1.shape == (B, 1, H, W) and out2.shape == (B, 3, H, W)
    assert jnp.allclose(out1, ref1, atol=1e-4, rtol=1e-4)
    assert jnp.allclose(out2, ref2, atol=1e-4, rtol=1e-4)

    print("KERNEL_OK")
</pallas_src>

<mosaic_0001>
module attributes {stable_mosaic.version = 11 : i64} {
  func.func @_fused_maskblock_kernel(%arg0: i32, %arg1: memref<4x648xf32, #tpu.memory_space<vmem>>, %arg2: memref<1x648xf32, #tpu.memory_space<vmem>>, %arg3: memref<9x4x4xf32, #tpu.memory_space<vmem>>, %arg4: memref<4x1xf32, #tpu.memory_space<vmem>>, %arg5: memref<4x1xf32, #tpu.memory_space<vmem>>, %arg6: memref<9x4x4xf32, #tpu.memory_space<vmem>>, %arg7: memref<4x1xf32, #tpu.memory_space<vmem>>, %arg8: memref<4x1xf32, #tpu.memory_space<vmem>>, %arg9: memref<4x648xf32, #tpu.memory_space<vmem>>, %arg10: memref<4x686xf32, #tpu.memory_space<vmem>>) attributes {dimension_semantics = [#tpu.dimension_semantics<arbitrary>], iteration_bounds = array<i64: 1>, scalar_prefetch = 0 : i64, scratch_operands = 1 : i64, tpu.core_type = #tpu.core_type<tc>, window_params = [{pipeline_mode = #tpu.pipeline_mode<synchronous>, transform_indices = @transform_0, window_bounds = array<i64: 4, 648>}, {pipeline_mode = #tpu.pipeline_mode<synchronous>, transform_indices = @transform_1, window_bounds = array<i64: 1, 648>}, {pipeline_mode = #tpu.pipeline_mode<synchronous>, transform_indices = @transform_2, window_bounds = array<i64: 9, 4, 4>}, {pipeline_mode = #tpu.pipeline_mode<synchronous>, transform_indices = @transform_3, window_bounds = array<i64: 4, 1>}, {pipeline_mode = #tpu.pipeline_mode<synchronous>, transform_indices = @transform_4, window_bounds = array<i64: 4, 1>}, {pipeline_mode = #tpu.pipeline_mode<synchronous>, transform_indices = @transform_5, window_bounds = array<i64: 9, 4, 4>}, {pipeline_mode = #tpu.pipeline_mode<synchronous>, transform_indices = @transform_6, window_bounds = array<i64: 4, 1>}, {pipeline_mode = #tpu.pipeline_mode<synchronous>, transform_indices = @transform_7, window_bounds = array<i64: 4, 1>}, {pipeline_mode = #tpu.pipeline_mode<synchronous>, transform_indices = @transform_8, window_bounds = array<i64: 4, 648>}]} {
    %c0 = arith.constant 0 : index
    %c0_0 = arith.constant 0 : index
    %0 = vector.load %arg2[%c0, %c0_0] : memref<1x648xf32, #tpu.memory_space<vmem>>, vector<1x648xf32>
    %cst = arith.constant 5.000000e-01 : f32
    %1 = vector.broadcast %cst : f32 to vector<1x648xf32>
    %2 = arith.cmpf ogt, %0, %1 : vector<1x648xf32>
    %cst_1 = arith.constant 0.000000e+00 : f32
    %3 = vector.broadcast %cst_1 : f32 to vector<4x686xf32>
    %c0_2 = arith.constant 0 : index
    %c0_3 = arith.constant 0 : index
    %4 = vector.load %arg10[%c0_2, %c0_3] : memref<4x686xf32, #tpu.memory_space<vmem>>, vector<4x686xf32>
    tpu.vector_store %arg10[%c0_2, %c0_3], %3 {strides = array<i32>} : memref<4x686xf32, #tpu.memory_space<vmem>>, vector<4x686xf32>,
    %c0_4 = arith.constant 0 : index
    %c0_5 = arith.constant 0 : index
    %5 = vector.load %arg1[%c0_4, %c0_5] : memref<4x648xf32, #tpu.memory_space<vmem>>, vector<4x648xf32>
    %c0_6 = arith.constant 0 : index
    %c19 = arith.constant 19 : index
    %6 = vector.load %arg10[%c0_6, %c19] : memref<4x686xf32, #tpu.memory_space<vmem>>, vector<4x648xf32>
    tpu.vector_store %arg10[%c0_6, %c19], %5 {strides = array<i32>} : memref<4x686xf32, #tpu.memory_space<vmem>>, vector<4x648xf32>,
    %cst_7 = arith.constant 0.000000e+00 : f32
    %7 = vector.broadcast %cst_7 : f32 to vector<4x648xf32>
    %c0_8 = arith.constant 0 : index
    %c0_9 = arith.constant 0 : index
    %8 = vector.load %arg10[%c0_8, %c0_9] : memref<4x686xf32, #tpu.memory_space<vmem>>, vector<4x648xf32>
    %c0_10 = arith.constant 0 : index
    %c0_11 = arith.constant 0 : index
    %c0_12 = arith.constant 0 : index
    %9 = vector.load %arg3[%c0_10, %c0_11, %c0_12] : memref<9x4x4xf32, #tpu.memory_space<vmem>>, vector<1x4x4xf32>
    %10 = vector.shape_cast %9 : vector<1x4x4xf32> to vector<4x4xf32>
    %11 = vector.extract_strided_slice %8 {offsets = [0, 0], sizes = [1, 648], strides = [1, 1]} : vector<4x648xf32> to vector<1x648xf32>
    %12 = vector.extract_strided_slice %10 {offsets = [0, 0], sizes = [4, 1], strides = [1, 1]} : vector<4x4xf32> to vector<4x1xf32>
    %13 = vector.broadcast %11 : vector<1x648xf32> to vector<4x648xf32>
    %14 = vector.broadcast %12 : vector<4x1xf32> to vector<4x648xf32>
    %15 = arith.mulf %13, %14 : vector<4x648xf32>
    %16 = arith.addf %7, %15 : vector<4x648xf32>
    %17 = vector.extract_strided_slice %8 {offsets = [1, 0], sizes = [1, 648], strides = [1, 1]} : vector<4x648xf32> to vector<1x648xf32>
    %18 = vector.extract_strided_slice %10 {offsets = [0, 1], sizes = [4, 1], strides = [1, 1]} : vector<4x4xf32> to vector<4x1xf32>
    %19 = vector.broadcast %17 : vector<1x648xf32> to vector<4x648xf32>
    %20 = vector.broadcast %18 : vector<4x1xf32> to vector<4x648xf32>
    %21 = arith.mulf %19, %20 : vector<4x648xf32>
    %22 = arith.addf %16, %21 : vector<4x648xf32>
    %23 = vector.extract_strided_slice %8 {offsets = [2, 0], sizes = [1, 648], strides = [1, 1]} : vector<4x648xf32> to vector<1x648xf32>
    %24 = vector.extract_strided_slice %10 {offsets = [0, 2], sizes = [4, 1], strides = [1, 1]} : vector<4x4xf32> to vector<4x1xf32>
    %25 = vector.broadcast %23 : vector<1x648xf32> to vector<4x648xf32>
    %26 = vector.broadcast %24 : vector<4x1xf32> to vector<4x648xf32>
    %27 = arith.mulf %25, %26 : vector<4x648xf32>
    %28 = arith.addf %22, %27 : vector<4x648xf32>
    %29 = vector.extract_strided_slice %8 {offsets = [3, 0], sizes = [1, 648], strides = [1, 1]} : vector<4x648xf32> to vector<1x648xf32>
    %30 = vector.extract_strided_slice %10 {offsets = [0, 3], sizes = [4, 1], strides = [1, 1]} : vector<4x4xf32> to vector<4x1xf32>
    %31 = vector.broadcast %29 : vector<1x648xf32> to vector<4x648xf32>
    %32 = vector.broadcast %30 : vector<4x1xf32> to vector<4x648xf32>
    %33 = arith.mulf %31, %32 : vector<4x648xf32>
    %34 = arith.addf %28, %33 : vector<4x648xf32>
    %c0_13 = arith.constant 0 : index
    %c1 = arith.constant 1 : index
    %35 = vector.load %arg10[%c0_13, %c1] : memref<4x686xf32, #tpu.memory_space<vmem>>, vector<4x648xf32>
    %c1_14 = arith.constant 1 : index
    %c0_15 = arith.constant 0 : index
    %c0_16 = arith.constant 0 : index
    %36 = vector.load %arg3[%c1_14, %c0_15, %c0_16] : memref<9x4x4xf32, #tpu.memory_space<vmem>>, vector<1x4x4xf32>
    %37 = vector.shape_cast %36 : vector<1x4x4xf32> to vector<4x4xf32>
    %38 = vector.extract_strided_slice %35 {offsets = [0, 0], sizes = [1, 648], strides = [1, 1]} : vector<4x648xf32> to vector<1x648xf32>
    %39 = vector.extract_strided_slice %37 {offsets = [0, 0], sizes = [4, 1], strides = [1, 1]} : vector<4x4xf32> to vector<4x1xf32>
    %40 = vector.broadcast %38 : vector<1x648xf32> to vector<4x648xf32>
    %41 = vector.broadcast %39 : vector<4x1xf32> to vector<4x648xf32>
    %42 = arith.mulf %40, %41 : vector<4x648xf32>
    %43 = arith.addf %34, %42 : vector<4x648xf32>
    %44 = vector.extract_strided_slice %35 {offsets = [1, 0], sizes = [1, 648], strides = [1, 1]} : vector<4x648xf32> to vector<1x648xf32>
    %45 = vector.extract_strided_slice %37 {offsets = [0, 1], sizes = [4, 1], strides = [1, 1]} : vector<4x4xf32> to vector<4x1xf32>
    %46 = vector.broadcast %44 : vector<1x648xf32> to vector<4x648xf32>
    %47 = vector.broadcast %45 : vector<4x1xf32> to vector<4x648xf32>
    %48 = arith.mulf %46, %47 : vector<4x648xf32>
    %49 = arith.addf %43, %48 : vector<4x648xf32>
    %50 = vector.extract_strided_slice %35 {offsets = [2, 0], sizes = [1, 648], strides = [1, 1]} : vector<4x648xf32> to vector<1x648xf32>
    %51 = vector.extract_strided_slice %37 {offsets = [0, 2], sizes = [4, 1], strides = [1, 1]} : vector<4x4xf32> to vector<4x1xf32>
    %52 = vector.broadcast %50 : vector<1x648xf32> to vector<4x648xf32>
    %53 = vector.broadcast %51 : vector<4x1xf32> to vector<4x648xf32>
    %54 = arith.mulf %52, %53 : vector<4x648xf32>
    %55 = arith.addf %49, %54 : vector<4x648xf32>
    %56 = vector.extract_strided_slice %35 {offsets = [3, 0], sizes = [1, 648], strides = [1, 1]} : vector<4x648xf32> to vector<1x648xf32>
    %57 = vector.extract_strided_slice %37 {offsets = [0, 3], sizes = [4, 1], strides = [1, 1]} : vector<4x4xf32> to vector<4x1xf32>
    %58 = vector.broadcast %56 : vector<1x648xf32> to vector<4x648xf32>
    %59 = vector.broadcast %57 : vector<4x1xf32> to vector<4x648xf32>
    %60 = arith.mulf %58, %59 : vector<4x648xf32>
    %61 = arith.addf %55, %60 : vector<4x648xf32>
    %c0_17 = arith.constant 0 : index
    %c2 = arith.constant 2 : index
    %62 = vector.load %arg10[%c0_17, %c2] : memref<4x686xf32, #tpu.memory_space<vmem>>, vector<4x648xf32>
    %c2_18 = arith.constant 2 : index
    %c0_19 = arith.constant 0 : index
    %c0_20 = arith.constant 0 : index
    %63 = vector.load %arg3[%c2_18, %c0_19, %c0_20] : memref<9x4x4xf32, #tpu.memory_space<vmem>>, vector<1x4x4xf32>
    %64 = vector.shape_cast %63 : vector<1x4x4xf32> to vector<4x4xf32>
    %65 = vector.extract_strided_slice %62 {offsets = [0, 0], sizes = [1, 648], strides = [1, 1]} : vector<4x648xf32> to vector<1x648xf32>
    %66 = vector.extract_strided_slice %64 {offsets = [0, 0], sizes = [4, 1], strides = [1, 1]} : vector<4x4xf32> to vector<4x1xf32>
    %67 = vector.broadcast %65 : vector<1x648xf32> to vector<4x648xf32>
    %68 = vector.broadcast %66 : vector<4x1xf32> to vector<4x648xf32>
    %69 = arith.mulf %67, %68 : vector<4x648xf32>
    %70 = arith.addf %61, %69 : vector<4x648xf32>
    %71 = vector.extract_strided_slice %62 {offsets = [1, 0], sizes = [1, 648], strides = [1, 1]} : vector<4x648xf32> to vector<1x648xf32>
    %72 = vector.extract_strided_slice %64 {offsets = [0, 1], sizes = [4, 1], strides = [1, 1]} : vector<4x4xf32> to vector<4x1xf32>
    %73 = vector.broadcast %71 : vector<1x648xf32> to vector<4x648xf32>
    %74 = vector.broadcast %72 : vector<4x1xf32> to vector<4x648xf32>
    %75 = arith.mulf %73, %74 : vector<4x648xf32>
    %76 = arith.addf %70, %75 : vector<4x648xf32>
    %77 = vector.extract_strided_slice %62 {offsets = [2, 0], sizes = [1, 648], strides = [1, 1]} : vector<4x648xf32> to vector<1x648xf32>
    %78 = vector.extract_strided_slice %64 {offsets = [0, 2], sizes = [4, 1], strides = [1, 1]} : vector<4x4xf32> to vector<4x1xf32>
    %79 = vector.broadcast %77 : vector<1x648xf32> to vector<4x648xf32>
    %80 = vector.broadcast %78 : vector<4x1xf32> to vector<4x648xf32>
    %81 = arith.mulf %79, %80 : vector<4x648xf32>
    %82 = arith.addf %76, %81 : vector<4x648xf32>
    %83 = vector.extract_strided_slice %62 {offsets = [3, 0], sizes = [1, 648], strides = [1, 1]} : vector<4x648xf32> to vector<1x648xf32>
    %84 = vector.extract_strided_slice %64 {offsets = [0, 3], sizes = [4, 1], strides = [1, 1]} : vector<4x4xf32> to vector<4x1xf32>
    %85 = vector.broadcast %83 : vector<1x648xf32> to vector<4x648xf32>
    %86 = vector.broadcast %84 : vector<4x1xf32> to vector<4x648xf32>
    %87 = arith.mulf %85, %86 : vector<4x648xf32>
    %88 = arith.addf %82, %87 : vector<4x648xf32>
    %c0_21 = arith.constant 0 : index
    %c18 = arith.constant 18 : index
    %89 = vector.load %arg10[%c0_21, %c18] : memref<4x686xf32, #tpu.memory_space<vmem>>, vector<4x648xf32>
    %c3 = arith.constant 3 : index
    %c0_22 = arith.constant 0 : index
    %c0_23 = arith.constant 0 : index
    %90 = vector.load %arg3[%c3, %c0_22, %c0_23] : memref<9x4x4xf32, #tpu.memory_space<vmem>>, vector<1x4x4xf32>
    %91 = vector.shape_cast %90 : vector<1x4x4xf32> to vector<4x4xf32>
    %92 = vector.extract_strided_slice %89 {offsets = [0, 0], sizes = [1, 648], strides = [1, 1]} : vector<4x648xf32> to vector<1x648xf32>
    %93 = vector.extract_strided_slice %91 {offsets = [0, 0], sizes = [4, 1], strides = [1, 1]} : vector<4x4xf32> to vector<4x1xf32>
    %94 = vector.broadcast %92 : vector<1x648xf32> to vector<4x648xf32>
    %95 = vector.broadcast %93 : vector<4x1xf32> to vector<4x648xf32>
    %96 = arith.mulf %94, %95 : vector<4x648xf32>
    %97 = arith.addf %88, %96 : vector<4x648xf32>
    %98 = vector.extract_strided_slice %89 {offsets = [1, 0], sizes = [1, 648], strides = [1, 1]} : vector<4x648xf32> to vector<1x648xf32>
    %99 = vector.extract_strided_slice %91 {offsets = [0, 1], sizes = [4, 1], strides = [1, 1]} : vector<4x4xf32> to vector<4x1xf32>
    %100 = vector.broadcast %98 : vector<1x648xf32> to vector<4x648xf32>
    %101 = vector.broadcast %99 : vector<4x1xf32> to vector<4x648xf32>
    %102 = arith.mulf %100, %101 : vector<4x648xf32>
    %103 = arith.addf %97, %102 : vector<4x648xf32>
    %104 = vector.extract_strided_slice %89 {offsets = [2, 0], sizes = [1, 648], strides = [1, 1]} : vector<4x648xf32> to vector<1x648xf32>
    %105 = vector.extract_strided_slice %91 {offsets = [0, 2], sizes = [4, 1], strides = [1, 1]} : vector<4x4xf32> to vector<4x1xf32>
    %106 = vector.broadcast %104 : vector<1x648xf32> to vector<4x648xf32>
    %107 = vector.broadcast %105 : vector<4x1xf32> to vector<4x648xf32>
    %108 = arith.mulf %106, %107 : vector<4x648xf32>
    %109 = arith.addf %103, %108 : vector<4x648xf32>
    %110 = vector.extract_strided_slice %89 {offsets = [3, 0], sizes = [1, 648], strides = [1, 1]} : vector<4x648xf32> to vector<1x648xf32>
    %111 = vector.extract_strided_slice %91 {offsets = [0, 3], sizes = [4, 1], strides = [1, 1]} : vector<4x4xf32> to vector<4x1xf32>
    %112 = vector.broadcast %110 : vector<1x648xf32> to vector<4x648xf32>
    %113 = vector.broadcast %111 : vector<4x1xf32> to vector<4x648xf32>
    %114 = arith.mulf %112, %113 : vector<4x648xf32>
    %115 = arith.addf %109, %114 : vector<4x648xf32>
    %c0_24 = arith.constant 0 : index
    %c19_25 = arith.constant 19 : index
    %116 = vector.load %arg10[%c0_24, %c19_25] : memref<4x686xf32, #tpu.memory_space<vmem>>, vector<4x648xf32>
    %c4 = arith.constant 4 : index
    %c0_26 = arith.constant 0 : index
    %c0_27 = arith.constant 0 : index
    %117 = vector.load %arg3[%c4, %c0_26, %c0_27] : memref<9x4x4xf32, #tpu.memory_space<vmem>>, vector<1x4x4xf32>
    %118 = vector.shape_cast %117 : vector<1x4x4xf32> to vector<4x4xf32>
    %119 = vector.extract_strided_slice %116 {offsets = [0, 0], sizes = [1, 648], strides = [1, 1]} : vector<4x648xf32> to vector<1x648xf32>
    %120 = vector.extract_strided_slice %118 {offsets = [0, 0], sizes = [4, 1], strides = [1, 1]} : vector<4x4xf32> to vector<4x1xf32>
    %121 = vector.broadcast %119 : vector<1x648xf32> to vector<4x648xf32>
    %122 = vector.broadcast %120 : vector<4x1xf32> to vector<4x648xf32>
    %123 = arith.mulf %121, %122 : vector<4x648xf32>
    %124 = arith.addf %115, %123 : vector<4x648xf32>
    %125 = vector.extract_strided_slice %116 {offsets = [1, 0], sizes = [1, 648], strides = [1, 1]} : vector<4x648xf32> to vector<1x648xf32>
    %126 = vector.extract_strided_slice %118 {offsets = [0, 1], sizes = [4, 1], strides = [1, 1]} : vector<4x4xf32> to vector<4x1xf32>
    %127 = vector.broadcast %125 : vector<1x648xf32> to vector<4x648xf32>
    %128 = vector.broadcast %126 : vector<4x1xf32> to vector<4x648xf32>
    %129 = arith.mulf %127, %128 : vector<4x648xf32>
    %130 = arith.addf %124, %129 : vector<4x648xf32>
    %131 = vector.extract_strided_slice %116 {offsets = [2, 0], sizes = [1, 648], strides = [1, 1]} : vector<4x648xf32> to vector<1x648xf32>
    %132 = vector.extract_strided_slice %118 {offsets = [0, 2], sizes = [4, 1], strides = [1, 1]} : vector<4x4xf32> to vector<4x1xf32>
    %133 = vector.broadcast %131 : vector<1x648xf32> to vector<4x648xf32>
    %134 = vector.broadcast %132 : vector<4x1xf32> to vector<4x648xf32>
    %135 = arith.mulf %133, %134 : vector<4x648xf32>
    %136 = arith.addf %130, %135 : vector<4x648xf32>
    %137 = vector.extract_strided_slice %116 {offsets = [3, 0], sizes = [1, 648], strides = [1, 1]} : vector<4x648xf32> to vector<1x648xf32>
    %138 = vector.extract_strided_slice %118 {offsets = [0, 3], sizes = [4, 1], strides = [1, 1]} : vector<4x4xf32> to vector<4x1xf32>
    %139 = vector.broadcast %137 : vector<1x648xf32> to vector<4x648xf32>
    %140 = vector.broadcast %138 : vector<4x1xf32> to vector<4x648xf32>
    %141 = arith.mulf %139, %140 : vector<4x648xf32>
    %142 = arith.addf %136, %141 : vector<4x648xf32>
    %c0_28 = arith.constant 0 : index
    %c20 = arith.constant 20 : index
    %143 = vector.load %arg10[%c0_28, %c20] : memref<4x686xf32, #tpu.memory_space<vmem>>, vector<4x648xf32>
    %c5 = arith.constant 5 : index
    %c0_29 = arith.constant 0 : index
    %c0_30 = arith.constant 0 : index
    %144 = vector.load %arg3[%c5, %c0_29, %c0_30] : memref<9x4x4xf32, #tpu.memory_space<vmem>>, vector<1x4x4xf32>
    %145 = vector.shape_cast %144 : vector<1x4x4xf32> to vector<4x4xf32>
    %146 = vector.extract_strided_slice %143 {offsets = [0, 0], sizes = [1, 648], strides = [1, 1]} : vector<4x648xf32> to vector<1x648xf32>
    %147 = vector.extract_strided_slice %145 {offsets = [0, 0], sizes = [4, 1], strides = [1, 1]} : vector<4x4xf32> to vector<4x1xf32>
    %148 = vector.broadcast %146 : vector<1x648xf32> to vector<4x648xf32>
    %149 = vector.broadcast %147 : vector<4x1xf32> to vector<4x648xf32>
    %150 = arith.mulf %148, %149 : vector<4x648xf32>
    %151 = arith.addf %142, %150 : vector<4x648xf32>
    %152 = vector.extract_strided_slice %143 {offsets = [1, 0], sizes = [1, 648], strides = [1, 1]} : vector<4x648xf32> to vector<1x648xf32>
    %153 = vector.extract_strided_slice %145 {offsets = [0, 1], sizes = [4, 1], strides = [1, 1]} : vector<4x4xf32> to vector<4x1xf32>
    %154 = vector.broadcast %152 : vector<1x648xf32> to vector<4x648xf32>
    %155 = vector.broadcast %153 : vector<4x1xf32> to vector<4x648xf32>
    %156 = arith.mulf %154, %155 : vector<4x648xf32>
    %157 = arith.addf %151, %156 : vector<4x648xf32>
    %158 = vector.extract_strided_slice %143 {offsets = [2, 0], sizes = [1, 648], strides = [1, 1]} : vector<4x648xf32> to vector<1x648xf32>
    %159 = vector.extract_strided_slice %145 {offsets = [0, 2], sizes = [4, 1], strides = [1, 1]} : vector<4x4xf32> to vector<4x1xf32>
    %160 = vector.broadcast %158 : vector<1x648xf32> to vector<4x648xf32>
    %161 = vector.broadcast %159 : vector<4x1xf32> to vector<4x648xf32>
    %162 = arith.mulf %160, %161 : vector<4x648xf32>
    %163 = arith.addf %157, %162 : vector<4x648xf32>
    %164 = vector.extract_strided_slice %143 {offsets = [3, 0], sizes = [1, 648], strides = [1, 1]} : vector<4x648xf32> to vector<1x648xf32>
    %165 = vector.extract_strided_slice %145 {offsets = [0, 3], sizes = [4, 1], strides = [1, 1]} : vector<4x4xf32> to vector<4x1xf32>
    %166 = vector.broadcast %164 : vector<1x648xf32> to vector<4x648xf32>
    %167 = vector.broadcast %165 : vector<4x1xf32> to vector<4x648xf32>
    %168 = arith.mulf %166, %167 : vector<4x648xf32>
    %169 = arith.addf %163, %168 : vector<4x648xf32>
    %c0_31 = arith.constant 0 : index
    %c36 = arith.constant 36 : index
    %170 = vector.load %arg10[%c0_31, %c36] : memref<4x686xf32, #tpu.memory_space<vmem>>, vector<4x648xf32>
    %c6 = arith.constant 6 : index
    %c0_32 = arith.constant 0 : index
    %c0_33 = arith.constant 0 : index
    %171 = vector.load %arg3[%c6, %c0_32, %c0_33] : memref<9x4x4xf32, #tpu.memory_space<vmem>>, vector<1x4x4xf32>
    %172 = vector.shape_cast %171 : vector<1x4x4xf32> to vector<4x4xf32>
    %173 = vector.extract_strided_slice %170 {offsets = [0, 0], sizes = [1, 648], strides = [1, 1]} : vector<4x648xf32> to vector<1x648xf32>
    %174 = vector.extract_strided_slice %172 {offsets = [0, 0], sizes = [4, 1], strides = [1, 1]} : vector<4x4xf32> to vector<4x1xf32>
    %175 = vector.broadcast %173 : vector<1x648xf32> to vector<4x648xf32>
    %176 = vector.broadcast %174 : vector<4x1xf32> to vector<4x648xf32>
    %177 = arith.mulf %175, %176 : vector<4x648xf32>
    %178 = arith.addf %169, %177 : vector<4x648xf32>
    %179 = vector.extract_strided_slice %170 {offsets = [1, 0], sizes = [1, 648], strides = [1, 1]} : vector<4x648xf32> to vector<1x648xf32>
    %180 = vector.extract_strided_slice %172 {offsets = [0, 1], sizes = [4, 1], strides = [1, 1]} : vector<4x4xf32> to vector<4x1xf32>
    %181 = vector.broadcast %179 : vector<1x648xf32> to vector<4x648xf32>
    %182 = vector.broadcast %180 : vector<4x1xf32> to vector<4x648xf32>
    %183 = arith.mulf %181, %182 : vector<4x648xf32>
    %184 = arith.addf %178, %183 : vector<4x648xf32>
    %185 = vector.extract_strided_slice %170 {offsets = [2, 0], sizes = [1, 648], strides = [1, 1]} : vector<4x648xf32> to vector<1x648xf32>
    %186 = vector.extract_strided_slice %172 {offsets = [0, 2], sizes = [4, 1], strides = [1, 1]} : vector<4x4xf32> to vector<4x1xf32>
    %187 = vector.broadcast %185 : vector<1x648xf32> to vector<4x648xf32>
    %188 = vector.broadcast %186 : vector<4x1xf32> to vector<4x648xf32>
    %189 = arith.mulf %187, %188 : vector<4x648xf32>
    %190 = arith.addf %184, %189 : vector<4x648xf32>
    %191 = vector.extract_strided_slice %170 {offsets = [3, 0], sizes = [1, 648], strides = [1, 1]} : vector<4x648xf32> to vector<1x648xf32>
    %192 = vector.extract_strided_slice %172 {offsets = [0, 3], sizes = [4, 1], strides = [1, 1]} : vector<4x4xf32> to vector<4x1xf32>
    %193 = vector.broadcast %191 : vector<1x648xf32> to vector<4x648xf32>
    %194 = vector.broadcast %192 : vector<4x1xf32> to vector<4x648xf32>
    %195 = arith.mulf %193, %194 : vector<4x648xf32>
    %196 = arith.addf %190, %195 : vector<4x648xf32>
    %c0_34 = arith.constant 0 : index
    %c37 = arith.constant 37 : index
    %197 = vector.load %arg10[%c0_34, %c37] : memref<4x686xf32, #tpu.memory_space<vmem>>, vector<4x648xf32>
    %c7 = arith.constant 7 : index
    %c0_35 = arith.constant 0 : index
    %c0_36 = arith.constant 0 : index
    %198 = vector.load %arg3[%c7, %c0_35, %c0_36] : memref<9x4x4xf32, #tpu.memory_space<vmem>>, vector<1x4x4xf32>
    %199 = vector.shape_cast %198 : vector<1x4x4xf32> to vector<4x4xf32>
    %200 = vector.extract_strided_slice %197 {offsets = [0, 0], sizes = [1, 648], strides = [1, 1]} : vector<4x648xf32> to vector<1x648xf32>
    %201 = vector.extract_strided_slice %199 {offsets = [0, 0], sizes = [4, 1], strides = [1, 1]} : vector<4x4xf32> to vector<4x1xf32>
    %202 = vector.broadcast %200 : vector<1x648xf32> to vector<4x648xf32>
    %203 = vector.broadcast %201 : vector<4x1xf32> to vector<4x648xf32>
    %204 = arith.mulf %202, %203 : vector<4x648xf32>
    %205 = arith.addf %196, %204 : vector<4x648xf32>
    %206 = vector.extract_strided_slice %197 {offsets = [1, 0], sizes = [1, 648], strides = [1, 1]} : vector<4x648xf32> to vector<1x648xf32>
    %207 = vector.extract_strided_slice %199 {offsets = [0, 1], sizes = [4, 1], strides = [1, 1]} : vector<4x4xf32> to vector<4x1xf32>
    %208 = vector.broadcast %206 : vector<1x648xf32> to vector<4x648xf32>
    %209 = vector.broadcast %207 : vector<4x1xf32> to vector<4x648xf32>
    %210 = arith.mulf %208, %209 : vector<4x648xf32>
    %211 = arith.addf %205, %210 : vector<4x648xf32>
    %212 = vector.extract_strided_slice %197 {offsets = [2, 0], sizes = [1, 648], strides = [1, 1]} : vector<4x648xf32> to vector<1x648xf32>
    %213 = vector.extract_strided_slice %199 {offsets = [0, 2], sizes = [4, 1], strides = [1, 1]} : vector<4x4xf32> to vector<4x1xf32>
    %214 = vector.broadcast %212 : vector<1x648xf32> to vector<4x648xf32>
    %215 = vector.broadcast %213 : vector<4x1xf32> to vector<4x648xf32>
    %216 = arith.mulf %214, %215 : vector<4x648xf32>
    %217 = arith.addf %211, %216 : vector<4x648xf32>
    %218 = vector.extract_strided_slice %197 {offsets = [3, 0], sizes = [1, 648], strides = [1, 1]} : vector<4x648xf32> to vector<1x648xf32>
    %219 = vector.extract_strided_slice %199 {offsets = [0, 3], sizes = [4, 1], strides = [1, 1]} : vector<4x4xf32> to vector<4x1xf32>
    %220 = vector.broadcast %218 : vector<1x648xf32> to vector<4x648xf32>
    %221 = vector.broadcast %219 : vector<4x1xf32> to vector<4x648xf32>
    %222 = arith.mulf %220, %221 : vector<4x648xf32>
    %223 = arith.addf %217, %222 : vector<4x648xf32>
    %c0_37 = arith.constant 0 : index
    %c38 = arith.constant 38 : index
    %224 = vector.load %arg10[%c0_37, %c38] : memref<4x686xf32, #tpu.memory_space<vmem>>, vector<4x648xf32>
    %c8 = arith.constant 8 : index
    %c0_38 = arith.constant 0 : index
    %c0_39 = arith.constant 0 : index
    %225 = vector.load %arg3[%c8, %c0_38, %c0_39] : memref<9x4x4xf32, #tpu.memory_space<vmem>>, vector<1x4x4xf32>
    %226 = vector.shape_cast %225 : vector<1x4x4xf32> to vector<4x4xf32>
    %227 = vector.extract_strided_slice %224 {offsets = [0, 0], sizes = [1, 648], strides = [1, 1]} : vector<4x648xf32> to vector<1x648xf32>
    %228 = vector.extract_strided_slice %226 {offsets = [0, 0], sizes = [4, 1], strides = [1, 1]} : vector<4x4xf32> to vector<4x1xf32>
    %229 = vector.broadcast %227 : vector<1x648xf32> to vector<4x648xf32>
    %230 = vector.broadcast %228 : vector<4x1xf32> to vector<4x648xf32>
    %231 = arith.mulf %229, %230 : vector<4x648xf32>
    %232 = arith.addf %223, %231 : vector<4x648xf32>
    %233 = vector.extract_strided_slice %224 {offsets = [1, 0], sizes = [1, 648], strides = [1, 1]} : vector<4x648xf32> to vector<1x648xf32>
    %234 = vector.extract_strided_slice %226 {offsets = [0, 1], sizes = [4, 1], strides = [1, 1]} : vector<4x4xf32> to vector<4x1xf32>
    %235 = vector.broadcast %233 : vector<1x648xf32> to vector<4x648xf32>
    %236 = vector.broadcast %234 : vector<4x1xf32> to vector<4x648xf32>
    %237 = arith.mulf %235, %236 : vector<4x648xf32>
    %238 = arith.addf %232, %237 : vector<4x648xf32>
    %239 = vector.extract_strided_slice %224 {offsets = [2, 0], sizes = [1, 648], strides = [1, 1]} : vector<4x648xf32> to vector<1x648xf32>
    %240 = vector.extract_strided_slice %226 {offsets = [0, 2], sizes = [4, 1], strides = [1, 1]} : vector<4x4xf32> to vector<4x1xf32>
    %241 = vector.broadcast %239 : vector<1x648xf32> to vector<4x648xf32>
    %242 = vector.broadcast %240 : vector<4x1xf32> to vector<4x648xf32>
    %243 = arith.mulf %241, %242 : vector<4x648xf32>
    %244 = arith.addf %238, %243 : vector<4x648xf32>
    %245 = vector.extract_strided_slice %224 {offsets = [3, 0], sizes = [1, 648], strides = [1, 1]} : vector<4x648xf32> to vector<1x648xf32>
    %246 = vector.extract_strided_slice %226 {offsets = [0, 3], sizes = [4, 1], strides = [1, 1]} : vector<4x4xf32> to vector<4x1xf32>
    %247 = vector.broadcast %245 : vector<1x648xf32> to vector<4x648xf32>
    %248 = vector.broadcast %246 : vector<4x1xf32> to vector<4x648xf32>
    %249 = arith.mulf %247, %248 : vector<4x648xf32>
    %250 = arith.addf %244, %249 : vector<4x648xf32>
    %c0_40 = arith.constant 0 : index
    %c0_41 = arith.constant 0 : index
    %251 = vector.load %arg4[%c0_40, %c0_41] : memref<4x1xf32, #tpu.memory_space<vmem>>, vector<4x1xf32>
    %252 = vector.broadcast %251 : vector<4x1xf32> to vector<4x648xf32>
    %253 = arith.addf %250, %252 : vector<4x648xf32>
    %cst_42 = arith.constant 0.000000e+00 : f32
    %254 = vector.broadcast %cst_42 : f32 to vector<4x648xf32>
    %255 = arith.cmpf oge, %253, %254 : vector<4x648xf32>
    %c0_43 = arith.constant 0 : index
    %c0_44 = arith.constant 0 : index
    %256 = vector.load %arg5[%c0_43, %c0_44] : memref<4x1xf32, #tpu.memory_space<vmem>>, vector<4x1xf32>
    %257 = vector.broadcast %256 : vector<4x1xf32> to vector<4x648xf32>
    %258 = arith.mulf %257, %253 : vector<4x648xf32>
    %259 = arith.select %255, %253, %258 : vector<4x648xi1>, vector<4x648xf32>
    %cst_45 = arith.constant 0.000000e+00 : f32
    %260 = vector.shape_cast %2 : vector<1x648xi1> to vector<1x648xi1>
    %261 = vector.broadcast %260 : vector<1x648xi1> to vector<4x648xi1>
    %262 = vector.broadcast %cst_45 : f32 to vector<4x648xf32>
    %263 = arith.select %261, %259, %262 : vector<4x648xi1>, vector<4x648xf32>
    %c0_46 = arith.constant 0 : index
    %c19_47 = arith.constant 19 : index
    %264 = vector.load %arg10[%c0_46, %c19_47] : memref<4x686xf32, #tpu.memory_space<vmem>>, vector<4x648xf32>
    tpu.vector_store %arg10[%c0_46, %c19_47], %263 {strides = array<i32>} : memref<4x686xf32, #tpu.memory_space<vmem>>, vector<4x648xf32>,
    %cst_48 = arith.constant 0.000000e+00 : f32
    %265 = vector.broadcast %cst_48 : f32 to vector<4x648xf32>
    %c0_49 = arith.constant 0 : index
    %c0_50 = arith.constant 0 : index
    %266 = vector.load %arg10[%c0_49, %c0_50] : memref<4x686xf32, #tpu.memory_space<vmem>>, vector<4x648xf32>
    %c0_51 = arith.constant 0 : index
    %c0_52 = arith.constant 0 : index
    %c0_53 = arith.constant 0 : index
    %267 = vector.load %arg6[%c0_51, %c0_52, %c0_53] : memref<9x4x4xf32, #tpu.memory_space<vmem>>, vector<1x4x4xf32>
    %268 = vector.shape_cast %267 : vector<1x4x4xf32> to vector<4x4xf32>
    %269 = vector.extract_strided_slice %266 {offsets = [0, 0], sizes = [1, 648], strides = [1, 1]} : vector<4x648xf32> to vector<1x648xf32>
    %270 = vector.extract_strided_slice %268 {offsets = [0, 0], sizes = [4, 1], strides = [1, 1]} : vector<4x4xf32> to vector<4x1xf32>
    %271 = vector.broadcast %269 : vector<1x648xf32> to vector<4x648xf32>
    %272 = vector.broadcast %270 : vector<4x1xf32> to vector<4x648xf32>
    %273 = arith.mulf %271, %272 : vector<4x648xf32>
    %274 = arith.addf %265, %273 : vector<4x648xf32>
    %275 = vector.extract_strided_slice %266 {offsets = [1, 0], sizes = [1, 648], strides = [1, 1]} : vector<4x648xf32> to vector<1x648xf32>
    %276 = vector.extract_strided_slice %268 {offsets = [0, 1], sizes = [4, 1], strides = [1, 1]} : vector<4x4xf32> to vector<4x1xf32>
    %277 = vector.broadcast %275 : vector<1x648xf32> to vector<4x648xf32>
    %278 = vector.broadcast %276 : vector<4x1xf32> to vector<4x648xf32>
    %279 = arith.mulf %277, %278 : vector<4x648xf32>
    %280 = arith.addf %274, %279 : vector<4x648xf32>
    %281 = vector.extract_strided_slice %266 {offsets = [2, 0], sizes = [1, 648], strides = [1, 1]} : vector<4x648xf32> to vector<1x648xf32>
    %282 = vector.extract_strided_slice %268 {offsets = [0, 2], sizes = [4, 1], strides = [1, 1]} : vector<4x4xf32> to vector<4x1xf32>
    %283 = vector.broadcast %281 : vector<1x648xf32> to vector<4x648xf32>
    %284 = vector.broadcast %282 : vector<4x1xf32> to vector<4x648xf32>
    %285 = arith.mulf %283, %284 : vector<4x648xf32>
    %286 = arith.addf %280, %285 : vector<4x648xf32>
    %287 = vector.extract_strided_slice %266 {offsets = [3, 0], sizes = [1, 648], strides = [1, 1]} : vector<4x648xf32> to vector<1x648xf32>
    %288 = vector.extract_strided_slice %268 {offsets = [0, 3], sizes = [4, 1], strides = [1, 1]} : vector<4x4xf32> to vector<4x1xf32>
    %289 = vector.broadcast %287 : vector<1x648xf32> to vector<4x648xf32>
    %290 = vector.broadcast %288 : vector<4x1xf32> to vector<4x648xf32>
    %291 = arith.mulf %289, %290 : vector<4x648xf32>
    %292 = arith.addf %286, %291 : vector<4x648xf32>
    %c0_54 = arith.constant 0 : index
    %c1_55 = arith.constant 1 : index
    %293 = vector.load %arg10[%c0_54, %c1_55] : memref<4x686xf32, #tpu.memory_space<vmem>>, vector<4x648xf32>
    %c1_56 = arith.constant 1 : index
    %c0_57 = arith.constant 0 : index
    %c0_58 = arith.constant 0 : index
    %294 = vector.load %arg6[%c1_56, %c0_57, %c0_58] : memref<9x4x4xf32, #tpu.memory_space<vmem>>, vector<1x4x4xf32>
    %295 = vector.shape_cast %294 : vector<1x4x4xf32> to vector<4x4xf32>
    %296 = vector.extract_strided_slice %293 {offsets = [0, 0], sizes = [1, 648], strides = [1, 1]} : vector<4x648xf32> to vector<1x648xf32>
    %297 = vector.extract_strided_slice %295 {offsets = [0, 0], sizes = [4, 1], strides = [1, 1]} : vector<4x4xf32> to vector<4x1xf32>
    %298 = vector.broadcast %296 : vector<1x648xf32> to vector<4x648xf32>
    %299 = vector.broadcast %297 : vector<4x1xf32> to vector<4x648xf32>
    %300 = arith.mulf %298, %299 : vector<4x648xf32>
    %301 = arith.addf %292, %300 : vector<4x648xf32>
    %302 = vector.extract_strided_slice %293 {offsets = [1, 0], sizes = [1, 648], strides = [1, 1]} : vector<4x648xf32> to vector<1x648xf32>
    %303 = vector.extract_strided_slice %295 {offsets = [0, 1], sizes = [4, 1], strides = [1, 1]} : vector<4x4xf32> to vector<4x1xf32>
    %304 = vector.broadcast %302 : vector<1x648xf32> to vector<4x648xf32>
    %305 = vector.broadcast %303 : vector<4x1xf32> to vector<4x648xf32>
    %306 = arith.mulf %304, %305 : vector<4x648xf32>
    %307 = arith.addf %301, %306 : vector<4x648xf32>
    %308 = vector.extract_strided_slice %293 {offsets = [2, 0], sizes = [1, 648], strides = [1, 1]} : vector<4x648xf32> to vector<1x648xf32>
    %309 = vector.extract_strided_slice %295 {offsets = [0, 2], sizes = [4, 1], strides = [1, 1]} : vector<4x4xf32> to vector<4x1xf32>
    %310 = vector.broadcast %308 : vector<1x648xf32> to vector<4x648xf32>
    %311 = vector.broadcast %309 : vector<4x1xf32> to vector<4x648xf32>
    %312 = arith.mulf %310, %311 : vector<4x648xf32>
    %313 = arith.addf %307, %312 : vector<4x648xf32>
    %314 = vector.extract_strided_slice %293 {offsets = [3, 0], sizes = [1, 648], strides = [1, 1]} : vector<4x648xf32> to vector<1x648xf32>
    %315 = vector.extract_strided_slice %295 {offsets = [0, 3], sizes = [4, 1], strides = [1, 1]} : vector<4x4xf32> to vector<4x1xf32>
    %316 = vector.broadcast %314 : vector<1x648xf32> to vector<4x648xf32>
    %317 = vector.broadcast %315 : vector<4x1xf32> to vector<4x648xf32>
    %318 = arith.mulf %316, %317 : vector<4x648xf32>
    %319 = arith.addf %313, %318 : vector<4x648xf32>
    %c0_59 = arith.constant 0 : index
    %c2_60 = arith.constant 2 : index
    %320 = vector.load %arg10[%c0_59, %c2_60] : memref<4x686xf32, #tpu.memory_space<vmem>>, vector<4x648xf32>
    %c2_61 = arith.constant 2 : index
    %c0_62 = arith.constant 0 : index
    %c0_63 = arith.constant 0 : index
    %321 = vector.load %arg6[%c2_61, %c0_62, %c0_63] : memref<9x4x4xf32, #tpu.memory_space<vmem>>, vector<1x4x4xf32>
    %322 = vector.shape_cast %321 : vector<1x4x4xf32> to vector<4x4xf32>
    %323 = vector.extract_strided_slice %320 {offsets = [0, 0], sizes = [1, 648], strides = [1, 1]} : vector<4x648xf32> to vector<1x648xf32>
    %324 = vector.extract_strided_slice %322 {offsets = [0, 0], sizes = [4, 1], strides = [1, 1]} : vector<4x4xf32> to vector<4x1xf32>
    %325 = vector.broadcast %323 : vector<1x648xf32> to vector<4x648xf32>
    %326 = vector.broadcast %324 : vector<4x1xf32> to vector<4x648xf32>
    %327 = arith.mulf %325, %326 : vector<4x648xf32>
    %328 = arith.addf %319, %327 : vector<4x648xf32>
    %329 = vector.extract_strided_slice %320 {offsets = [1, 0], sizes = [1, 648], strides = [1, 1]} : vector<4x648xf32> to vector<1x648xf32>
    %330 = vector.extract_strided_slice %322 {offsets = [0, 1], sizes = [4, 1], strides = [1, 1]} : vector<4x4xf32> to vector<4x1xf32>
    %331 = vector.broadcast %329 : vector<1x648xf32> to vector<4x648xf32>
    %332 = vector.broadcast %330 : vector<4x1xf32> to vector<4x648xf32>
    %333 = arith.mulf %331, %332 : vector<4x648xf32>
    %334 = arith.addf %328, %333 : vector<4x648xf32>
    %335 = vector.extract_strided_slice %320 {offsets = [2, 0], sizes = [1, 648], strides = [1, 1]} : vector<4x648xf32> to vector<1x648xf32>
    %336 = vector.extract_strided_slice %322 {offsets = [0, 2], sizes = [4, 1], strides = [1, 1]} : vector<4x4xf32> to vector<4x1xf32>
    %337 = vector.broadcast %335 : vector<1x648xf32> to vector<4x648xf32>
    %338 = vector.broadcast %336 : vector<4x1xf32> to vector<4x648xf32>
    %339 = arith.mulf %337, %338 : vector<4x648xf32>
    %340 = arith.addf %334, %339 : vector<4x648xf32>
    %341 = vector.extract_strided_slice %320 {offsets = [3, 0], sizes = [1, 648], strides = [1, 1]} : vector<4x648xf32> to vector<1x648xf32>
    %342 = vector.extract_strided_slice %322 {offsets = [0, 3], sizes = [4, 1], strides = [1, 1]} : vector<4x4xf32> to vector<4x1xf32>
    %343 = vector.broadcast %341 : vector<1x648xf32> to vector<4x648xf32>
    %344 = vector.broadcast %342 : vector<4x1xf32> to vector<4x648xf32>
    %345 = arith.mulf %343, %344 : vector<4x648xf32>
    %346 = arith.addf %340, %345 : vector<4x648xf32>
    %c0_64 = arith.constant 0 : index
    %c18_65 = arith.constant 18 : index
    %347 = vector.load %arg10[%c0_64, %c18_65] : memref<4x686xf32, #tpu.memory_space<vmem>>, vector<4x648xf32>
    %c3_66 = arith.constant 3 : index
    %c0_67 = arith.constant 0 : index
    %c0_68 = arith.constant 0 : index
    %348 = vector.load %arg6[%c3_66, %c0_67, %c0_68] : memref<9x4x4xf32, #tpu.memory_space<vmem>>, vector<1x4x4xf32>
    %349 = vector.shape_cast %348 : vector<1x4x4xf32> to vector<4x4xf32>
    %350 = vector.extract_strided_slice %347 {offsets = [0, 0], sizes = [1, 648], strides = [1, 1]} : vector<4x648xf32> to vector<1x648xf32>
    %351 = vector.extract_strided_slice %349 {offsets = [0, 0], sizes = [4, 1], strides = [1, 1]} : vector<4x4xf32> to vector<4x1xf32>
    %352 = vector.broadcast %350 : vector<1x648xf32> to vector<4x648xf32>
    %353 = vector.broadcast %351 : vector<4x1xf32> to vector<4x648xf32>
    %354 = arith.mulf %352, %353 : vector<4x648xf32>
    %355 = arith.addf %346, %354 : vector<4x648xf32>
    %356 = vector.extract_strided_slice %347 {offsets = [1, 0], sizes = [1, 648], strides = [1, 1]} : vector<4x648xf32> to vector<1x648xf32>
    %357 = vector.extract_strided_slice %349 {offsets = [0, 1], sizes = [4, 1], strides = [1, 1]} : vector<4x4xf32> to vector<4x1xf32>
    %358 = vector.broadcast %356 : vector<1x648xf32> to vector<4x648xf32>
    %359 = vector.broadcast %357 : vector<4x1xf32> to vector<4x648xf32>
    %360 = arith.mulf %358, %359 : vector<4x648xf32>
    %361 = arith.addf %355, %360 : vector<4x648xf32>
    %362 = vector.extract_strided_slice %347 {offsets = [2, 0], sizes = [1, 648], strides = [1, 1]} : vector<4x648xf32> to vector<1x648xf32>
    %363 = vector.extract_strided_slice %349 {offsets = [0, 2], sizes = [4, 1], strides = [1, 1]} : vector<4x4xf32> to vector<4x1xf32>
    %364 = vector.broadcast %362 : vector<1x648xf32> to vector<4x648xf32>
    %365 = vector.broadcast %363 : vector<4x1xf32> to vector<4x648xf32>
    %366 = arith.mulf %364, %365 : vector<4x648xf32>
    %367 = arith.addf %361, %366 : vector<4x648xf32>
    %368 = vector.extract_strided_slice %347 {offsets = [3, 0], sizes = [1, 648], strides = [1, 1]} : vector<4x648xf32> to vector<1x648xf32>
    %369 = vector.extract_strided_slice %349 {offsets = [0, 3], sizes = [4, 1], strides = [1, 1]} : vector<4x4xf32> to vector<4x1xf32>
    %370 = vector.broadcast %368 : vector<1x648xf32> to vector<4x648xf32>
    %371 = vector.broadcast %369 : vector<4x1xf32> to vector<4x648xf32>
    %372 = arith.mulf %370, %371 : vector<4x648xf32>
    %373 = arith.addf %367, %372 : vector<4x648xf32>
    %c0_69 = arith.constant 0 : index
    %c19_70 = arith.constant 19 : index
    %374 = vector.load %arg10[%c0_69, %c19_70] : memref<4x686xf32, #tpu.memory_space<vmem>>, vector<4x648xf32>
    %c4_71 = arith.constant 4 : index
    %c0_72 = arith.constant 0 : index
    %c0_73 = arith.constant 0 : index
    %375 = vector.load %arg6[%c4_71, %c0_72, %c0_73] : memref<9x4x4xf32, #tpu.memory_space<vmem>>, vector<1x4x4xf32>
    %376 = vector.shape_cast %375 : vector<1x4x4xf32> to vector<4x4xf32>
    %377 = vector.extract_strided_slice %374 {offsets = [0, 0], sizes = [1, 648], strides = [1, 1]} : vector<4x648xf32> to vector<1x648xf32>
    %378 = vector.extract_strided_slice %376 {offsets = [0, 0], sizes = [4, 1], strides = [1, 1]} : vector<4x4xf32> to vector<4x1xf32>
    %379 = vector.broadcast %377 : vector<1x648xf32> to vector<4x648xf32>
    %380 = vector.broadcast %378 : vector<4x1xf32> to vector<4x648xf32>
    %381 = arith.mulf %379, %380 : vector<4x648xf32>
    %382 = arith.addf %373, %381 : vector<4x648xf32>
    %383 = vector.extract_strided_slice %374 {offsets = [1, 0], sizes = [1, 648], strides = [1, 1]} : vector<4x648xf32> to vector<1x648xf32>
    %384 = vector.extract_strided_slice %376 {offsets = [0, 1], sizes = [4, 1], strides = [1, 1]} : vector<4x4xf32> to vector<4x1xf32>
    %385 = vector.broadcast %383 : vector<1x648xf32> to vector<4x648xf32>
    %386 = vector.broadcast %384 : vector<4x1xf32> to vector<4x648xf32>
    %387 = arith.mulf %385, %386 : vector<4x648xf32>
    %388 = arith.addf %382, %387 : vector<4x648xf32>
    %389 = vector.extract_strided_slice %374 {offsets = [2, 0], sizes = [1, 648], strides = [1, 1]} : vector<4x648xf32> to vector<1x648xf32>
    %390 = vector.extract_strided_slice %376 {offsets = [0, 2], sizes = [4, 1], strides = [1, 1]} : vector<4x4xf32> to vector<4x1xf32>
    %391 = vector.broadcast %389 : vector<1x648xf32> to vector<4x648xf32>
    %392 = vector.broadcast %390 : vector<4x1xf32> to vector<4x648xf32>
    %393 = arith.mulf %391, %392 : vector<4x648xf32>
    %394 = arith.addf %388, %393 : vector<4x648xf32>
    %395 = vector.extract_strided_slice %374 {offsets = [3, 0], sizes = [1, 648], strides = [1, 1]} : vector<4x648xf32> to vector<1x648xf32>
    %396 = vector.extract_strided_slice %376 {offsets = [0, 3], sizes = [4, 1], strides = [1, 1]} : vector<4x4xf32> to vector<4x1xf32>
    %397 = vector.broadcast %395 : vector<1x648xf32> to vector<4x648xf32>
    %398 = vector.broadcast %396 : vector<4x1xf32> to vector<4x648xf32>
    %399 = arith.mulf %397, %398 : vector<4x648xf32>
    %400 = arith.addf %394, %399 : vector<4x648xf32>
    %c0_74 = arith.constant 0 : index
    %c20_75 = arith.constant 20 : index
    %401 = vector.load %arg10[%c0_74, %c20_75] : memref<4x686xf32, #tpu.memory_space<vmem>>, vector<4x648xf32>
    %c5_76 = arith.constant 5 : index
    %c0_77 = arith.constant 0 : index
    %c0_78 = arith.constant 0 : index
    %402 = vector.load %arg6[%c5_76, %c0_77, %c0_78] : memref<9x4x4xf32, #tpu.memory_space<vmem>>, vector<1x4x4xf32>
    %403 = vector.shape_cast %402 : vector<1x4x4xf32> to vector<4x4xf32>
    %404 = vector.extract_strided_slice %401 {offsets = [0, 0], sizes = [1, 648], strides = [1, 1]} : vector<4x648xf32> to vector<1x648xf32>
    %405 = vector.extract_strided_slice %403 {offsets = [0, 0], sizes = [4, 1], strides = [1, 1]} : vector<4x4xf32> to vector<4x1xf32>
    %406 = vector.broadcast %404 : vector<1x648xf32> to vector<4x648xf32>
    %407 = vector.broadcast %405 : vector<4x1xf32> to vector<4x648xf32>
    %408 = arith.mulf %406, %407 : vector<4x648xf32>
    %409 = arith.addf %400, %408 : vector<4x648xf32>
    %410 = vector.extract_strided_slice %401 {offsets = [1, 0], sizes = [1, 648], strides = [1, 1]} : vector<4x648xf32> to vector<1x648xf32>
    %411 = vector.extract_strided_slice %403 {offsets = [0, 1], sizes = [4, 1], strides = [1, 1]} : vector<4x4xf32> to vector<4x1xf32>
    %412 = vector.broadcast %410 : vector<1x648xf32> to vector<4x648xf32>
    %413 = vector.broadcast %411 : vector<4x1xf32> to vector<4x648xf32>
    %414 = arith.mulf %412, %413 : vector<4x648xf32>
    %415 = arith.addf %409, %414 : vector<4x648xf32>
    %416 = vector.extract_strided_slice %401 {offsets = [2, 0], sizes = [1, 648], strides = [1, 1]} : vector<4x648xf32> to vector<1x648xf32>
    %417 = vector.extract_strided_slice %403 {offsets = [0, 2], sizes = [4, 1], strides = [1, 1]} : vector<4x4xf32> to vector<4x1xf32>
    %418 = vector.broadcast %416 : vector<1x648xf32> to vector<4x648xf32>
    %419 = vector.broadcast %417 : vector<4x1xf32> to vector<4x648xf32>
    %420 = arith.mulf %418, %419 : vector<4x648xf32>
    %421 = arith.addf %415, %420 : vector<4x648xf32>
    %422 = vector.extract_strided_slice %401 {offsets = [3, 0], sizes = [1, 648], strides = [1, 1]} : vector<4x648xf32> to vector<1x648xf32>
    %423 = vector.extract_strided_slice %403 {offsets = [0, 3], sizes = [4, 1], strides = [1, 1]} : vector<4x4xf32> to vector<4x1xf32>
    %424 = vector.broadcast %422 : vector<1x648xf32> to vector<4x648xf32>
    %425 = vector.broadcast %423 : vector<4x1xf32> to vector<4x648xf32>
    %426 = arith.mulf %424, %425 : vector<4x648xf32>
    %427 = arith.addf %421, %426 : vector<4x648xf32>
    %c0_79 = arith.constant 0 : index
    %c36_80 = arith.constant 36 : index
    %428 = vector.load %arg10[%c0_79, %c36_80] : memref<4x686xf32, #tpu.memory_space<vmem>>, vector<4x648xf32>
    %c6_81 = arith.constant 6 : index
    %c0_82 = arith.constant 0 : index
    %c0_83 = arith.constant 0 : index
    %429 = vector.load %arg6[%c6_81, %c0_82, %c0_83] : memref<9x4x4xf32, #tpu.memory_space<vmem>>, vector<1x4x4xf32>
    %430 = vector.shape_cast %429 : vector<1x4x4xf32> to vector<4x4xf32>
    %431 = vector.extract_strided_slice %428 {offsets = [0, 0], sizes = [1, 648], strides = [1, 1]} : vector<4x648xf32> to vector<1x648xf32>
    %432 = vector.extract_strided_slice %430 {offsets = [0, 0], sizes = [4, 1], strides = [1, 1]} : vector<4x4xf32> to vector<4x1xf32>
    %433 = vector.broadcast %431 : vector<1x648xf32> to vector<4x648xf32>
    %434 = vector.broadcast %432 : vector<4x1xf32> to vector<4x648xf32>
    %435 = arith.mulf %433, %434 : vector<4x648xf32>
    %436 = arith.addf %427, %435 : vector<4x648xf32>
    %437 = vector.extract_strided_slice %428 {offsets = [1, 0], sizes = [1, 648], strides = [1, 1]} : vector<4x648xf32> to vector<1x648xf32>
    %438 = vector.extract_strided_slice %430 {offsets = [0, 1], sizes = [4, 1], strides = [1, 1]} : vector<4x4xf32> to vector<4x1xf32>
    %439 = vector.broadcast %437 : vector<1x648xf32> to vector<4x648xf32>
    %440 = vector.broadcast %438 : vector<4x1xf32> to vector<4x648xf32>
    %441 = arith.mulf %439, %440 : vector<4x648xf32>
    %442 = arith.addf %436, %441 : vector<4x648xf32>
    %443 = vector.extract_strided_slice %428 {offsets = [2, 0], sizes = [1, 648], strides = [1, 1]} : vector<4x648xf32> to vector<1x648xf32>
    %444 = vector.extract_strided_slice %430 {offsets = [0, 2], sizes = [4, 1], strides = [1, 1]} : vector<4x4xf32> to vector<4x1xf32>
    %445 = vector.broadcast %443 : vector<1x648xf32> to vector<4x648xf32>
    %446 = vector.broadcast %444 : vector<4x1xf32> to vector<4x648xf32>
    %447 = arith.mulf %445, %446 : vector<4x648xf32>
    %448 = arith.addf %442, %447 : vector<4x648xf32>
    %449 = vector.extract_strided_slice %428 {offsets = [3, 0], sizes = [1, 648], strides = [1, 1]} : vector<4x648xf32> to vector<1x648xf32>
    %450 = vector.extract_strided_slice %430 {offsets = [0, 3], sizes = [4, 1], strides = [1, 1]} : vector<4x4xf32> to vector<4x1xf32>
    %451 = vector.broadcast %449 : vector<1x648xf32> to vector<4x648xf32>
    %452 = vector.broadcast %450 : vector<4x1xf32> to vector<4x648xf32>
    %453 = arith.mulf %451, %452 : vector<4x648xf32>
    %454 = arith.addf %448, %453 : vector<4x648xf32>
    %c0_84 = arith.constant 0 : index
    %c37_85 = arith.constant 37 : index
    %455 = vector.load %arg10[%c0_84, %c37_85] : memref<4x686xf32, #tpu.memory_space<vmem>>, vector<4x648xf32>
    %c7_86 = arith.constant 7 : index
    %c0_87 = arith.constant 0 : index
    %c0_88 = arith.constant 0 : index
    %456 = vector.load %arg6[%c7_86, %c0_87, %c0_88] : memref<9x4x4xf32, #tpu.memory_space<vmem>>, vector<1x4x4xf32>
    %457 = vector.shape_cast %456 : vector<1x4x4xf32> to vector<4x4xf32>
    %458 = vector.extract_strided_slice %455 {offsets = [0, 0], sizes = [1, 648], strides = [1, 1]} : vector<4x648xf32> to vector<1x648xf32>
    %459 = vector.extract_strided_slice %457 {offsets = [0, 0], sizes = [4, 1], strides = [1, 1]} : vector<4x4xf32> to vector<4x1xf32>
    %460 = vector.broadcast %458 : vector<1x648xf32> to vector<4x648xf32>
    %461 = vector.broadcast %459 : vector<4x1xf32> to vector<4x648xf32>
    %462 = arith.mulf %460, %461 : vector<4x648xf32>
    %463 = arith.addf %454, %462 : vector<4x648xf32>
    %464 = vector.extract_strided_slice %455 {offsets = [1, 0], sizes = [1, 648], strides = [1, 1]} : vector<4x648xf32> to vector<1x648xf32>
    %465 = vector.extract_strided_slice %457 {offsets = [0, 1], sizes = [4, 1], strides = [1, 1]} : vector<4x4xf32> to vector<4x1xf32>
    %466 = vector.broadcast %464 : vector<1x648xf32> to vector<4x648xf32>
    %467 = vector.broadcast %465 : vector<4x1xf32> to vector<4x648xf32>
    %468 = arith.mulf %466, %467 : vector<4x648xf32>
    %469 = arith.addf %463, %468 : vector<4x648xf32>
    %470 = vector.extract_strided_slice %455 {offsets = [2, 0], sizes = [1, 648], strides = [1, 1]} : vector<4x648xf32> to vector<1x648xf32>
    %471 = vector.extract_strided_slice %457 {offsets = [0, 2], sizes = [4, 1], strides = [1, 1]} : vector<4x4xf32> to vector<4x1xf32>
    %472 = vector.broadcast %470 : vector<1x648xf32> to vector<4x648xf32>
    %473 = vector.broadcast %471 : vector<4x1xf32> to vector<4x648xf32>
    %474 = arith.mulf %472, %473 : vector<4x648xf32>
    %475 = arith.addf %469, %474 : vector<4x648xf32>
    %476 = vector.extract_strided_slice %455 {offsets = [3, 0], sizes = [1, 648], strides = [1, 1]} : vector<4x648xf32> to vector<1x648xf32>
    %477 = vector.extract_strided_slice %457 {offsets = [0, 3], sizes = [4, 1], strides = [1, 1]} : vector<4x4xf32> to vector<4x1xf32>
    %478 = vector.broadcast %476 : vector<1x648xf32> to vector<4x648xf32>
    %479 = vector.broadcast %477 : vector<4x1xf32> to vector<4x648xf32>
    %480 = arith.mulf %478, %479 : vector<4x648xf32>
    %481 = arith.addf %475, %480 : vector<4x648xf32>
    %c0_89 = arith.constant 0 : index
    %c38_90 = arith.constant 38 : index
    %482 = vector.load %arg10[%c0_89, %c38_90] : memref<4x686xf32, #tpu.memory_space<vmem>>, vector<4x648xf32>
    %c8_91 = arith.constant 8 : index
    %c0_92 = arith.constant 0 : index
    %c0_93 = arith.constant 0 : index
    %483 = vector.load %arg6[%c8_91, %c0_92, %c0_93] : memref<9x4x4xf32, #tpu.memory_space<vmem>>, vector<1x4x4xf32>
    %484 = vector.shape_cast %483 : vector<1x4x4xf32> to vector<4x4xf32>
    %485 = vector.extract_strided_slice %482 {offsets = [0, 0], sizes = [1, 648], strides = [1, 1]} : vector<4x648xf32> to vector<1x648xf32>
    %486 = vector.extract_strided_slice %484 {offsets = [0, 0], sizes = [4, 1], strides = [1, 1]} : vector<4x4xf32> to vector<4x1xf32>
    %487 = vector.broadcast %485 : vector<1x648xf32> to vector<4x648xf32>
    %488 = vector.broadcast %486 : vector<4x1xf32> to vector<4x648xf32>
    %489 = arith.mulf %487, %488 : vector<4x648xf32>
    %490 = arith.addf %481, %489 : vector<4x648xf32>
    %491 = vector.extract_strided_slice %482 {offsets = [1, 0], sizes = [1, 648], strides = [1, 1]} : vector<4x648xf32> to vector<1x648xf32>
    %492 = vector.extract_strided_slice %484 {offsets = [0, 1], sizes = [4, 1], strides = [1, 1]} : vector<4x4xf32> to vector<4x1xf32>
    %493 = vector.broadcast %491 : vector<1x648xf32> to vector<4x648xf32>
    %494 = vector.broadcast %492 : vector<4x1xf32> to vector<4x648xf32>
    %495 = arith.mulf %493, %494 : vector<4x648xf32>
    %496 = arith.addf %490, %495 : vector<4x648xf32>
    %497 = vector.extract_strided_slice %482 {offsets = [2, 0], sizes = [1, 648], strides = [1, 1]} : vector<4x648xf32> to vector<1x648xf32>
    %498 = vector.extract_strided_slice %484 {offsets = [0, 2], sizes = [4, 1], strides = [1, 1]} : vector<4x4xf32> to vector<4x1xf32>
    %499 = vector.broadcast %497 : vector<1x648xf32> to vector<4x648xf32>
    %500 = vector.broadcast %498 : vector<4x1xf32> to vector<4x648xf32>
    %501 = arith.mulf %499, %500 : vector<4x648xf32>
    %502 = arith.addf %496, %501 : vector<4x648xf32>
    %503 = vector.extract_strided_slice %482 {offsets = [3, 0], sizes = [1, 648], strides = [1, 1]} : vector<4x648xf32> to vector<1x648xf32>
    %504 = vector.extract_strided_slice %484 {offsets = [0, 3], sizes = [4, 1], strides = [1, 1]} : vector<4x4xf32> to vector<4x1xf32>
    %505 = vector.broadcast %503 : vector<1x648xf32> to vector<4x648xf32>
    %506 = vector.broadcast %504 : vector<4x1xf32> to vector<4x648xf32>
    %507 = arith.mulf %505, %506 : vector<4x648xf32>
    %508 = arith.addf %502, %507 : vector<4x648xf32>
    %c0_94 = arith.constant 0 : index
    %c0_95 = arith.constant 0 : index
    %509 = vector.load %arg7[%c0_94, %c0_95] : memref<4x1xf32, #tpu.memory_space<vmem>>, vector<4x1xf32>
    %510 = vector.broadcast %509 : vector<4x1xf32> to vector<4x648xf32>
    %511 = arith.addf %508, %510 : vector<4x648xf32>
    %512 = arith.addf %511, %263 : vector<4x648xf32>
    %cst_96 = arith.constant 0.000000e+00 : f32
    %513 = vector.broadcast %cst_96 : f32 to vector<4x648xf32>
    %514 = arith.cmpf oge, %512, %513 : vector<4x648xf32>
    %c0_97 = arith.constant 0 : index
    %c0_98 = arith.constant 0 : index
    %515 = vector.load %arg8[%c0_97, %c0_98] : memref<4x1xf32, #tpu.memory_space<vmem>>, vector<4x1xf32>
    %516 = vector.broadcast %515 : vector<4x1xf32> to vector<4x648xf32>
    %517 = arith.mulf %516, %512 : vector<4x648xf32>
    %518 = arith.select %514, %512, %517 : vector<4x648xi1>, vector<4x648xf32>
    %cst_99 = arith.constant 0.000000e+00 : f32
    %519 = vector.shape_cast %2 : vector<1x648xi1> to vector<1x648xi1>
    %520 = vector.broadcast %519 : vector<1x648xi1> to vector<4x648xi1>
    %521 = vector.broadcast %cst_99 : f32 to vector<4x648xf32>
    %522 = arith.select %520, %518, %521 : vector<4x648xi1>, vector<4x648xf32>
    %c0_100 = arith.constant 0 : index
    %c0_101 = arith.constant 0 : index
    %523 = vector.load %arg9[%c0_100, %c0_101] : memref<4x648xf32, #tpu.memory_space<vmem>>, vector<4x648xf32>
    tpu.vector_store %arg9[%c0_100, %c0_101], %522 {strides = array<i32>} : memref<4x648xf32, #tpu.memory_space<vmem>>, vector<4x648xf32>,
    return
  }
  func.func @transform_0(%arg0: i32) -> (i32, i32) {
    %c0_i32 = arith.constant 0 : i32
    %c0_i32_0 = arith.constant 0 : i32
    %c0_i32_1 = arith.constant 0 : i32
    return %c0_i32, %c0_i32_0 : i32, i32
  }
  func.func @transform_1(%arg0: i32) -> (i32, i32) {
    %c0_i32 = arith.constant 0 : i32
    %c0_i32_0 = arith.constant 0 : i32
    %c0_i32_1 = arith.constant 0 : i32
    return %c0_i32, %c0_i32_0 : i32, i32
  }
  func.func @transform_2(%arg0: i32) -> (i32, i32, i32) {
    %c0_i32 = arith.constant 0 : i32
    %c0_i32_0 = arith.constant 0 : i32
    %c0_i32_1 = arith.constant 0 : i32
    %c0_i32_2 = arith.constant 0 : i32
    return %c0_i32, %c0_i32_0, %c0_i32_1 : i32, i32, i32
  }
  func.func @transform_3(%arg0: i32) -> (i32, i32) {
    %c0_i32 = arith.constant 0 : i32
    %c0_i32_0 = arith.constant 0 : i32
    %c0_i32_1 = arith.constant 0 : i32
    return %c0_i32, %c0_i32_0 : i32, i32
  }
  func.func @transform_4(%arg0: i32) -> (i32, i32) {
    %c0_i32 = arith.constant 0 : i32
    %c0_i32_0 = arith.constant 0 : i32
    %c0_i32_1 = arith.constant 0 : i32
    return %c0_i32, %c0_i32_0 : i32, i32
  }
  func.func @transform_5(%arg0: i32) -> (i32, i32, i32) {
    %c0_i32 = arith.constant 0 : i32
    %c0_i32_0 = arith.constant 0 : i32
    %c0_i32_1 = arith.constant 0 : i32
    %c0_i32_2 = arith.constant 0 : i32
    return %c0_i32, %c0_i32_0, %c0_i32_1 : i32, i32, i32
  }
  func.func @transform_6(%arg0: i32) -> (i32, i32) {
    %c0_i32 = arith.constant 0 : i32
    %c0_i32_0 = arith.constant 0 : i32
    %c0_i32_1 = arith.constant 0 : i32
    return %c0_i32, %c0_i32_0 : i32, i32
  }
  func.func @transform_7(%arg0: i32) -> (i32, i32) {
    %c0_i32 = arith.constant 0 : i32
    %c0_i32_0 = arith.constant 0 : i32
    %c0_i32_1 = arith.constant 0 : i32
    return %c0_i32, %c0_i32_0 : i32, i32
  }
  func.func @transform_8(%arg0: i32) -> (i32, i32) {
    %c0_i32 = arith.constant 0 : i32
    %c0_i32_0 = arith.constant 0 : i32
    %c0_i32_1 = arith.constant 0 : i32
    return %c0_i32, %c0_i32_0 : i32, i32
  }
}

</mosaic_0001>

<bundles_post_ra>
// kernel: tpu_custom_call.1
= control target key start
LH: loop header
LB: loop body
LE: loop exit
PB: predicated region body
PF: predicated region fallthrough
CT: control target
= control target key end

     0   :  { %s3884_s9 = smov 19   ;;  %v7073_v2 = vmov 0   ;;  %v7067_v5 = vmov 1   ;;  %v3887_v6 = vmov 0.0   ;;  %vm34_vm0 = vcmask 1043456   ;;  %s7056_s0 = inlined_call_operand.vmem [shape: f32[4,648], index: 0, kind: input, shape index: {}]   ;;  %s7057_s1 = inlined_call_operand.vmem [shape: f32[1,648], index: 1, kind: input, shape index: {}]   ;;  %s7058_s2 = inlined_call_operand.vmem [shape: f32[9,4,4], index: 2, kind: input, shape index: {}]   ;;  %s7059_s3 = inlined_call_operand.vmem [shape: f32[4,1], index: 3, kind: input, shape index: {}]   ;;  %s7060_s4 = inlined_call_operand.vmem [shape: f32[4,1], index: 4, kind: input, shape index: {}]   ;;  %s7061_s5 = inlined_call_operand.vmem [shape: f32[9,4,4], index: 5, kind: input, shape index: {}]   ;;  %s7062_s6 = inlined_call_operand.vmem [shape: f32[4,1], index: 6, kind: input, shape index: {}]   ;;  %s7063_s7 = inlined_call_operand.vmem [shape: f32[4,1], index: 7, kind: input, shape index: {}]   ;;  %s7064_s8 = inlined_call_operand.hbm [shape: f32[4,648], index: 8, kind: output, shape index: {}]  }
   0x1   :  { %v40_v0 = vld [vmem:[%s7056_s0 + $0x10] sm:$0xff]  ;;  %v38_v1 = vld [vmem:[%s7056_s0] sm:$0xff]  ;;  %3794 = vset.pattern.permute.xlu1 %v7073_v2  ;;  %v39_v4 = vld [vmem:[%s7056_s0 + $0x8] sm:$0xff]  ;;  %3795 = vset.pattern.permute.xlu0 %v7067_v5  ;;  %32 = vst [vmem:[#allocation2] sm:$0xff] %v3887_v6  ;;  %vm35_vm1 = vcmask 375812  }
   0x2   :  { %48 = vrot.lane.b32.xlu1 %v40_v0, %s3884_s9  ;;  %44 = vrot.lane.b32.xlu0 %v38_v1, %s3884_s9  ;;  %v73_v3 = vld [vmem:[%s7058_s2] sm:$0xf]  ;;  %vm36_vm2 = vmor %vm35_vm1, %vm34_vm0 }
   0x3   :  { %37 = vst.msk [vmem:[#allocation2 + $0x10] sm:$0xff] %vm36_vm2, %v3887_v6 }
   0x6   :  { %133 = vperm.xlu1 %3794, %v73_v3   ;;  %46 = vrot.lane.b32.xlu0 %v39_v4, %s3884_s9 }
   0x7   :  { %13 = vsyncpa [#allocation4], 0  ;;  %v7065_v7 = vmov 2   ;;  %v3763_v8 = vld [vmem:[%s7058_s2 + $0x4] sm:$0xf]  ;;  %v7069_v9 = vmov 3   ;;  %v77_v26 = vlaneseq }
   0x8   :  { %v3764_v10 = vld [vmem:[%s7058_s2 + $0x8] sm:$0xf]  ;;  %vm62_vm3 = vcmask 1043608   ;;  %vm63_vm4 = vcmask 1047556   ;;  %vm53_vm5 = vcmask 154624   ;;  %v7336_v13 = vmov 0 }
   0x9   :  { %vm3974_vm6 = vmor %vm63_vm4, %vm62_vm3  ;;  %vm67_vm7 = vcmask 220164   ;;  %v7339_v19 = vmov 0  ;;  %v4000_v28 = vshrl.u32 %v77_v26, 7  ;;  %s3890_s17 = smov 127   ;;  %s3891_s18 = smov 126   ;;  %vm7225_vm9 = vcmask 1039360  }
   0xa   :  { %3796 = vset.pattern.permute.xlu1 %v7065_v7  ;;  %203 = vperm.xlu0 %3795, %v73_v3   ;;  %v7337_v13 = vsel %vm3974_vm6, 4294967295, %v7336_v13  ;;  %vm3982_vm8 = vmor %vm67_vm7, %vm34_vm0  ;;  %s3892_s21 = smov 110   ;;  %s3893_s24 = smov 109   ;;  %vm7224_vm10 = vcmask 1031168   ;;  %vm7223_vm11 = vcmask 900096   ;;  %vm7222_vm12 = vcmask 891904  }
   0xb   :  { %273 = vperm.xlu1 %3796, %v73_v3   ;;  %7338 = vst [vmem:[#allocation6_spill] sm:$0xff] %v7337_v13  ;;  %v7340_v19 = vsel %vm3982_vm8, 4294967295, %v7339_v19  ;;  %v4004_v30 = vsub.s32 0, %v4000_v28  ;;  %v4022_v38 = vsub.s32 4, %v4000_v28  ;;  %v4025_v39 = vsub.s32 1, %v4000_v28  ;;  %s3894_s27 = smov 108  }
   0xc   :  { %7341 = vst [vmem:[#allocation7_spill] sm:$0xff] %v7340_v19  ;;  %v4056_v51 = vsub.s32 5, %v4000_v28  ;;  %v4066_v55 = vsub.s32 2, %v4000_v28  ;;  %v4094_v1 = vsub.s32 6, %v4000_v28  ;;  %s3895_s30 = smov 92   ;;  %s3896_s12 = smov 91  }
   0xd   :  { %7342 = vst [vmem:[#allocation8_spill] sm:$0xff] %v4004_v30  ;;  %7343 = vst [vmem:[#allocation9_spill] sm:$0xff] %v4022_v38  ;;  %vm7221_vm13 = vcmask 883712   ;;  %vm7220_vm14 = vcmask 752640   ;;  %vm7219_vm15 = vcmask 744448   ;;  %vm7218_vm1 = vcmask 736256  }
   0xe   :  { %408 = vperm.xlu0 %3795, %v3763_v8   ;;  %7344 = vst [vmem:[#allocation10_spill] sm:$0xff] %v4025_v39  ;;  %7345 = vst [vmem:[#allocation11_spill] sm:$0xff] %v4056_v51 }
   0xf   :  { %3797 = vset.pattern.permute.xlu1 %v7069_v9  ;;  %7346 = vst [vmem:[#allocation12_spill] sm:$0xff] %v4066_v55  ;;  %7347 = vst [vmem:[#allocation13_spill] sm:$0xff] %v4094_v1 }
  0x10   :  { %343 = vperm.xlu1 %3797, %v73_v3  }
  0x12   :  { %592 = vperm.xlu0 %3795, %v3764_v10  }
  0x14   :  { %3825 = vset.pattern.permute.xlu1 %v7073_v2 }
  0x16   :  { %3798 = vset.pattern.permute.xlu0 %v7065_v7 }
  0x17   :  { %453 = vperm.xlu0 %3798, %v3763_v8  }
  0x1b   :  { %637 = vperm.xlu0 %3798, %v3764_v10  }
  0x1f   :  { %3799 = vset.pattern.permute.xlu0 %v7069_v9 }
  0x20   :  { %498 = vperm.xlu0 %3799, %v3763_v8  }
  0x24   :  { %682 = vperm.xlu0 %3799, %v3764_v10  }
  0x28   :  { %3800 = vset.pattern.permute.xlu0 %v7073_v2 }
  0x29   :  { %362 = vperm.xlu0 %3800, %v3763_v8   ;;  %v4103_v8 = vsub.s32 3, %v4000_v28 }
  0x2b   :  { %7348 = vst [vmem:[#allocation14_spill] sm:$0xff] %v4103_v8 }
  0x2d   :  { %546 = vperm.xlu0 %3800, %v3764_v10  }
  0x74   :  { %v45_v11 = vpop.permute.xlu0 %44  ;;  %v49_v12 = vpop.permute.xlu1 %48 }
  0x75   :  { %v50_v14 = vrot.slane %v45_v11, 4  ;;  %v52_v16 = vrot.slane %v49_v12, 4 }
  0x77   :  { %v54_v15 = vsel %vm53_vm5, %v50_v14, %v45_v11 }
  0x78   :  { %65 = vst.msk [vmem:[#allocation2] sm:$0xff] %vm3974_vm6, %v54_v15  ;;  %v47_v17 = vpop.permute.xlu0 %46 }
  0x79   :  { %v51_v18 = vrot.slane %v47_v17, 4 }
  0x7b   :  { %v57_v20 = vsel %vm34_vm0, %v51_v18, %v52_v16  ;;  %v55_v29 = vsel %vm34_vm0, %v50_v14, %v51_v18 }
  0x7c   :  { %v58_v21 = vsel %vm53_vm5, %v57_v20, %v49_v12  ;;  %v4011_v33 = vsel %vm53_vm5, %v55_v29, %v47_v17  ;;  %v4136_v29 = vsub.s32 7, %v4000_v28 }
  0x7d   :  { %69 = vst.msk [vmem:[#allocation2 + $0x10] sm:$0xff] %vm3982_vm8, %v58_v21  ;;  %v88_v35 = vrot.slane %v4011_v33, %v4004_v30  ;;  %v159_v47 = vrot.slane %v4011_v33, %v4025_v39  ;;  %v229_v61 = vrot.slane %v4011_v33, %v4066_v55  ;;  %v299_v16 = vrot.slane %v4011_v33, %v4103_v8 }
  0x7e   :  { %7349 = vst [vmem:[#allocation15_spill] sm:$0xff] %v4136_v29 }
  0x7f   :  { %v4008_v32 = vld [vmem:[#allocation2] sm:$0xff]  ;;  %v4035_v43 = vrot.slane %v88_v35, %v4004_v30  ;;  %v4063_v54 = vrot.slane %v159_v47, %v4025_v39  ;;  %v4111_v12 = vrot.slane %v229_v61, %v4066_v55 }
  0x80   :  { %v80_v34 = vrot.slane %v4008_v32, %v4004_v30  ;;  %v84_v40 = vrot.slane %v4008_v32, %v4022_v38  ;;  %v151_v50 = vrot.slane %v4008_v32, %v4025_v39  ;;  %v155_v56 = vrot.slane %v4008_v32, %v4056_v51 }
  0x81   :  { %v221_v0 = vrot.slane %v4008_v32, %v4066_v55  ;;  %v225_v6 = vrot.slane %v4008_v32, %v4094_v1  ;;  %v291_v20 = vrot.slane %v4008_v32, %v4103_v8 }
  0x82   :  { %v4032_v42 = vrot.slane %v80_v34, %v4004_v30  ;;  %v4046_v48 = vrot.slane %v84_v40, %v4004_v30  ;;  %v4073_v58 = vrot.slane %v151_v50, %v4025_v39  ;;  %v4084_v62 = vrot.slane %v155_v56, %v4025_v39 }
  0x83   :  { %v4108_v11 = vrot.slane %v221_v0, %v4066_v55  ;;  %v4122_v17 = vrot.slane %v225_v6, %v4066_v55  ;;  %v4139_v34 = vrot.slane %v299_v16, %v4103_v8  ;;  %v4144_v35 = vrot.slane %v291_v20, %v4103_v8 }
  0x84   :  { %v4019_v37 = vld [vmem:[#allocation2 + $0x10] sm:$0xff]  ;;  %v92_v20 = vrot.slane %v4011_v33, %v4022_v38 }
  0x85   :  { %v96_v41 = vrot.slane %v4019_v37, %v4004_v30  ;;  %v167_v57 = vrot.slane %v4019_v37, %v4025_v39  ;;  %v237_v10 = vrot.slane %v4019_v37, %v4066_v55  ;;  %v307_v40 = vrot.slane %v4019_v37, %v4103_v8 }
  0x87   :  { %v4049_v49 = vrot.slane %v96_v41, %v4004_v30  ;;  %v4087_v63 = vrot.slane %v167_v57, %v4025_v39  ;;  %v4125_v18 = vrot.slane %v237_v10, %v4066_v55  ;;  %v295_v41 = vrot.slane %v4008_v32, %v4136_v29 }
  0x89   :  { %v3990_v22 = vpop.permute.xlu0 %203  ;;  %v4160_v47 = vrot.slane %v295_v41, %v4103_v8  ;;  %v4221_v41 = vrot.slane %v92_v20, %v4004_v30 }
  0x8d   :  { %v3992_v23 = vpop.permute.xlu0 %408 }
  0x8e   :  { %v413_v59 = vmul.f32 %v3992_v23, %v4063_v54  ;;  %v411_v60 = vmul.f32 %v3992_v23, %v4073_v58  ;;  %v415_v3 = vmul.f32 %v3992_v23, %v4087_v63  ;;  %v412_v4 = vmul.f32 %v3992_v23, %v4084_v62 }
  0x91   :  { %v3994_v24 = vpop.permute.xlu0 %592 }
  0x92   :  { %v595_v61 = vmul.f32 %v3994_v24, %v4073_v58  ;;  %v599_v0 = vmul.f32 %v3994_v24, %v4087_v63 }
  0x96   :  { %v3996_v25 = vpop.permute.xlu0 %453 }
  0x97   :  { %v458_v14 = vmul.f32 %v3996_v25, %v4111_v12  ;;  %v456_v15 = vmul.f32 %v3996_v25, %v4108_v11  ;;  %v460_v21 = vmul.f32 %v3996_v25, %v4125_v18  ;;  %v457_v26 = vmul.f32 %v3996_v25, %v4122_v17 }
  0x9a   :  { %v3998_v27 = vpop.permute.xlu0 %637 }
  0x9b   :  { %v640_v6 = vmul.f32 %v3998_v27, %v4108_v11  ;;  %v644_v10 = vmul.f32 %v3998_v27, %v4125_v18 }
  0x9f   :  { %v4006_v31 = vpop.permute.xlu0 %498 }
  0xa0   :  { %v503_v28 = vmul.f32 %v4006_v31, %v4139_v34  ;;  %v502_v32 = vmul.f32 %v4006_v31, %v4160_v47 }
  0xa3   :  { %v4017_v36 = vpop.permute.xlu0 %682 }
  0xa4   :  { %v685_v16 = vmul.f32 %v4017_v36, %v4144_v35 }
  0xa8   :  { %v4037_v44 = vpop.permute.xlu0 %362 }
  0xa9   :  { %v367_v45 = vmul.f32 %v4037_v44, %v4035_v43  ;;  %v365_v46 = vmul.f32 %v4037_v44, %v4032_v42  ;;  %v369_v52 = vmul.f32 %v4037_v44, %v4049_v49  ;;  %v366_v53 = vmul.f32 %v4037_v44, %v4046_v48 }
  0xab   :  { %381 = vrot.lane.b32.xlu0 %v367_v45, %s3890_s17  ;;  %377 = vrot.lane.b32.xlu1 %v365_v46, %s3890_s17  ;;  %v501_v45 = vmul.f32 %v4006_v31, %v4144_v35  ;;  %v4157_v46 = vrot.slane %v307_v40, %v4103_v8  ;;  %v100_v40 = vrot.slane %v4019_v37, %v4022_v38 }
  0xad   :  { %v505_v50 = vmul.f32 %v4006_v31, %v4157_v46 }
  0xaf   :  { %385 = vrot.lane.b32.xlu0 %v369_v52, %s3890_s17  ;;  %379 = vrot.lane.b32.xlu1 %v366_v53, %s3890_s17  ;;  %v4166_v52 = vpop.permute.xlu0 %546 }
  0xb0   :  { %v551_v53 = vmul.f32 %v4166_v52, %v4035_v43  ;;  %v549_v56 = vmul.f32 %v4166_v52, %v4032_v42  ;;  %v553_v57 = vmul.f32 %v4166_v52, %v4049_v49 }
  0xb3   :  { %427 = vrot.lane.b32.xlu0 %v413_v59, %s3890_s17  ;;  %423 = vrot.lane.b32.xlu1 %v411_v60, %s3890_s17  ;;  %v550_v59 = vmul.f32 %v4166_v52, %v4046_v48  ;;  %v597_v60 = vmul.f32 %v3994_v24, %v4063_v54 }
  0xb7   :  { %431 = vrot.lane.b32.xlu0 %v415_v3, %s3890_s17  ;;  %425 = vrot.lane.b32.xlu1 %v412_v4, %s3890_s17  ;;  %v596_v3 = vmul.f32 %v3994_v24, %v4084_v62  ;;  %v642_v4 = vmul.f32 %v3998_v27, %v4111_v12 }
  0xbb   :  { %472 = vrot.lane.b32.xlu0 %v458_v14, %s3890_s17  ;;  %468 = vrot.lane.b32.xlu1 %v456_v15, %s3890_s17  ;;  %v641_v14 = vmul.f32 %v3998_v27, %v4122_v17  ;;  %v687_v15 = vmul.f32 %v4017_v36, %v4139_v34 }
  0xbf   :  { %476 = vrot.lane.b32.xlu0 %v460_v21, %s3890_s17  ;;  %470 = vrot.lane.b32.xlu1 %v457_v26, %s3890_s17  ;;  %v689_v21 = vmul.f32 %v4017_v36, %v4157_v46  ;;  %v686_v26 = vmul.f32 %v4017_v36, %v4160_v47 }
  0xc3   :  { %517 = vrot.lane.b32.xlu0 %v503_v28, %s3890_s17  ;;  %513 = vrot.lane.b32.xlu1 %v501_v45, %s3890_s17  ;;  %v4228_v28 = vld [vmem:[%s7058_s2 + $0xc] sm:$0xf]  ;;  %v368_v45 = vmul.f32 %v4037_v44, %v4221_v41 }
  0xc7   :  { %521 = vrot.lane.b32.xlu0 %v505_v50, %s3890_s17  ;;  %515 = vrot.lane.b32.xlu1 %v502_v32, %s3890_s17  ;;  %v4233_v50 = vrot.slane %v100_v40, %v4004_v30  ;;  %v163_v32 = vrot.slane %v4011_v33, %v4056_v51 }
  0xcb   :  { %565 = vrot.lane.b32.xlu0 %v551_v53, %s3891_s18  ;;  %561 = vrot.lane.b32.xlu1 %v549_v56, %s3891_s18  ;;  %v370_v53 = vmul.f32 %v4037_v44, %v4233_v50  ;;  %v171_v56 = vrot.slane %v4019_v37, %v4056_v51 }
  0xcf   :  { %569 = vrot.lane.b32.xlu0 %v553_v57, %s3891_s18  ;;  %563 = vrot.lane.b32.xlu1 %v550_v59, %s3891_s18  ;;  %v4244_v57 = vrot.slane %v163_v32, %v4025_v39 }
  0xd1   :  { %v414_v59 = vmul.f32 %v3992_v23, %v4244_v57 }
  0xd3   :  { %611 = vrot.lane.b32.xlu0 %v597_v60, %s3891_s18  ;;  %607 = vrot.lane.b32.xlu1 %v595_v61, %s3891_s18  ;;  %v4251_v60 = vrot.slane %v171_v56, %v4025_v39  ;;  %v233_v61 = vrot.slane %v4011_v33, %v4094_v1 }
  0xd5   :  { %v416_v44 = vmul.f32 %v3992_v23, %v4251_v60 }
  0xd7   :  { %615 = vrot.lane.b32.xlu0 %v599_v0, %s3891_s18  ;;  %609 = vrot.lane.b32.xlu1 %v596_v3, %s3891_s18  ;;  %v4259_v0 = vrot.slane %v233_v61, %v4066_v55  ;;  %v241_v3 = vrot.slane %v4019_v37, %v4094_v1 }
  0xdb   :  { %656 = vrot.lane.b32.xlu0 %v642_v4, %s3891_s18  ;;  %652 = vrot.lane.b32.xlu1 %v640_v6, %s3891_s18  ;;  %v459_v4 = vmul.f32 %v3996_v25, %v4259_v0  ;;  %v4268_v6 = vrot.slane %v241_v3, %v4066_v55 }
  0xdd   :  { %v461_v23 = vmul.f32 %v3996_v25, %v4268_v6  ;;  %v552_v25 = vmul.f32 %v4166_v52, %v4221_v41 }
  0xdf   :  { %660 = vrot.lane.b32.xlu0 %v644_v10, %s3891_s18  ;;  %654 = vrot.lane.b32.xlu1 %v641_v14, %s3891_s18  ;;  %v303_v10 = vrot.slane %v4011_v33, %v4136_v29 }
  0xe1   :  { %v4276_v14 = vrot.slane %v303_v10, %v4103_v8 }
  0xe3   :  { %701 = vrot.lane.b32.xlu0 %v687_v15, %s3891_s18  ;;  %697 = vrot.lane.b32.xlu1 %v685_v16, %s3891_s18  ;;  %v311_v15 = vrot.slane %v4019_v37, %v4136_v29  ;;  %v504_v16 = vmul.f32 %v4006_v31, %v4276_v14  ;;  %v554_v37 = vmul.f32 %v4166_v52, %v4233_v50 }
  0xe4   :  { %v645_v52 = vmul.f32 %v3998_v27, %v4268_v6  ;;  %v688_v32 = vmul.f32 %v4017_v36, %v4276_v14 }
  0xe5   :  { %v4284_v20 = vrot.slane %v311_v15, %v4103_v8 }
  0xe7   :  { %705 = vrot.lane.b32.xlu0 %v689_v21, %s3891_s18  ;;  %699 = vrot.lane.b32.xlu1 %v686_v26, %s3891_s18  ;;  %v506_v33 = vmul.f32 %v4006_v31, %v4284_v20  ;;  %v598_v21 = vmul.f32 %v3994_v24, %v4244_v57  ;;  %v600_v31 = vmul.f32 %v3994_v24, %v4251_v60 }
  0xe8   :  { %v643_v26 = vmul.f32 %v3998_v27, %v4259_v0 }
  0xeb   :  { %730 = vperm.xlu0 %3800, %v4228_v28   ;;  %383 = vrot.lane.b32.xlu1 %v368_v45, %s3890_s17 }
  0xef   :  { %387 = vrot.lane.b32.xlu1 %v370_v53, %s3890_s17  ;;  %3801 = vset.pattern.permute.xlu0 %v7067_v5  ;;  %v690_v53 = vmul.f32 %v4017_v36, %v4284_v20 }
  0xf3   :  { %429 = vrot.lane.b32.xlu1 %v414_v59, %s3890_s17 }
  0xf7   :  { %433 = vrot.lane.b32.xlu1 %v416_v44, %s3890_s17 }
  0xfb   :  { %474 = vrot.lane.b32.xlu1 %v459_v4, %s3890_s17 }
  0xff   :  { %478 = vrot.lane.b32.xlu1 %v461_v23, %s3890_s17 }
 0x103   :  { %519 = vrot.lane.b32.xlu1 %v504_v16, %s3890_s17 }
 0x107   :  { %523 = vrot.lane.b32.xlu1 %v506_v33, %s3890_s17 }
 0x10b   :  { %567 = vrot.lane.b32.xlu1 %v552_v25, %s3891_s18 }
 0x10f   :  { %571 = vrot.lane.b32.xlu1 %v554_v37, %s3891_s18 }
 0x113   :  { %613 = vrot.lane.b32.xlu1 %v598_v21, %s3891_s18 }
 0x117   :  { %617 = vrot.lane.b32.xlu1 %v600_v31, %s3891_s18 }
 0x11b   :  { %658 = vrot.lane.b32.xlu1 %v643_v26, %s3891_s18 }
 0x11d   :  { %v4304_v40 = vpop.permute.xlu0 %381 }
 0x11f   :  { %662 = vrot.lane.b32.xlu1 %v645_v52, %s3891_s18 }
 0x121   :  { %v4309_v45 = vpop.permute.xlu0 %385 }
 0x123   :  { %703 = vrot.lane.b32.xlu1 %v688_v32, %s3891_s18 }
 0x125   :  { %v4314_v24 = vpop.permute.xlu0 %427 }
 0x127   :  { %707 = vrot.lane.b32.xlu1 %v690_v53, %s3891_s18 }
 0x129   :  { %v4319_v56 = vpop.permute.xlu0 %431 }
 0x12a   :  { %7350 = vst [vmem:[#allocation16_spill] sm:$0xff] %v4319_v56 }
 0x12d   :  { %v4321_v59 = vpop.permute.xlu0 %472 }
 0x131   :  { %v4323_v27 = vpop.permute.xlu0 %476 }
 0x132   :  { %7351 = vst [vmem:[#allocation17_spill] sm:$0xff] %v4323_v27 }
 0x135   :  { %v4325_v61 = vpop.permute.xlu0 %517 }
 0x139   :  { %v4327_v44 = vpop.permute.xlu0 %521 }
 0x13a   :  { %7352 = vst [vmem:[#allocation18_spill] sm:$0xff] %v4327_v44 }
 0x13d   :  { %v4329_v3 = vpop.permute.xlu0 %565 }
 0x141   :  { %v4331_v4 = vpop.permute.xlu0 %569 }
 0x142   :  { %7353 = vst [vmem:[#allocation19_spill] sm:$0xff] %v4331_v4 }
 0x145   :  { %v4333_v10 = vpop.permute.xlu0 %611 }
 0x149   :  { %v4335_v23 = vpop.permute.xlu0 %615 }
 0x14a   :  { %7354 = vst [vmem:[#allocation20_spill] sm:$0xff] %v4335_v23 }
 0x14d   :  { %v4337_v36 = vpop.permute.xlu0 %656 }
 0x14e   :  { %7355 = vst [vmem:[#allocation21_spill] sm:$0xff] %v4337_v36 }
 0x151   :  { %v4339_v15 = vpop.permute.xlu0 %660 }
 0x152   :  { %7356 = vst [vmem:[#allocation22_spill] sm:$0xff] %v4339_v15 }
 0x155   :  { %v4341_v16 = vpop.permute.xlu0 %701 }
 0x156   :  { %7357 = vst [vmem:[#allocation23_spill] sm:$0xff] %v4341_v16 }
 0x159   :  { %v4343_v33 = vpop.permute.xlu0 %705 }
 0x15a   :  { %7358 = vst [vmem:[#allocation24_spill] sm:$0xff] %v4343_v33 }
 0x16a   :  { %v731_v25 = vpop.permute.xlu0 %730 }
 0x16b   :  { %v735_v37 = vmul.f32 %v731_v25, %v4035_v43  ;;  %v733_v21 = vmul.f32 %v731_v25, %v4032_v42  ;;  %v737_v31 = vmul.f32 %v731_v25, %v4049_v49  ;;  %v734_v26 = vmul.f32 %v731_v25, %v4046_v48 }
 0x16c   :  { %v736_v52 = vmul.f32 %v731_v25, %v4221_v41  ;;  %v738_v32 = vmul.f32 %v731_v25, %v4233_v50 }
 0x16d   :  { %749 = vrot.lane.b32.xlu0 %v735_v37, %s3892_s21  ;;  %745 = vrot.lane.b32.xlu1 %v733_v21, %s3892_s21 }
 0x171   :  { %753 = vrot.lane.b32.xlu0 %v737_v31, %s3892_s21  ;;  %747 = vrot.lane.b32.xlu1 %v734_v26, %s3892_s21 }
 0x175   :  { %776 = vperm.xlu0 %3801, %v4228_v28   ;;  %751 = vrot.lane.b32.xlu1 %v736_v52, %s3892_s21 }
 0x179   :  { %755 = vrot.lane.b32.xlu1 %v738_v32, %s3892_s21  ;;  %3802 = vset.pattern.permute.xlu0 %v7065_v7 }
 0x1df   :  { %v4359_v53 = vpop.permute.xlu0 %749 }
 0x1e0   :  { %7359 = vst [vmem:[#allocation25_spill] sm:$0xff] %v4359_v53 }
 0x1e3   :  { %v4361_v37 = vpop.permute.xlu0 %753 }
 0x1e4   :  { %7360 = vst [vmem:[#allocation26_spill] sm:$0xff] %v4361_v37 }
 0x1f4   :  { %v777_v21 = vpop.permute.xlu0 %776 }
 0x1f5   :  { %v781_v31 = vmul.f32 %v777_v21, %v4063_v54  ;;  %v779_v26 = vmul.f32 %v777_v21, %v4073_v58  ;;  %v783_v52 = vmul.f32 %v777_v21, %v4087_v63  ;;  %v780_v25 = vmul.f32 %v777_v21, %v4084_v62 }
 0x1f6   :  { %v782_v32 = vmul.f32 %v777_v21, %v4244_v57  ;;  %v784_v7 = vmul.f32 %v777_v21, %v4251_v60 }
 0x1f7   :  { %795 = vrot.lane.b32.xlu0 %v781_v31, %s3892_s21  ;;  %791 = vrot.lane.b32.xlu1 %v779_v26, %s3892_s21 }
 0x1fb   :  { %799 = vrot.lane.b32.xlu0 %v783_v52, %s3892_s21  ;;  %793 = vrot.lane.b32.xlu1 %v780_v25, %s3892_s21 }
 0x1ff   :  { %821 = vperm.xlu0 %3802, %v4228_v28   ;;  %797 = vrot.lane.b32.xlu1 %v782_v32, %s3892_s21 }
 0x203   :  { %801 = vrot.lane.b32.xlu1 %v784_v7, %s3892_s21  ;;  %3803 = vset.pattern.permute.xlu0 %v7069_v9 }
 0x269   :  { %v4377_v31 = vpop.permute.xlu0 %795 }
 0x26a   :  { %7361 = vst [vmem:[#allocation27_spill] sm:$0xff] %v4377_v31 }
 0x26d   :  { %v4379_v26 = vpop.permute.xlu0 %799 }
 0x26e   :  { %7362 = vst [vmem:[#allocation28_spill] sm:$0xff] %v4379_v26 }
 0x27e   :  { %v822_v5 = vpop.permute.xlu0 %821 }
 0x27f   :  { %v826_v52 = vmul.f32 %v822_v5, %v4111_v12  ;;  %v824_v25 = vmul.f32 %v822_v5, %v4108_v11  ;;  %v828_v32 = vmul.f32 %v822_v5, %v4125_v18  ;;  %v825_v21 = vmul.f32 %v822_v5, %v4122_v17 }
 0x280   :  { %v827_v7 = vmul.f32 %v822_v5, %v4259_v0  ;;  %v829_v9 = vmul.f32 %v822_v5, %v4268_v6 }
 0x281   :  { %840 = vrot.lane.b32.xlu0 %v826_v52, %s3892_s21  ;;  %836 = vrot.lane.b32.xlu1 %v824_v25, %s3892_s21 }
 0x285   :  { %844 = vrot.lane.b32.xlu0 %v828_v32, %s3892_s21  ;;  %838 = vrot.lane.b32.xlu1 %v825_v21, %s3892_s21 }
 0x289   :  { %866 = vperm.xlu0 %3803, %v4228_v28   ;;  %842 = vrot.lane.b32.xlu1 %v827_v7, %s3892_s21  ;;  %v4412_v7 = vpop.permute.xlu1 %133 }
 0x28d   :  { %846 = vrot.lane.b32.xlu1 %v829_v9, %s3892_s21  ;;  %3804 = vset.pattern.permute.xlu0 %v7073_v2  ;;  %v4410_v9 = vld [vmem:[%s7058_s2 + $0x10] sm:$0xf] }
 0x2f3   :  { %v4395_v52 = vpop.permute.xlu0 %840 }
 0x2f4   :  { %7363 = vst [vmem:[#allocation29_spill] sm:$0xff] %v4395_v52 }
 0x2f7   :  { %v4397_v25 = vpop.permute.xlu0 %844 }
 0x2f8   :  { %7364 = vst [vmem:[#allocation30_spill] sm:$0xff] %v4397_v25 }
 0x308   :  { %v867_v29 = vpop.permute.xlu0 %866 }
 0x309   :  { %v871_v32 = vmul.f32 %v867_v29, %v4139_v34  ;;  %v869_v21 = vmul.f32 %v867_v29, %v4144_v35  ;;  %v873_v28 = vmul.f32 %v867_v29, %v4157_v46  ;;  %v870_v5 = vmul.f32 %v867_v29, %v4160_v47 }
 0x30a   :  { %v872_v2 = vmul.f32 %v867_v29, %v4276_v14 }
 0x30b   :  { %885 = vrot.lane.b32.xlu0 %v871_v32, %s3892_s21  ;;  %881 = vrot.lane.b32.xlu1 %v869_v21, %s3892_s21  ;;  %v874_v32 = vmul.f32 %v867_v29, %v4284_v20  ;;  %v4418_v21 = vpop.permute.xlu1 %273 }
 0x30f   :  { %889 = vrot.lane.b32.xlu0 %v873_v28, %s3892_s21  ;;  %883 = vrot.lane.b32.xlu1 %v870_v5, %s3892_s21  ;;  %v7365_v28 = vmov 1   ;;  %v4426_v19 = vpop.permute.xlu1 %343 }
 0x313   :  { %914 = vperm.xlu0 %3804, %v4410_v9   ;;  %887 = vrot.lane.b32.xlu1 %v872_v2, %s3892_s21  ;;  %v4430_v2 = vpop.permute.xlu1 %377 }
 0x317   :  { %891 = vrot.lane.b32.xlu1 %v874_v32, %s3892_s21  ;;  %3805 = vset.pattern.permute.xlu0 %v7365_v28  ;;  %v4438_v39 = vpop.permute.xlu1 %379 }
 0x31b   :  { %v4444_v8 = vpop.permute.xlu1 %423 }
 0x37d   :  { %v4422_v5 = vpop.permute.xlu0 %885 }
 0x37e   :  { %7366 = vst [vmem:[#allocation31_spill] sm:$0xff] %v4422_v5 }
 0x381   :  { %v4424_v1 = vpop.permute.xlu0 %889 }
 0x382   :  { %7367 = vst [vmem:[#allocation32_spill] sm:$0xff] %v4424_v1 }
 0x392   :  { %v915_v13 = vpop.permute.xlu0 %914 }
 0x393   :  { %v919_v51 = vmul.f32 %v915_v13, %v4035_v43  ;;  %v917_v38 = vmul.f32 %v915_v13, %v4032_v42  ;;  %v921_v29 = vmul.f32 %v915_v13, %v4049_v49  ;;  %v918_v32 = vmul.f32 %v915_v13, %v4046_v48 }
 0x394   :  { %v920_v30 = vmul.f32 %v915_v13, %v4221_v41 }
 0x395   :  { %933 = vrot.lane.b32.xlu0 %v919_v51, %s3893_s24  ;;  %929 = vrot.lane.b32.xlu1 %v917_v38, %s3893_s24  ;;  %v922_v51 = vmul.f32 %v915_v13, %v4233_v50  ;;  %v7368_v38 = vmov 2  }
 0x399   :  { %937 = vrot.lane.b32.xlu0 %v921_v29, %s3893_s24  ;;  %931 = vrot.lane.b32.xlu1 %v918_v32, %s3893_s24  ;;  %v4452_v32 = vpop.permute.xlu1 %425 }
 0x39d   :  { %960 = vperm.xlu0 %3805, %v4410_v9   ;;  %935 = vrot.lane.b32.xlu1 %v920_v30, %s3893_s24  ;;  %v4456_v30 = vpop.permute.xlu1 %468 }
 0x3a1   :  { %939 = vrot.lane.b32.xlu1 %v922_v51, %s3893_s24  ;;  %3806 = vset.pattern.permute.xlu0 %v7368_v38 }
 0x407   :  { %v4448_v55 = vpop.permute.xlu0 %933 }
 0x408   :  { %7369 = vst [vmem:[#allocation33_spill] sm:$0xff] %v4448_v55 }
 0x40b   :  { %v4450_v29 = vpop.permute.xlu0 %937 }
 0x40c   :  { %7370 = vst [vmem:[#allocation34_spill] sm:$0xff] %v4450_v29  ;;  %v4464_v29 = vpop.permute.xlu1 %470 }
 0x410   :  { %v4470_v52 = vpop.permute.xlu1 %513 }
 0x41c   :  { %v961_v1 = vpop.permute.xlu0 %960 }
 0x41d   :  { %v965_v5 = vmul.f32 %v961_v1, %v4063_v54  ;;  %v963_v25 = vmul.f32 %v961_v1, %v4073_v58  ;;  %v967_v13 = vmul.f32 %v961_v1, %v4087_v63  ;;  %v964_v51 = vmul.f32 %v961_v1, %v4084_v62 }
 0x41e   :  { %v966_v55 = vmul.f32 %v961_v1, %v4244_v57 }
 0x41f   :  { %979 = vrot.lane.b32.xlu0 %v965_v5, %s3893_s24  ;;  %975 = vrot.lane.b32.xlu1 %v963_v25, %s3893_s24  ;;  %v968_v5 = vmul.f32 %v961_v1, %v4251_v60  ;;  %v7371_v25 = vmov 3  }
 0x423   :  { %983 = vrot.lane.b32.xlu0 %v967_v13, %s3893_s24  ;;  %977 = vrot.lane.b32.xlu1 %v964_v51, %s3893_s24  ;;  %v4478_v51 = vpop.permute.xlu1 %515 }
 0x427   :  { %1005 = vperm.xlu0 %3806, %v4410_v9   ;;  %981 = vrot.lane.b32.xlu1 %v966_v55, %s3893_s24  ;;  %v4482_v55 = vpop.permute.xlu1 %561 }
 0x42b   :  { %985 = vrot.lane.b32.xlu1 %v968_v5, %s3893_s24  ;;  %3807 = vset.pattern.permute.xlu0 %v7371_v25 }
 0x491   :  { %v4474_v26 = vpop.permute.xlu0 %979 }
 0x492   :  { %7372 = vst [vmem:[#allocation35_spill] sm:$0xff] %v4474_v26 }
 0x495   :  { %v4476_v13 = vpop.permute.xlu0 %983 }
 0x496   :  { %7373 = vst [vmem:[#allocation36_spill] sm:$0xff] %v4476_v13  ;;  %v4490_v13 = vpop.permute.xlu1 %563 }
 0x49a   :  { %v4496_v33 = vpop.permute.xlu1 %607 }
 0x4a6   :  { %v1006_v31 = vpop.permute.xlu0 %1005 }
 0x4a7   :  { %v1010_v37 = vmul.f32 %v1006_v31, %v4111_v12  ;;  %v1008_v53 = vmul.f32 %v1006_v31, %v4108_v11  ;;  %v1012_v1 = vmul.f32 %v1006_v31, %v4125_v18  ;;  %v1009_v5 = vmul.f32 %v1006_v31, %v4122_v17 }
 0x4a8   :  { %v1011_v26 = vmul.f32 %v1006_v31, %v4259_v0 }
 0x4a9   :  { %1024 = vrot.lane.b32.xlu0 %v1010_v37, %s3893_s24  ;;  %1020 = vrot.lane.b32.xlu1 %v1008_v53, %s3893_s24  ;;  %v1013_v37 = vmul.f32 %v1006_v31, %v4268_v6  ;;  %v7374_v53 = vmov 0  }
 0x4ad   :  { %1028 = vrot.lane.b32.xlu0 %v1012_v1, %s3893_s24  ;;  %1022 = vrot.lane.b32.xlu1 %v1009_v5, %s3893_s24  ;;  %v4504_v5 = vpop.permute.xlu1 %609 }
 0x4b1   :  { %1050 = vperm.xlu0 %3807, %v4410_v9   ;;  %1026 = vrot.lane.b32.xlu1 %v1011_v26, %s3893_s24  ;;  %v4508_v26 = vpop.permute.xlu1 %652 }
 0x4b2   :  { %7377 = vst [vmem:[#allocation39_spill] sm:$0xff] %v4508_v26 }
 0x4b5   :  { %1030 = vrot.lane.b32.xlu1 %v1013_v37, %s3893_s24  ;;  %3808 = vset.pattern.permute.xlu0 %v7374_v53 }
 0x51b   :  { %v4500_v15 = vpop.permute.xlu0 %1024 }
 0x51c   :  { %7375 = vst [vmem:[#allocation37_spill] sm:$0xff] %v4500_v15  ;;  %v4521_v15 = vpop.permute.xlu1 %654 }
 0x51d   :  { %7378 = vst [vmem:[#allocation40_spill] sm:$0xff] %v4521_v15 }
 0x51f   :  { %v4502_v1 = vpop.permute.xlu0 %1028 }
 0x520   :  { %7376 = vst [vmem:[#allocation38_spill] sm:$0xff] %v4502_v1  ;;  %v4519_v1 = vld [vmem:[%s7058_s2 + $0x14] sm:$0xf] }
 0x530   :  { %v1051_v16 = vpop.permute.xlu0 %1050 }
 0x531   :  { %v1055_v23 = vmul.f32 %v1051_v16, %v4139_v34  ;;  %v1053_v9 = vmul.f32 %v1051_v16, %v4144_v35  ;;  %v1057_v31 = vmul.f32 %v1051_v16, %v4157_v46  ;;  %v1054_v37 = vmul.f32 %v1051_v16, %v4160_v47 }
 0x532   :  { %v1056_v4 = vmul.f32 %v1051_v16, %v4276_v14 }
 0x533   :  { %1069 = vrot.lane.b32.xlu0 %v1055_v23, %s3893_s24  ;;  %1065 = vrot.lane.b32.xlu1 %v1053_v9, %s3893_s24  ;;  %v1058_v23 = vmul.f32 %v1051_v16, %v4284_v20  ;;  %v4527_v9 = vpop.permute.xlu1 %697 }
 0x534   :  { %7379 = vst [vmem:[#allocation41_spill] sm:$0xff] %v4527_v9 }
 0x537   :  { %1073 = vrot.lane.b32.xlu0 %v1057_v31, %s3893_s24  ;;  %1067 = vrot.lane.b32.xlu1 %v1054_v37, %s3893_s24  ;;  %v4535_v44 = vpop.permute.xlu1 %699 }
 0x538   :  { %7382 = vst [vmem:[#allocation44_spill] sm:$0xff] %v4535_v44 }
 0x53b   :  { %1098 = vperm.xlu0 %3808, %v4519_v1   ;;  %1071 = vrot.lane.b32.xlu1 %v1056_v4, %s3893_s24  ;;  %v4539_v4 = vpop.permute.xlu1 %383 }
 0x53f   :  { %1075 = vrot.lane.b32.xlu1 %v1058_v23, %s3893_s24  ;;  %3809 = vset.pattern.permute.xlu0 %v7365_v28 }
 0x5a5   :  { %v4531_v31 = vpop.permute.xlu0 %1069 }
 0x5a6   :  { %7380 = vst [vmem:[#allocation42_spill] sm:$0xff] %v4531_v31 }
 0x5a9   :  { %v4533_v37 = vpop.permute.xlu0 %1073 }
 0x5aa   :  { %7381 = vst [vmem:[#allocation43_spill] sm:$0xff] %v4533_v37  ;;  %v4547_v37 = vpop.permute.xlu1 %387 }
 0x5ae   :  { %v4553_v9 = vpop.permute.xlu1 %429 }
 0x5af   :  { %7383 = vst [vmem:[#allocation45_spill] sm:$0xff] %v4553_v9 }
 0x5ba   :  { %v1099_v27 = vpop.permute.xlu0 %1098 }
 0x5bb   :  { %v1103_v36 = vmul.f32 %v1099_v27, %v4035_v43  ;;  %v1101_v56 = vmul.f32 %v1099_v27, %v4032_v42  ;;  %v1105_v16 = vmul.f32 %v1099_v27, %v4049_v49  ;;  %v1102_v23 = vmul.f32 %v1099_v27, %v4046_v48 }
 0x5bc   :  { %v1104_v31 = vmul.f32 %v1099_v27, %v4221_v41 }
 0x5bd   :  { %1117 = vrot.lane.b32.xlu0 %v1103_v36, %s3894_s27  ;;  %1113 = vrot.lane.b32.xlu1 %v1101_v56, %s3894_s27  ;;  %v1106_v36 = vmul.f32 %v1099_v27, %v4233_v50 }
 0x5c1   :  { %1121 = vrot.lane.b32.xlu0 %v1105_v16, %s3894_s27  ;;  %1115 = vrot.lane.b32.xlu1 %v1102_v23, %s3894_s27  ;;  %v4561_v23 = vpop.permute.xlu1 %433 }
 0x5c2   :  { %7386 = vst [vmem:[#allocation48_spill] sm:$0xff] %v4561_v23 }
 0x5c5   :  { %1144 = vperm.xlu0 %3809, %v4519_v1   ;;  %1119 = vrot.lane.b32.xlu1 %v1104_v31, %s3894_s27  ;;  %v4565_v31 = vpop.permute.xlu1 %474 }
 0x5c6   :  { %7387 = vst [vmem:[#allocation49_spill] sm:$0xff] %v4565_v31 }
 0x5c9   :  { %1123 = vrot.lane.b32.xlu1 %v1106_v36, %s3894_s27  ;;  %3810 = vset.pattern.permute.xlu0 %v7368_v38 }
 0x62f   :  { %v4557_v56 = vpop.permute.xlu0 %1117 }
 0x630   :  { %7384 = vst [vmem:[#allocation46_spill] sm:$0xff] %v4557_v56 }
 0x633   :  { %v4559_v16 = vpop.permute.xlu0 %1121 }
 0x634   :  { %7385 = vst [vmem:[#allocation47_spill] sm:$0xff] %v4559_v16  ;;  %v4573_v16 = vpop.permute.xlu1 %478 }
 0x635   :  { %7388 = vst [vmem:[#allocation50_spill] sm:$0xff] %v4573_v16 }
 0x638   :  { %v4579_v31 = vpop.permute.xlu1 %519 }
 0x639   :  { %7389 = vst [vmem:[#allocation51_spill] sm:$0xff] %v4579_v31 }
 0x644   :  { %v1145_v44 = vpop.permute.xlu0 %1144 }
 0x645   :  { %v1149_v26 = vmul.f32 %v1145_v44, %v4063_v54  ;;  %v1147_v15 = vmul.f32 %v1145_v44, %v4073_v58  ;;  %v1151_v27 = vmul.f32 %v1145_v44, %v4087_v63  ;;  %v1148_v36 = vmul.f32 %v1145_v44, %v4084_v62 }
 0x646   :  { %v1150_v56 = vmul.f32 %v1145_v44, %v4244_v57 }
 0x647   :  { %1163 = vrot.lane.b32.xlu0 %v1149_v26, %s3894_s27  ;;  %1159 = vrot.lane.b32.xlu1 %v1147_v15, %s3894_s27  ;;  %v1152_v26 = vmul.f32 %v1145_v44, %v4251_v60 }
 0x64b   :  { %1167 = vrot.lane.b32.xlu0 %v1151_v27, %s3894_s27  ;;  %1161 = vrot.lane.b32.xlu1 %v1148_v36, %s3894_s27  ;;  %v4587_v36 = vpop.permute.xlu1 %523 }
 0x64c   :  { %7392 = vst [vmem:[#allocation54_spill] sm:$0xff] %v4587_v36 }
 0x64f   :  { %1189 = vperm.xlu0 %3810, %v4519_v1   ;;  %1165 = vrot.lane.b32.xlu1 %v1150_v56, %s3894_s27  ;;  %v4591_v56 = vpop.permute.xlu1 %567 }
 0x650   :  { %7393 = vst [vmem:[#allocation55_spill] sm:$0xff] %v4591_v56 }
 0x653   :  { %1169 = vrot.lane.b32.xlu1 %v1152_v26, %s3894_s27  ;;  %3811 = vset.pattern.permute.xlu0 %v7371_v25 }
 0x6b9   :  { %v4583_v15 = vpop.permute.xlu0 %1163 }
 0x6ba   :  { %7390 = vst [vmem:[#allocation52_spill] sm:$0xff] %v4583_v15 }
 0x6bd   :  { %v4585_v27 = vpop.permute.xlu0 %1167 }
 0x6be   :  { %7391 = vst [vmem:[#allocation53_spill] sm:$0xff] %v4585_v27  ;;  %v4599_v27 = vpop.permute.xlu1 %571 }
 0x6bf   :  { %7394 = vst [vmem:[#allocation56_spill] sm:$0xff] %v4599_v27 }
 0x6c2   :  { %v4605_v56 = vpop.permute.xlu1 %613 }
 0x6c3   :  { %7395 = vst [vmem:[#allocation57_spill] sm:$0xff] %v4605_v56 }
 0x6ce   :  { %v1190_v16 = vpop.permute.xlu0 %1189 }
 0x6cf   :  { %v1194_v23 = vmul.f32 %v1190_v16, %v4111_v12  ;;  %v1192_v9 = vmul.f32 %v1190_v16, %v4108_v11  ;;  %v1196_v44 = vmul.f32 %v1190_v16, %v4125_v18  ;;  %v1193_v26 = vmul.f32 %v1190_v16, %v4122_v17 }
 0x6d0   :  { %v1195_v15 = vmul.f32 %v1190_v16, %v4259_v0 }
 0x6d1   :  { %1208 = vrot.lane.b32.xlu0 %v1194_v23, %s3894_s27  ;;  %1204 = vrot.lane.b32.xlu1 %v1192_v9, %s3894_s27  ;;  %v1197_v23 = vmul.f32 %v1190_v16, %v4268_v6 }
 0x6d5   :  { %1212 = vrot.lane.b32.xlu0 %v1196_v44, %s3894_s27  ;;  %1206 = vrot.lane.b32.xlu1 %v1193_v26, %s3894_s27  ;;  %v4613_v26 = vpop.permute.xlu1 %617 }
 0x6d6   :  { %7398 = vst [vmem:[#allocation60_spill] sm:$0xff] %v4613_v26 }
 0x6d9   :  { %1234 = vperm.xlu0 %3811, %v4519_v1   ;;  %1210 = vrot.lane.b32.xlu1 %v1195_v15, %s3894_s27  ;;  %v4617_v15 = vpop.permute.xlu1 %658 }
 0x6da   :  { %7399 = vst [vmem:[#allocation61_spill] sm:$0xff] %v4617_v15 }
 0x6dd   :  { %1214 = vrot.lane.b32.xlu1 %v1197_v23, %s3894_s27  ;;  %3812 = vset.pattern.permute.xlu0 %v7374_v53 }
 0x743   :  { %v4609_v9 = vpop.permute.xlu0 %1208 }
 0x744   :  { %7396 = vst [vmem:[#allocation58_spill] sm:$0xff] %v4609_v9  ;;  %v4630_v9 = vpop.permute.xlu1 %662 }
 0x745   :  { %7400 = vst [vmem:[#allocation62_spill] sm:$0xff] %v4630_v9 }
 0x747   :  { %v4611_v44 = vpop.permute.xlu0 %1212 }
 0x748   :  { %7397 = vst [vmem:[#allocation59_spill] sm:$0xff] %v4611_v44  ;;  %v4628_v44 = vld [vmem:[%s7058_s2 + $0x18] sm:$0xf] }
 0x758   :  { %v1235_v27 = vpop.permute.xlu0 %1234 }
 0x759   :  { %v1239_v36 = vmul.f32 %v1235_v27, %v4139_v34  ;;  %v1237_v1 = vmul.f32 %v1235_v27, %v4144_v35  ;;  %v1241_v16 = vmul.f32 %v1235_v27, %v4157_v46  ;;  %v1238_v23 = vmul.f32 %v1235_v27, %v4160_v47 }
 0x75a   :  { %v1240_v15 = vmul.f32 %v1235_v27, %v4276_v14 }
 0x75b   :  { %1253 = vrot.lane.b32.xlu0 %v1239_v36, %s3894_s27  ;;  %1249 = vrot.lane.b32.xlu1 %v1237_v1, %s3894_s27  ;;  %v1242_v36 = vmul.f32 %v1235_v27, %v4284_v20  ;;  %v4636_v1 = vpop.permute.xlu1 %703 }
 0x75c   :  { %7401 = vst [vmem:[#allocation63_spill] sm:$0xff] %v4636_v1 }
 0x75f   :  { %1257 = vrot.lane.b32.xlu0 %v1241_v16, %s3894_s27  ;;  %1251 = vrot.lane.b32.xlu1 %v1238_v23, %s3894_s27  ;;  %v4644_v26 = vpop.permute.xlu1 %707 }
 0x760   :  { %7404 = vst [vmem:[#allocation66_spill] sm:$0xff] %v4644_v26 }
 0x763   :  { %1282 = vperm.xlu0 %3812, %v4628_v44   ;;  %1255 = vrot.lane.b32.xlu1 %v1240_v15, %s3894_s27  ;;  %v4648_v15 = vpop.permute.xlu1 %745 }
 0x764   :  { %7405 = vst [vmem:[#allocation67_spill] sm:$0xff] %v4648_v15 }
 0x767   :  { %1259 = vrot.lane.b32.xlu1 %v1242_v36, %s3894_s27  ;;  %3813 = vset.pattern.permute.xlu0 %v7365_v28 }
 0x7cd   :  { %v4640_v16 = vpop.permute.xlu0 %1253 }
 0x7ce   :  { %7402 = vst [vmem:[#allocation64_spill] sm:$0xff] %v4640_v16 }
 0x7d1   :  { %v4642_v23 = vpop.permute.xlu0 %1257 }
 0x7d2   :  { %7403 = vst [vmem:[#allocation65_spill] sm:$0xff] %v4642_v23  ;;  %v4656_v23 = vpop.permute.xlu1 %747 }
 0x7d3   :  { %7406 = vst [vmem:[#allocation68_spill] sm:$0xff] %v4656_v23 }
 0x7d6   :  { %v4662_v15 = vpop.permute.xlu1 %751 }
 0x7d7   :  { %7407 = vst [vmem:[#allocation69_spill] sm:$0xff] %v4662_v15 }
 0x7e2   :  { %v1283_v9 = vpop.permute.xlu0 %1282 }
 0x7e3   :  { %v1287_v56 = vmul.f32 %v1283_v9, %v4035_v43  ;;  %v1285_v31 = vmul.f32 %v1283_v9, %v4032_v42  ;;  %v1289_v27 = vmul.f32 %v1283_v9, %v4049_v49  ;;  %v1286_v36 = vmul.f32 %v1283_v9, %v4046_v48 }
 0x7e4   :  { %v1288_v16 = vmul.f32 %v1283_v9, %v4221_v41 }
 0x7e5   :  { %1301 = vrot.lane.b32.xlu0 %v1287_v56, %s3895_s30  ;;  %1297 = vrot.lane.b32.xlu1 %v1285_v31, %s3895_s30  ;;  %v1290_v56 = vmul.f32 %v1283_v9, %v4233_v50 }
 0x7e9   :  { %1305 = vrot.lane.b32.xlu0 %v1289_v27, %s3895_s30  ;;  %1299 = vrot.lane.b32.xlu1 %v1286_v36, %s3895_s30  ;;  %v4670_v36 = vpop.permute.xlu1 %755 }
 0x7ea   :  { %7410 = vst [vmem:[#allocation72_spill] sm:$0xff] %v4670_v36 }
 0x7ed   :  { %1328 = vperm.xlu0 %3813, %v4628_v44   ;;  %1303 = vrot.lane.b32.xlu1 %v1288_v16, %s3895_s30  ;;  %v4674_v16 = vpop.permute.xlu1 %791 }
 0x7ee   :  { %7411 = vst [vmem:[#allocation73_spill] sm:$0xff] %v4674_v16 }
 0x7f1   :  { %1307 = vrot.lane.b32.xlu1 %v1290_v56, %s3895_s30  ;;  %3814 = vset.pattern.permute.xlu0 %v7368_v38 }
 0x857   :  { %v4666_v31 = vpop.permute.xlu0 %1301 }
 0x858   :  { %7408 = vst [vmem:[#allocation70_spill] sm:$0xff] %v4666_v31 }
 0x85b   :  { %v4668_v27 = vpop.permute.xlu0 %1305 }
 0x85c   :  { %7409 = vst [vmem:[#allocation71_spill] sm:$0xff] %v4668_v27  ;;  %v4682_v27 = vpop.permute.xlu1 %793 }
 0x85d   :  { %7412 = vst [vmem:[#allocation74_spill] sm:$0xff] %v4682_v27 }
 0x860   :  { %v4688_v16 = vpop.permute.xlu1 %797 }
 0x861   :  { %7413 = vst [vmem:[#allocation75_spill] sm:$0xff] %v4688_v16 }
 0x86c   :  { %v1329_v23 = vpop.permute.xlu0 %1328 }
 0x86d   :  { %v1333_v26 = vmul.f32 %v1329_v23, %v4063_v54  ;;  %v1331_v1 = vmul.f32 %v1329_v23, %v4073_v58  ;;  %v1335_v9 = vmul.f32 %v1329_v23, %v4087_v63  ;;  %v1332_v56 = vmul.f32 %v1329_v23, %v4084_v62 }
 0x86e   :  { %v1334_v31 = vmul.f32 %v1329_v23, %v4244_v57 }
 0x86f   :  { %1347 = vrot.lane.b32.xlu0 %v1333_v26, %s3895_s30  ;;  %1343 = vrot.lane.b32.xlu1 %v1331_v1, %s3895_s30  ;;  %v1336_v26 = vmul.f32 %v1329_v23, %v4251_v60 }
 0x873   :  { %1351 = vrot.lane.b32.xlu0 %v1335_v9, %s3895_s30  ;;  %1345 = vrot.lane.b32.xlu1 %v1332_v56, %s3895_s30  ;;  %v4696_v56 = vpop.permute.xlu1 %801 }
 0x874   :  { %7416 = vst [vmem:[#allocation78_spill] sm:$0xff] %v4696_v56 }
 0x877   :  { %1373 = vperm.xlu0 %3814, %v4628_v44   ;;  %1349 = vrot.lane.b32.xlu1 %v1334_v31, %s3895_s30  ;;  %v4700_v31 = vpop.permute.xlu1 %836 }
 0x878   :  { %7417 = vst [vmem:[#allocation79_spill] sm:$0xff] %v4700_v31 }
 0x87b   :  { %1353 = vrot.lane.b32.xlu1 %v1336_v26, %s3895_s30  ;;  %3815 = vset.pattern.permute.xlu0 %v7371_v25 }
 0x8e1   :  { %v4692_v1 = vpop.permute.xlu0 %1347 }
 0x8e2   :  { %7414 = vst [vmem:[#allocation76_spill] sm:$0xff] %v4692_v1 }
 0x8e5   :  { %v4694_v9 = vpop.permute.xlu0 %1351 }
 0x8e6   :  { %7415 = vst [vmem:[#allocation77_spill] sm:$0xff] %v4694_v9  ;;  %v4708_v9 = vpop.permute.xlu1 %838 }
 0x8e7   :  { %7418 = vst [vmem:[#allocation80_spill] sm:$0xff] %v4708_v9 }
 0x8ea   :  { %v4714_v31 = vpop.permute.xlu1 %842 }
 0x8eb   :  { %7419 = vst [vmem:[#allocation81_spill] sm:$0xff] %v4714_v31 }
 0x8f6   :  { %v1374_v27 = vpop.permute.xlu0 %1373 }
 0x8f7   :  { %v1378_v36 = vmul.f32 %v1374_v27, %v4111_v12  ;;  %v1376_v15 = vmul.f32 %v1374_v27, %v4108_v11  ;;  %v1380_v23 = vmul.f32 %v1374_v27, %v4125_v18  ;;  %v1377_v26 = vmul.f32 %v1374_v27, %v4122_v17 }
 0x8f8   :  { %v1379_v1 = vmul.f32 %v1374_v27, %v4259_v0 }
 0x8f9   :  { %1392 = vrot.lane.b32.xlu0 %v1378_v36, %s3895_s30  ;;  %1388 = vrot.lane.b32.xlu1 %v1376_v15, %s3895_s30  ;;  %v1381_v36 = vmul.f32 %v1374_v27, %v4268_v6 }
 0x8fd   :  { %1396 = vrot.lane.b32.xlu0 %v1380_v23, %s3895_s30  ;;  %1390 = vrot.lane.b32.xlu1 %v1377_v26, %s3895_s30  ;;  %v4722_v26 = vpop.permute.xlu1 %846 }
 0x8fe   :  { %7422 = vst [vmem:[#allocation84_spill] sm:$0xff] %v4722_v26 }
 0x901   :  { %1418 = vperm.xlu0 %3815, %v4628_v44   ;;  %1394 = vrot.lane.b32.xlu1 %v1379_v1, %s3895_s30  ;;  %v4726_v1 = vpop.permute.xlu1 %881 }
 0x902   :  { %7423 = vst [vmem:[#allocation85_spill] sm:$0xff] %v4726_v1 }
 0x905   :  { %1398 = vrot.lane.b32.xlu1 %v1381_v36, %s3895_s30  ;;  %3816 = vset.pattern.permute.xlu0 %v7374_v53 }
 0x96b   :  { %v4718_v15 = vpop.permute.xlu0 %1392 }
 0x96c   :  { %7420 = vst [vmem:[#allocation82_spill] sm:$0xff] %v4718_v15  ;;  %v4739_v15 = vpop.permute.xlu1 %883 }
 0x96d   :  { %7424 = vst [vmem:[#allocation86_spill] sm:$0xff] %v4739_v15 }
 0x96f   :  { %v4720_v23 = vpop.permute.xlu0 %1396 }
 0x970   :  { %7421 = vst [vmem:[#allocation83_spill] sm:$0xff] %v4720_v23  ;;  %v4737_v23 = vld [vmem:[%s7058_s2 + $0x1c] sm:$0xf] }
 0x980   :  { %v1419_v9 = vpop.permute.xlu0 %1418 }
 0x981   :  { %v1423_v56 = vmul.f32 %v1419_v9, %v4139_v34  ;;  %v1421_v44 = vmul.f32 %v1419_v9, %v4144_v35  ;;  %v1425_v27 = vmul.f32 %v1419_v9, %v4157_v46  ;;  %v1422_v36 = vmul.f32 %v1419_v9, %v4160_v47 }
 0x982   :  { %v1424_v1 = vmul.f32 %v1419_v9, %v4276_v14 }
 0x983   :  { %1437 = vrot.lane.b32.xlu0 %v1423_v56, %s3895_s30  ;;  %1433 = vrot.lane.b32.xlu1 %v1421_v44, %s3895_s30  ;;  %v1426_v56 = vmul.f32 %v1419_v9, %v4284_v20  ;;  %v4745_v44 = vpop.permute.xlu1 %887 }
 0x984   :  { %7425 = vst [vmem:[#allocation87_spill] sm:$0xff] %v4745_v44 }
 0x987   :  { %1441 = vrot.lane.b32.xlu0 %v1425_v27, %s3895_s30  ;;  %1435 = vrot.lane.b32.xlu1 %v1422_v36, %s3895_s30  ;;  %v4753_v26 = vpop.permute.xlu1 %891 }
 0x988   :  { %7428 = vst [vmem:[#allocation90_spill] sm:$0xff] %v4753_v26 }
 0x98b   :  { %1466 = vperm.xlu0 %3816, %v4737_v23   ;;  %1439 = vrot.lane.b32.xlu1 %v1424_v1, %s3895_s30  ;;  %v4757_v1 = vpop.permute.xlu1 %929 }
 0x98c   :  { %7429 = vst [vmem:[#allocation91_spill] sm:$0xff] %v4757_v1 }
 0x98f   :  { %1443 = vrot.lane.b32.xlu1 %v1426_v56, %s3895_s30  ;;  %3817 = vset.pattern.permute.xlu0 %v7365_v28 }
 0x9f5   :  { %v4749_v27 = vpop.permute.xlu0 %1437 }
 0x9f6   :  { %7426 = vst [vmem:[#allocation88_spill] sm:$0xff] %v4749_v27 }
 0x9f9   :  { %v4751_v36 = vpop.permute.xlu0 %1441 }
 0x9fa   :  { %7427 = vst [vmem:[#allocation89_spill] sm:$0xff] %v4751_v36  ;;  %v4765_v36 = vpop.permute.xlu1 %931 }
 0x9fb   :  { %7430 = vst [vmem:[#allocation92_spill] sm:$0xff] %v4765_v36 }
 0x9fe   :  { %v4771_v1 = vpop.permute.xlu1 %935 }
 0x9ff   :  { %7431 = vst [vmem:[#allocation93_spill] sm:$0xff] %v4771_v1 }
 0xa0a   :  { %v1467_v15 = vpop.permute.xlu0 %1466 }
 0xa0b   :  { %v1471_v31 = vmul.f32 %v1467_v15, %v4035_v43  ;;  %v1469_v16 = vmul.f32 %v1467_v15, %v4032_v42  ;;  %v1473_v9 = vmul.f32 %v1467_v15, %v4049_v49  ;;  %v1470_v56 = vmul.f32 %v1467_v15, %v4046_v48 }
 0xa0c   :  { %v1472_v27 = vmul.f32 %v1467_v15, %v4221_v41 }
 0xa0d   :  { %1485 = vrot.lane.b32.xlu0 %v1471_v31, %s3896_s12  ;;  %1481 = vrot.lane.b32.xlu1 %v1469_v16, %s3896_s12  ;;  %v1474_v31 = vmul.f32 %v1467_v15, %v4233_v50 }
 0xa11   :  { %1489 = vrot.lane.b32.xlu0 %v1473_v9, %s3896_s12  ;;  %1483 = vrot.lane.b32.xlu1 %v1470_v56, %s3896_s12  ;;  %v4779_v56 = vpop.permute.xlu1 %939 }
 0xa12   :  { %7434 = vst [vmem:[#allocation96_spill] sm:$0xff] %v4779_v56 }
 0xa15   :  { %1512 = vperm.xlu0 %3817, %v4737_v23   ;;  %1487 = vrot.lane.b32.xlu1 %v1472_v27, %s3896_s12  ;;  %v4783_v27 = vpop.permute.xlu1 %975 }
 0xa16   :  { %7435 = vst [vmem:[#allocation97_spill] sm:$0xff] %v4783_v27 }
 0xa19   :  { %1491 = vrot.lane.b32.xlu1 %v1474_v31, %s3896_s12  ;;  %3818 = vset.pattern.permute.xlu0 %v7368_v38 }
 0xa7f   :  { %v4775_v16 = vpop.permute.xlu0 %1485 }
 0xa80   :  { %7432 = vst [vmem:[#allocation94_spill] sm:$0xff] %v4775_v16 }
 0xa83   :  { %v4777_v9 = vpop.permute.xlu0 %1489 }
 0xa84   :  { %7433 = vst [vmem:[#allocation95_spill] sm:$0xff] %v4777_v9  ;;  %v4791_v9 = vpop.permute.xlu1 %977 }
 0xa85   :  { %7436 = vst [vmem:[#allocation98_spill] sm:$0xff] %v4791_v9 }
 0xa88   :  { %v4797_v27 = vpop.permute.xlu1 %981 }
 0xa89   :  { %7437 = vst [vmem:[#allocation99_spill] sm:$0xff] %v4797_v27 }
 0xa94   :  { %v1513_v36 = vpop.permute.xlu0 %1512 }
 0xa95   :  { %v1517_v26 = vmul.f32 %v1513_v36, %v4063_v54  ;;  %v1515_v44 = vmul.f32 %v1513_v36, %v4073_v58  ;;  %v1519_v15 = vmul.f32 %v1513_v36, %v4087_v63  ;;  %v1516_v31 = vmul.f32 %v1513_v36, %v4084_v62 }
 0xa96   :  { %v1518_v16 = vmul.f32 %v1513_v36, %v4244_v57 }
 0xa97   :  { %1531 = vrot.lane.b32.xlu0 %v1517_v26, %s3896_s12  ;;  %1527 = vrot.lane.b32.xlu1 %v1515_v44, %s3896_s12  ;;  %v1520_v26 = vmul.f32 %v1513_v36, %v4251_v60 }
 0xa9b   :  { %1535 = vrot.lane.b32.xlu0 %v1519_v15, %s3896_s12  ;;  %1529 = vrot.lane.b32.xlu1 %v1516_v31, %s3896_s12  ;;  %v4805_v31 = vpop.permute.xlu1 %985 }
 0xa9c   :  { %7440 = vst [vmem:[#allocation102_spill] sm:$0xff] %v4805_v31 }
 0xa9f   :  { %1557 = vperm.xlu0 %3818, %v4737_v23   ;;  %1533 = vrot.lane.b32.xlu1 %v1518_v16, %s3896_s12  ;;  %v4809_v16 = vpop.permute.xlu1 %1020 }
 0xaa0   :  { %7441 = vst [vmem:[#allocation103_spill] sm:$0xff] %v4809_v16 }
 0xaa3   :  { %1537 = vrot.lane.b32.xlu1 %v1520_v26, %s3896_s12  ;;  %3819 = vset.pattern.permute.xlu0 %v7371_v25 }
 0xb09   :  { %v4801_v44 = vpop.permute.xlu0 %1531 }
 0xb0a   :  { %7438 = vst [vmem:[#allocation100_spill] sm:$0xff] %v4801_v44 }
 0xb0d   :  { %v4803_v15 = vpop.permute.xlu0 %1535 }
 0xb0e   :  { %7439 = vst [vmem:[#allocation101_spill] sm:$0xff] %v4803_v15  ;;  %v4817_v15 = vpop.permute.xlu1 %1022 }
 0xb0f   :  { %7442 = vst [vmem:[#allocation104_spill] sm:$0xff] %v4817_v15 }
 0xb12   :  { %v4823_v16 = vpop.permute.xlu1 %1026 }
 0xb13   :  { %7443 = vst [vmem:[#allocation105_spill] sm:$0xff] %v4823_v16 }
 0xb1e   :  { %v1558_v9 = vpop.permute.xlu0 %1557 }
 0xb1f   :  { %v1562_v56 = vmul.f32 %v1558_v9, %v4111_v12  ;;  %v1560_v1 = vmul.f32 %v1558_v9, %v4108_v11  ;;  %v1564_v36 = vmul.f32 %v1558_v9, %v4125_v18  ;;  %v1561_v26 = vmul.f32 %v1558_v9, %v4122_v17 }
 0xb20   :  { %v1563_v44 = vmul.f32 %v1558_v9, %v4259_v0 }
 0xb21   :  { %1576 = vrot.lane.b32.xlu0 %v1562_v56, %s3896_s12  ;;  %1572 = vrot.lane.b32.xlu1 %v1560_v1, %s3896_s12  ;;  %v1565_v56 = vmul.f32 %v1558_v9, %v4268_v6 }
 0xb25   :  { %1580 = vrot.lane.b32.xlu0 %v1564_v36, %s3896_s12  ;;  %1574 = vrot.lane.b32.xlu1 %v1561_v26, %s3896_s12  ;;  %v4831_v26 = vpop.permute.xlu1 %1030 }
 0xb26   :  { %7446 = vst [vmem:[#allocation108_spill] sm:$0xff] %v4831_v26 }
 0xb29   :  { %1602 = vperm.xlu0 %3819, %v4737_v23   ;;  %1578 = vrot.lane.b32.xlu1 %v1563_v44, %s3896_s12  ;;  %v4835_v44 = vpop.permute.xlu1 %1065 }
 0xb2a   :  { %7447 = vst [vmem:[#allocation109_spill] sm:$0xff] %v4835_v44 }
 0xb2d   :  { %1582 = vrot.lane.b32.xlu1 %v1565_v56, %s3896_s12  ;;  %3820 = vset.pattern.permute.xlu0 %v7374_v53 }
 0xb93   :  { %v4827_v1 = vpop.permute.xlu0 %1576 }
 0xb94   :  { %7444 = vst [vmem:[#allocation106_spill] sm:$0xff] %v4827_v1  ;;  %v4848_v1 = vpop.permute.xlu1 %1067 }
 0xb95   :  { %7448 = vst [vmem:[#allocation110_spill] sm:$0xff] %v4848_v1 }
 0xb97   :  { %v4829_v36 = vpop.permute.xlu0 %1580 }
 0xb98   :  { %7445 = vst [vmem:[#allocation107_spill] sm:$0xff] %v4829_v36  ;;  %v4846_v36 = vld [vmem:[%s7058_s2 + $0x20] sm:$0xf]  ;;  %s3897_s2 = smov 90  }
 0xba8   :  { %v1603_v15 = vpop.permute.xlu0 %1602 }
 0xba9   :  { %v1607_v31 = vmul.f32 %v1603_v15, %v4139_v34  ;;  %v1605_v23 = vmul.f32 %v1603_v15, %v4144_v35  ;;  %v1609_v9 = vmul.f32 %v1603_v15, %v4157_v46  ;;  %v1606_v56 = vmul.f32 %v1603_v15, %v4160_v47 }
 0xbaa   :  { %v1608_v44 = vmul.f32 %v1603_v15, %v4276_v14 }
 0xbab   :  { %1621 = vrot.lane.b32.xlu0 %v1607_v31, %s3896_s12  ;;  %1617 = vrot.lane.b32.xlu1 %v1605_v23, %s3896_s12  ;;  %v1610_v31 = vmul.f32 %v1603_v15, %v4284_v20  ;;  %v4854_v23 = vpop.permute.xlu1 %1071 }
 0xbac   :  { %7449 = vst [vmem:[#allocation111_spill] sm:$0xff] %v4854_v23 }
 0xbaf   :  { %1625 = vrot.lane.b32.xlu0 %v1609_v9, %s3896_s12  ;;  %1619 = vrot.lane.b32.xlu1 %v1606_v56, %s3896_s12  ;;  %v4862_v26 = vpop.permute.xlu1 %1075 }
 0xbb0   :  { %7452 = vst [vmem:[#allocation114_spill] sm:$0xff] %v4862_v26 }
 0xbb3   :  { %1650 = vperm.xlu0 %3820, %v4846_v36   ;;  %1623 = vrot.lane.b32.xlu1 %v1608_v44, %s3896_s12  ;;  %v4866_v44 = vpop.permute.xlu1 %1113 }
 0xbb4   :  { %7453 = vst [vmem:[#allocation115_spill] sm:$0xff] %v4866_v44 }
 0xbb7   :  { %1627 = vrot.lane.b32.xlu1 %v1610_v31, %s3896_s12  ;;  %3821 = vset.pattern.permute.xlu0 %v7365_v28 }
 0xc1d   :  { %v4858_v9 = vpop.permute.xlu0 %1621 }
 0xc1e   :  { %7450 = vst [vmem:[#allocation112_spill] sm:$0xff] %v4858_v9 }
 0xc21   :  { %v4860_v56 = vpop.permute.xlu0 %1625 }
 0xc22   :  { %7451 = vst [vmem:[#allocation113_spill] sm:$0xff] %v4860_v56  ;;  %v4874_v56 = vpop.permute.xlu1 %1115 }
 0xc23   :  { %7454 = vst [vmem:[#allocation116_spill] sm:$0xff] %v4874_v56 }
 0xc26   :  { %v4880_v44 = vpop.permute.xlu1 %1119 }
 0xc32   :  { %v1651_v1 = vpop.permute.xlu0 %1650 }
 0xc33   :  { %v1655_v16 = vmul.f32 %v1651_v1, %v4035_v43  ;;  %v1653_v27 = vmul.f32 %v1651_v1, %v4032_v42  ;;  %v1657_v15 = vmul.f32 %v1651_v1, %v4049_v49  ;;  %v1654_v31 = vmul.f32 %v1651_v1, %v4046_v48 }
 0xc34   :  { %v1656_v9 = vmul.f32 %v1651_v1, %v4221_v41 }
 0xc35   :  { %1669 = vrot.lane.b32.xlu0 %v1655_v16, %s3897_s2  ;;  %1665 = vrot.lane.b32.xlu1 %v1653_v27, %s3897_s2  ;;  %v1658_v16 = vmul.f32 %v1651_v1, %v4233_v50 }
 0xc39   :  { %1673 = vrot.lane.b32.xlu0 %v1657_v15, %s3897_s2  ;;  %1667 = vrot.lane.b32.xlu1 %v1654_v31, %s3897_s2  ;;  %v4888_v31 = vpop.permute.xlu1 %1123 }
 0xc3a   :  { %7457 = vst [vmem:[#allocation119_spill] sm:$0xff] %v4888_v31 }
 0xc3d   :  { %1696 = vperm.xlu0 %3821, %v4846_v36   ;;  %1671 = vrot.lane.b32.xlu1 %v1656_v9, %s3897_s2  ;;  %v4892_v9 = vpop.permute.xlu1 %1159 }
 0xc3e   :  { %7458 = vst [vmem:[#allocation120_spill] sm:$0xff] %v4892_v9 }
 0xc41   :  { %1675 = vrot.lane.b32.xlu1 %v1658_v16, %s3897_s2  ;;  %3822 = vset.pattern.permute.xlu0 %v7368_v38  ;;  %v4900_v38 = vpop.permute.xlu1 %1161 }
 0xc42   :  { %7459 = vst [vmem:[#allocation121_spill] sm:$0xff] %v4900_v38 }
 0xca7   :  { %v4884_v27 = vpop.permute.xlu0 %1669 }
 0xca8   :  { %7455 = vst [vmem:[#allocation117_spill] sm:$0xff] %v4884_v27  ;;  %v4906_v27 = vpop.permute.xlu1 %1165 }
 0xca9   :  { %7460 = vst [vmem:[#allocation122_spill] sm:$0xff] %v4906_v27 }
 0xcab   :  { %v4886_v15 = vpop.permute.xlu0 %1673 }
 0xcac   :  { %7456 = vst [vmem:[#allocation118_spill] sm:$0xff] %v4886_v15 }
 0xcbc   :  { %v1697_v56 = vpop.permute.xlu0 %1696 }
 0xcbd   :  { %v1701_v26 = vmul.f32 %v1697_v56, %v4063_v54  ;;  %v1699_v23 = vmul.f32 %v1697_v56, %v4073_v58  ;;  %v1703_v1 = vmul.f32 %v1697_v56, %v4087_v63  ;;  %v1700_v16 = vmul.f32 %v1697_v56, %v4084_v62 }
 0xcbe   :  { %v1702_v15 = vmul.f32 %v1697_v56, %v4244_v57 }
 0xcbf   :  { %1715 = vrot.lane.b32.xlu0 %v1701_v26, %s3897_s2  ;;  %1711 = vrot.lane.b32.xlu1 %v1699_v23, %s3897_s2  ;;  %v1704_v26 = vmul.f32 %v1697_v56, %v4251_v60  ;;  %v4910_v23 = vpop.permute.xlu1 %1169 }
 0xcc0   :  { %7461 = vst [vmem:[#allocation123_spill] sm:$0xff] %v4910_v23 }
 0xcc3   :  { %1719 = vrot.lane.b32.xlu0 %v1703_v1, %s3897_s2  ;;  %1713 = vrot.lane.b32.xlu1 %v1700_v16, %s3897_s2  ;;  %v4912_v1 = vpop.permute.xlu1 %1204 }
 0xcc4   :  { %7462 = vst [vmem:[#allocation124_spill] sm:$0xff] %v4912_v1 }
 0xcc7   :  { %1741 = vperm.xlu0 %3822, %v4846_v36   ;;  %1717 = vrot.lane.b32.xlu1 %v1702_v15, %s3897_s2  ;;  %v4914_v16 = vpop.permute.xlu1 %1206 }
 0xccb   :  { %1721 = vrot.lane.b32.xlu1 %v1704_v26, %s3897_s2  ;;  %3823 = vset.pattern.permute.xlu0 %v7371_v25  ;;  %v4916_v9 = vpop.permute.xlu1 %1210 }
 0xccf   :  { %v4918_v38 = vpop.permute.xlu1 %1214 }
 0xcd0   :  { %7463 = vst [vmem:[#allocation125_spill] sm:$0xff] %v4918_v38 }
 0xcd3   :  { %v4922_v15 = vpop.permute.xlu1 %1249 }
 0xcd4   :  { %7465 = vst [vmem:[#allocation127_spill] sm:$0xff] %v4922_v15 }
 0xcd7   :  { %v4926_v27 = vpop.permute.xlu1 %1251 }
 0xcd8   :  { %7467 = vst [vmem:[#allocation129_spill] sm:$0xff] %v4926_v27 }
 0xcdb   :  { %v4930_v1 = vpop.permute.xlu1 %1255 }
 0xcdc   :  { %7468 = vst [vmem:[#allocation130_spill] sm:$0xff] %v4930_v1 }
 0xd31   :  { %v4920_v31 = vpop.permute.xlu0 %1715 }
 0xd32   :  { %7464 = vst [vmem:[#allocation126_spill] sm:$0xff] %v4920_v31 }
 0xd35   :  { %v4924_v56 = vpop.permute.xlu0 %1719 }
 0xd36   :  { %7466 = vst [vmem:[#allocation128_spill] sm:$0xff] %v4924_v56  ;;  %v4938_v56 = vpop.permute.xlu1 %1259 }
 0xd37   :  { %7469 = vst [vmem:[#allocation131_spill] sm:$0xff] %v4938_v56 }
 0xd3a   :  { %v4943_v1 = vpop.permute.xlu1 %1297 }
 0xd3b   :  { %7470 = vst [vmem:[#allocation132_spill] sm:$0xff] %v4943_v1 }
 0xd46   :  { %v1742_v26 = vpop.permute.xlu0 %1741 }
 0xd47   :  { %v1746_v25 = vmul.f32 %v1742_v26, %v4111_v12  ;;  %v1744_v23 = vmul.f32 %v1742_v26, %v4108_v11  ;;  %v1748_v38 = vmul.f32 %v1742_v26, %v4125_v18  ;;  %v1745_v31 = vmul.f32 %v1742_v26, %v4122_v17 }
 0xd48   :  { %v1747_v15 = vmul.f32 %v1742_v26, %v4259_v0 }
 0xd49   :  { %1760 = vrot.lane.b32.xlu0 %v1746_v25, %s3897_s2  ;;  %1756 = vrot.lane.b32.xlu1 %v1744_v23, %s3897_s2  ;;  %v1749_v25 = vmul.f32 %v1742_v26, %v4268_v6  ;;  %v4948_v23 = vpop.permute.xlu1 %1299 }
 0xd4a   :  { %7471 = vst [vmem:[#allocation133_spill] sm:$0xff] %v4948_v23 }
 0xd4d   :  { %1764 = vrot.lane.b32.xlu0 %v1748_v38, %s3897_s2  ;;  %1758 = vrot.lane.b32.xlu1 %v1745_v31, %s3897_s2  ;;  %v4950_v38 = vpop.permute.xlu1 %1303 }
 0xd4e   :  { %7472 = vst [vmem:[#allocation134_spill] sm:$0xff] %v4950_v38 }
 0xd51   :  { %1786 = vperm.xlu0 %3823, %v4846_v36   ;;  %1762 = vrot.lane.b32.xlu1 %v1747_v15, %s3897_s2  ;;  %v4952_v31 = vpop.permute.xlu1 %1307 }
 0xd52   :  { %7473 = vst [vmem:[#allocation135_spill] sm:$0xff] %v4952_v31 }
 0xd55   :  { %1766 = vrot.lane.b32.xlu1 %v1749_v25, %s3897_s2  ;;  %3824 = vset.pattern.permute.xlu0 %v7374_v53  ;;  %v4954_v56 = vpop.permute.xlu1 %1343 }
 0xd56   :  { %7474 = vst [vmem:[#allocation136_spill] sm:$0xff] %v4954_v56 }
 0xd59   :  { %v4956_v27 = vpop.permute.xlu1 %1345 }
 0xd5a   :  { %7475 = vst [vmem:[#allocation137_spill] sm:$0xff] %v4956_v27 }
 0xd5d   :  { %v4958_v36 = vpop.permute.xlu1 %1349 }
 0xd5e   :  { %7476 = vst [vmem:[#allocation138_spill] sm:$0xff] %v4958_v36 }
 0xd61   :  { %v4960_v15 = vpop.permute.xlu1 %1353 }
 0xd62   :  { %7477 = vst [vmem:[#allocation139_spill] sm:$0xff] %v4960_v15 }
 0xd65   :  { %v4962_v1 = vpop.permute.xlu1 %1388 }
 0xd66   :  { %7478 = vst [vmem:[#allocation140_spill] sm:$0xff] %v4962_v1 }
 0xd69   :  { %v4964_v26 = vpop.permute.xlu1 %1390 }
 0xd6a   :  { %7479 = vst [vmem:[#allocation141_spill] sm:$0xff] %v4964_v26 }
 0xd6d   :  { %v4966_v25 = vpop.permute.xlu1 %1394 }
 0xd6e   :  { %7480 = vst [vmem:[#allocation142_spill] sm:$0xff] %v4966_v25 }
 0xd71   :  { %v4968_v53 = vpop.permute.xlu1 %1398 }
 0xd72   :  { %7481 = vst [vmem:[#allocation143_spill] sm:$0xff] %v4968_v53 }
 0xd75   :  { %v4970_v23 = vpop.permute.xlu1 %1433 }
 0xd76   :  { %7482 = vst [vmem:[#allocation144_spill] sm:$0xff] %v4970_v23 }
 0xd79   :  { %v4972_v38 = vpop.permute.xlu1 %1435 }
 0xd7a   :  { %7483 = vst [vmem:[#allocation145_spill] sm:$0xff] %v4972_v38 }
 0xd7d   :  { %v4974_v31 = vpop.permute.xlu1 %1439 }
 0xd7e   :  { %7484 = vst [vmem:[#allocation146_spill] sm:$0xff] %v4974_v31 }
 0xd81   :  { %v4976_v56 = vpop.permute.xlu1 %1443 }
 0xd82   :  { %7485 = vst [vmem:[#allocation147_spill] sm:$0xff] %v4976_v56 }
 0xd85   :  { %v4978_v27 = vpop.permute.xlu1 %1481 }
 0xd86   :  { %7486 = vst [vmem:[#allocation148_spill] sm:$0xff] %v4978_v27 }
 0xd89   :  { %v4980_v36 = vpop.permute.xlu1 %1483 }
 0xd8a   :  { %7487 = vst [vmem:[#allocation149_spill] sm:$0xff] %v4980_v36 }
 0xd8d   :  { %v4982_v15 = vpop.permute.xlu1 %1487 }
 0xd91   :  { %v4984_v1 = vpop.permute.xlu1 %1491 }
 0xd95   :  { %v4986_v26 = vpop.permute.xlu1 %1527 }
 0xd96   :  { %7488 = vst [vmem:[#allocation150_spill] sm:$0xff] %v4986_v26 }
 0xd99   :  { %v4990_v53 = vpop.permute.xlu1 %1529 }
 0xd9a   :  { %7490 = vst [vmem:[#allocation152_spill] sm:$0xff] %v4990_v53 }
 0xd9d   :  { %v4994_v38 = vpop.permute.xlu1 %1533 }
 0xda1   :  { %v4998_v36 = vpop.permute.xlu1 %1537 }
 0xda2   :  { %7492 = vst [vmem:[#allocation154_spill] sm:$0xff] %v4998_v36 }
 0xda5   :  { %v5004_v53 = vpop.permute.xlu1 %1572 }
 0xda6   :  { %7493 = vst [vmem:[#allocation155_spill] sm:$0xff] %v5004_v53 }
 0xdbb   :  { %v4988_v25 = vpop.permute.xlu0 %1760 }
 0xdbc   :  { %7489 = vst [vmem:[#allocation151_spill] sm:$0xff] %v4988_v25 }
 0xdbf   :  { %v4992_v23 = vpop.permute.xlu0 %1764 }
 0xdc0   :  { %7491 = vst [vmem:[#allocation153_spill] sm:$0xff] %v4992_v23  ;;  %v1830_v23 = vld [vmem:[%s7059_s3] sm:$0xf] }
 0xdd0   :  { %v1787_v31 = vpop.permute.xlu0 %1786 }
 0xdd1   :  { %v1791_v56 = vmul.f32 %v1787_v31, %v4139_v34  ;;  %v1789_v27 = vmul.f32 %v1787_v31, %v4144_v35  ;;  %v1793_v26 = vmul.f32 %v1787_v31, %v4157_v46  ;;  %v1790_v25 = vmul.f32 %v1787_v31, %v4160_v47 }
 0xdd2   :  { %v1792_v36 = vmul.f32 %v1787_v31, %v4276_v14 }
 0xdd3   :  { %1805 = vrot.lane.b32.xlu0 %v1791_v56, %s3897_s2  ;;  %1801 = vrot.lane.b32.xlu1 %v1789_v27, %s3897_s2  ;;  %v5013_v27 = vpop.permute.xlu1 %1574  ;;  %v1794_v56 = vmul.f32 %v1787_v31, %v4284_v20  ;;  %v206_v31 = vmul.f32 %v3990_v22, %v4073_v58  ;;  %v346_v58 = vmul.f32 %v4426_v19, %v4144_v35 }
 0xdd4   :  { %7494 = vst [vmem:[#allocation156_spill] sm:$0xff] %v5013_v27  ;;  %v136_v27 = vmul.f32 %v4412_v7, %v4032_v42  ;;  %v138_v42 = vmul.f32 %v4412_v7, %v4035_v43  ;;  %v209_v43 = vmul.f32 %v3990_v22, %v4244_v57  ;;  %v279_v57 = vmul.f32 %v4418_v21, %v4259_v0 }
 0xdd5   :  { %v481_v0 = vsel %vm7225_vm9, %v4464_v29, %v4321_v59 }
 0xdd7   :  { %1809 = vrot.lane.b32.xlu0 %v1793_v26, %s3897_s2  ;;  %1803 = vrot.lane.b32.xlu1 %v1790_v25, %s3897_s2  ;;  %v1848_v26 = vld [vmem:[%s7060_s4] sm:$0xf]  ;;  %v5021_v25 = vpop.permute.xlu1 %1578 }
 0xdd8   :  { %7495 = vst [vmem:[#allocation157_spill] sm:$0xff] %v5021_v25 }
 0xddb   :  { %1833 = vperm.xlu0 %3824, %v1830_v23   ;;  %1807 = vrot.lane.b32.xlu1 %v1792_v36, %s3897_s2  ;;  %v5024_v23 = vpop.permute.xlu1 %1582 }
 0xddc   :  { %7496 = vst [vmem:[#allocation158_spill] sm:$0xff] %v5024_v23  ;;  %v212_v23 = vadd.f32 %v206_v31, %v136_v27  ;;  %v208_v27 = vmul.f32 %v3990_v22, %v4063_v54  ;;  %v141_v31 = vmul.f32 %v4412_v7, %v4233_v50  ;;  %v211_v54 = vmul.f32 %v3990_v22, %v4251_v60 }
 0xddd   :  { %v278_v50 = vmul.f32 %v4418_v21, %v4111_v12  ;;  %v480_v60 = vsel %vm7225_vm9, %v4456_v30, %v4464_v29  ;;  %v281_v29 = vmul.f32 %v4418_v21, %v4268_v6  ;;  %v351_v6 = vmul.f32 %v4426_v19, %v4284_v20 }
 0xddf   :  { %1811 = vrot.lane.b32.xlu1 %v1794_v56, %s3897_s2  ;;  %3829 = vset.pattern.permute.xlu0 %v7365_v28  ;;  %v5026_v36 = vpop.permute.xlu1 %1617  ;;  %v207_v56 = vmul.f32 %v3990_v22, %v4084_v62  ;;  %v347_v62 = vmul.f32 %v4426_v19, %v4160_v47  ;;  %v390_v47 = vsel %vm7225_vm9, %v4430_v2, %v4438_v39 }
 0xde0   :  { %7497 = vst [vmem:[#allocation159_spill] sm:$0xff] %v5026_v36  ;;  %v277_v36 = vmul.f32 %v4418_v21, %v4122_v17  ;;  %v140_v17 = vmul.f32 %v4412_v7, %v4049_v49  ;;  %v210_v49 = vmul.f32 %v3990_v22, %v4087_v63  ;;  %v435_v2 = vsel %vm7225_vm9, %v4444_v8, %v4452_v32 }
 0xde1   :  { %v280_v63 = vmul.f32 %v4418_v21, %v4125_v18  ;;  %v214_v8 = vadd.f32 %v208_v27, %v138_v42  ;;  %v525_v18 = vsel %vm7225_vm9, %v4470_v52, %v4478_v51  ;;  %v349_v52 = vmul.f32 %v4426_v19, %v4276_v14 }
 0xde2   :  { %v350_v27 = vmul.f32 %v4426_v19, %v4157_v46  ;;  %v393_v46 = vsel %vm7225_vm9, %v4539_v4, %v4309_v45 }
 0xde3   :  { %1851 = vperm.xlu1 %3825, %v1848_v26   ;;  %v5032_v53 = vpop.permute.xlu1 %1619  ;;  %v137_v26 = vmul.f32 %v4412_v7, %v4046_v48  ;;  %v139_v48 = vmul.f32 %v4412_v7, %v4221_v41  ;;  %v391_v41 = vsel %vm7225_vm9, %v4438_v39, %v4304_v40  ;;  %v436_v39 = vsel %vm7225_vm9, %v4452_v32, %v4314_v24 }
 0xde4   :  { %7498 = vst [vmem:[#allocation160_spill] sm:$0xff] %v5032_v53  ;;  %v348_v32 = vmul.f32 %v4426_v19, %v4139_v34  ;;  %v392_v19 = vsel %vm7225_vm9, %v4304_v40, %v4539_v4 }
 0xde5   :  { %v213_v25 = vadd.f32 %v207_v56, %v137_v26  ;;  %v216_v26 = vadd.f32 %v210_v49, %v140_v17 }
 0xde7   :  { %3826 = vset.pattern.permute.xlu1 %v7365_v28  ;;  %v276_v28 = vmul.f32 %v4418_v21, %v4108_v11  ;;  %v5046_v53 = vpop.permute.xlu1 %1623  ;;  %v283_v35 = vadd.f32 %v277_v36, %v213_v25  ;;  %v286_v14 = vadd.f32 %v280_v63, %v216_v26  ;;  %v7503_v63 = vld [vmem:[#allocation21_spill] sm:$0xff] }
 0xde9   :  { %v282_v11 = vadd.f32 %v276_v28, %v212_v23  ;;  %v353_v28 = vadd.f32 %v347_v62, %v283_v35  ;;  %v215_v23 = vadd.f32 %v209_v43, %v139_v48  ;;  %v217_v62 = vadd.f32 %v211_v54, %v141_v31 }
 0xdea   :  { %v574_v48 = vsel %vm7224_vm10, %v4482_v55, %v4490_v13  ;;  %v619_v55 = vsel %vm7224_vm10, %v4496_v33, %v4504_v5  ;;  %v620_v31 = vsel %vm7224_vm10, %v4504_v5, %v4333_v10  ;;  %v356_v33 = vadd.f32 %v350_v27, %v286_v14  ;;  %v7511_v14 = vld [vmem:[#allocation55_spill] sm:$0xff] }
 0xdeb   :  { %v352_v56 = vadd.f32 %v346_v58, %v282_v11  ;;  %v402_v22 = vadd.f32 %v391_v41, %v353_v28  ;;  %v5085_v25 = vpop.permute.xlu1 %1627  ;;  %v526_v58 = vsel %vm7225_vm9, %v4478_v51, %v4325_v61  ;;  %v284_v11 = vadd.f32 %v278_v50, %v214_v8  ;;  %v7499_v28 = vld [vmem:[#allocation40_spill] sm:$0xff] }
 0xdec   :  { %v575_v51 = vsel %vm7224_vm10, %v4490_v13, %v4329_v3  ;;  %v285_v35 = vadd.f32 %v279_v57, %v215_v23  ;;  %v287_v13 = vadd.f32 %v281_v29, %v217_v62  ;;  %v394_v54 = vsel %vm7225_vm9, %v4309_v45, %v4547_v37  ;;  %v7501_v57 = vld [vmem:[#allocation45_spill] sm:$0xff]  ;;  %v7504_v8 = vld [vmem:[#allocation48_spill] sm:$0xff]  ;;  %v7507_v62 = vld [vmem:[#allocation50_spill] sm:$0xff] }
 0xded   :  { %v401_v7 = vadd.f32 %v390_v47, %v352_v56  ;;  %v447_v36 = vadd.f32 %v436_v39, %v402_v22  ;;  %v354_v43 = vadd.f32 %v348_v32, %v284_v11  ;;  %v437_v40 = vsel %vm7225_vm9, %v4314_v24, %v7501_v57  ;;  %v7505_v24 = vld [vmem:[#allocation49_spill] sm:$0xff]  ;;  %v7508_v11 = vld [vmem:[#allocation51_spill] sm:$0xff] }
 0xdee   :  { %v355_v41 = vadd.f32 %v349_v52, %v285_v35  ;;  %v357_v49 = vadd.f32 %v351_v6, %v287_v13  ;;  %v665_v22 = vsel %vm7224_vm10, %v7499_v28, %v7503_v63  ;;  %v7509_v52 = vld [vmem:[#allocation18_spill] sm:$0xff]  ;;  %v7513_v13 = vld [vmem:[#allocation44_spill] sm:$0xff] }
 0xdef   :  { %v446_v12 = vadd.f32 %v435_v2, %v401_v7  ;;  %v492_v42 = vadd.f32 %v481_v0, %v447_v36  ;;  %v5105_v34 = vpop.permute.xlu1 %1665  ;;  %v7500_v2 = vld [vmem:[#allocation39_spill] sm:$0xff]  ;;  %v7502_v7 = vld [vmem:[#allocation16_spill] sm:$0xff]  ;;  %v403_v45 = vadd.f32 %v392_v19, %v354_v43  ;;  %v405_v0 = vadd.f32 %v394_v54, %v356_v33  ;;  %v7510_v6 = vld [vmem:[#allocation54_spill] sm:$0xff] }
 0xdf0   :  { %v664_v50 = vsel %vm7224_vm10, %v7500_v2, %v7499_v28  ;;  %v438_v4 = vsel %vm7225_vm9, %v7501_v57, %v7502_v7  ;;  %v406_v23 = vadd.f32 %v4547_v37, %v357_v49  ;;  %v482_v36 = vsel %vm7225_vm9, %v4321_v59, %v7505_v24  ;;  %v7517_v28 = vld [vmem:[#allocation20_spill] sm:$0xff] }
 0xdf1   :  { %v491_v30 = vadd.f32 %v480_v60, %v446_v12  ;;  %v537_v21 = vadd.f32 %v526_v58, %v492_v42  ;;  %v404_v60 = vadd.f32 %v393_v46, %v355_v41  ;;  %v439_v12 = vsel %vm7225_vm9, %v7502_v7, %v7504_v8 }
 0xdf2   :  { %v450_v42 = vadd.f32 %v439_v12, %v405_v0  ;;  %v527_v37 = vsel %vm7225_vm9, %v4325_v61, %v7508_v11  ;;  %v528_v59 = vsel %vm7225_vm9, %v7508_v11, %v7509_v52  ;;  %v7521_v12 = vld [vmem:[#allocation22_spill] sm:$0xff] }
 0xdf3   :  { %v536_v17 = vadd.f32 %v525_v18, %v491_v30  ;;  %v586_v56 = vadd.f32 %v575_v51, %v537_v21  ;;  %v5138_v39 = vpop.permute.xlu1 %1667  ;;  %v7506_v18 = vld [vmem:[#allocation17_spill] sm:$0xff]  ;;  %v448_v30 = vadd.f32 %v437_v40, %v403_v45  ;;  %v449_v58 = vadd.f32 %v438_v4, %v404_v60  ;;  %v7519_v4 = vld [vmem:[#allocation60_spill] sm:$0xff] }
 0xdf4   :  { %v483_v32 = vsel %vm7225_vm9, %v7505_v24, %v7506_v18  ;;  %v484_v29 = vsel %vm7225_vm9, %v7506_v18, %v7507_v62  ;;  %v529_v21 = vsel %vm7225_vm9, %v7509_v52, %v7510_v6 }
 0xdf5   :  { %v585_v47 = vadd.f32 %v574_v48, %v536_v17  ;;  %v631_v5 = vadd.f32 %v620_v31, %v586_v56  ;;  %v451_v48 = vadd.f32 %v7504_v8, %v406_v23  ;;  %v493_v51 = vadd.f32 %v482_v36, %v448_v30  ;;  %v7512_v31 = vld [vmem:[#allocation19_spill] sm:$0xff]  ;;  %v7514_v56 = vld [vmem:[#allocation41_spill] sm:$0xff]  ;;  %v7522_v36 = vld [vmem:[#allocation62_spill] sm:$0xff] }
 0xdf6   :  { %v494_v27 = vadd.f32 %v483_v32, %v449_v58  ;;  %v577_v61 = vsel %vm7224_vm10, %v7511_v14, %v7512_v31  ;;  %v709_v41 = vsel %vm7224_vm10, %v7514_v56, %v7513_v13  ;;  %v7520_v8 = vld [vmem:[#allocation61_spill] sm:$0xff]  ;;  %v668_v18 = vsel %vm7224_vm10, %v7521_v12, %v7522_v36 }
 0xdf7   :  { %v630_v20 = vadd.f32 %v619_v55, %v585_v47  ;;  %v676_v17 = vadd.f32 %v665_v22, %v631_v5  ;;  %v495_v55 = vadd.f32 %v484_v29, %v450_v42  ;;  %v496_v35 = vadd.f32 %v7507_v62, %v451_v48  ;;  %v5173_v43 = vpop.permute.xlu1 %1671  ;;  %v7523_v62 = vld [vmem:[#allocation63_spill] sm:$0xff] }
 0xdf8   :  { %v576_v47 = vsel %vm7224_vm10, %v4329_v3, %v7511_v14  ;;  %v538_v19 = vadd.f32 %v527_v37, %v493_v51  ;;  %v539_v46 = vadd.f32 %v528_v59, %v494_v27  ;;  %v7516_v3 = vld [vmem:[#allocation57_spill] sm:$0xff]  ;;  %v623_v22 = vsel %vm7224_vm10, %v7517_v28, %v7519_v4  ;;  %v7524_v37 = vld [vmem:[#allocation24_spill] sm:$0xff] }
 0xdf9   :  { %v675_v26 = vadd.f32 %v664_v50, %v630_v20  ;;  %v7515_v20 = vld [vmem:[#allocation56_spill] sm:$0xff]  ;;  %v540_v49 = vadd.f32 %v529_v21, %v495_v55  ;;  %v541_v54 = vadd.f32 %v7510_v6, %v496_v35  ;;  %v621_v5 = vsel %vm7224_vm10, %v4333_v10, %v7516_v3  ;;  %v7518_v50 = vld [vmem:[#allocation23_spill] sm:$0xff]  ;;  %v7528_v14 = vld [vmem:[#allocation25_spill] sm:$0xff] }
 0xdfa   :  { %v578_v33 = vsel %vm7224_vm10, %v7512_v31, %v7515_v20  ;;  %v622_v2 = vsel %vm7224_vm10, %v7516_v3, %v7517_v28  ;;  %v710_v57 = vsel %vm7224_vm10, %v7513_v13, %v7518_v50  ;;  %v587_v40 = vadd.f32 %v576_v47, %v538_v19  ;;  %v7526_v6 = vld [vmem:[#allocation68_spill] sm:$0xff]  ;;  %v7527_v21 = vld [vmem:[#allocation67_spill] sm:$0xff]  ;;  %v7529_v47 = vld [vmem:[#allocation69_spill] sm:$0xff] }
 0xdfb   :  { %v588_v7 = vadd.f32 %v577_v61, %v539_v46  ;;  %v589_v45 = vadd.f32 %v578_v33, %v540_v49  ;;  %v590_v60 = vadd.f32 %v7515_v20, %v541_v54  ;;  %v666_v10 = vsel %vm7224_vm10, %v7503_v63, %v7520_v8  ;;  %v5208_v63 = vpop.permute.xlu1 %1675  ;;  %v7530_v61 = vld [vmem:[#allocation26_spill] sm:$0xff]  ;;  %v7531_v19 = vld [vmem:[#allocation72_spill] sm:$0xff]  ;;  %v7533_v33 = vld [vmem:[#allocation73_spill] sm:$0xff] }
 0xdfc   :  { %v667_v0 = vsel %vm7224_vm10, %v7520_v8, %v7521_v12  ;;  %v632_v23 = vadd.f32 %v621_v5, %v587_v40  ;;  %v720_v32 = vadd.f32 %v709_v41, %v675_v26  ;;  %v711_v29 = vsel %vm7224_vm10, %v7518_v50, %v7523_v62  ;;  %v7525_v26 = vld [vmem:[#allocation66_spill] sm:$0xff]  ;;  %v7534_v28 = vld [vmem:[#allocation27_spill] sm:$0xff] }
 0xdfd   :  { %v633_v24 = vadd.f32 %v622_v2, %v588_v7  ;;  %v634_v30 = vadd.f32 %v623_v22, %v589_v45  ;;  %v635_v58 = vadd.f32 %v7519_v4, %v590_v60  ;;  %v721_v42 = vadd.f32 %v710_v57, %v676_v17  ;;  %v7532_v20 = vld [vmem:[#allocation74_spill] sm:$0xff]  ;;  %v7535_v50 = vld [vmem:[#allocation75_spill] sm:$0xff]  ;;  %v7536_v22 = vld [vmem:[#allocation28_spill] sm:$0xff] }
 0xdfe   :  { %v677_v48 = vadd.f32 %v666_v10, %v632_v23  ;;  %v712_v52 = vsel %vm7224_vm10, %v7523_v62, %v7524_v37  ;;  %v713_v27 = vsel %vm7224_vm10, %v7524_v37, %v7525_v26  ;;  %v758_v55 = vsel %vm7223_vm11, %v7527_v21, %v7526_v6  ;;  %v7537_v12 = vld [vmem:[#allocation78_spill] sm:$0xff]  ;;  %v7546_v21 = vld [vmem:[#allocation31_spill] sm:$0xff] }
 0xdff   :  { %v678_v11 = vadd.f32 %v667_v0, %v633_v24  ;;  %v679_v59 = vadd.f32 %v668_v18, %v634_v30  ;;  %v680_v51 = vadd.f32 %v7522_v36, %v635_v58  ;;  %v759_v17 = vsel %vm7223_vm11, %v7526_v6, %v7528_v14  ;;  %v5236_v54 = vpop.permute.xlu1 %1711  ;;  %v7538_v36 = vld [vmem:[#allocation80_spill] sm:$0xff]  ;;  %v7539_v18 = vld [vmem:[#allocation79_spill] sm:$0xff]  ;;  %v7540_v30 = vld [vmem:[#allocation29_spill] sm:$0xff] }
 0xe00   :  { %v722_v35 = vadd.f32 %v711_v29, %v677_v48  ;;  %v760_v31 = vsel %vm7223_vm11, %v7528_v14, %v7529_v47  ;;  %v761_v13 = vsel %vm7223_vm11, %v7529_v47, %v7530_v61  ;;  %v762_v46 = vsel %vm7223_vm11, %v7530_v61, %v7531_v19  ;;  %v7547_v47 = vld [vmem:[#allocation87_spill] sm:$0xff] }
 0xe01   :  { %v723_v56 = vadd.f32 %v712_v52, %v678_v11  ;;  %v725_v41 = vadd.f32 %v7525_v26, %v680_v51  ;;  %v803_v49 = vsel %vm7223_vm11, %v7533_v33, %v7532_v20  ;;  %v724_v3 = vadd.f32 %v713_v27, %v679_v59  ;;  %v7542_v11 = vld [vmem:[#allocation30_spill] sm:$0xff]  ;;  %v7543_v59 = vld [vmem:[#allocation84_spill] sm:$0xff]  ;;  %v7545_v27 = vld [vmem:[#allocation85_spill] sm:$0xff] }
 0xe02   :  { %v769_v5 = vadd.f32 %v758_v55, %v720_v32  ;;  %v804_v2 = vsel %vm7223_vm11, %v7532_v20, %v7534_v28  ;;  %v805_v57 = vsel %vm7223_vm11, %v7534_v28, %v7535_v50  ;;  %v770_v40 = vadd.f32 %v759_v17, %v721_v42  ;;  %v7541_v42 = vld [vmem:[#allocation81_spill] sm:$0xff]  ;;  %v7544_v26 = vld [vmem:[#allocation86_spill] sm:$0xff]  ;;  %v7550_v28 = vld [vmem:[#allocation92_spill] sm:$0xff] }
 0xe03   :  { %v771_v7 = vadd.f32 %v760_v31, %v722_v35  ;;  %v772_v4 = vadd.f32 %v761_v13, %v723_v56  ;;  %v806_v45 = vsel %vm7223_vm11, %v7535_v50, %v7536_v22  ;;  %v773_v60 = vadd.f32 %v762_v46, %v724_v3  ;;  %v5273_v35 = vpop.permute.xlu1 %1713 }
 0xe04   :  { %v774_v8 = vadd.f32 %v7531_v19, %v725_v41  ;;  %v814_v10 = vadd.f32 %v803_v49, %v769_v5  ;;  %v807_v0 = vsel %vm7223_vm11, %v7536_v22, %v7537_v12  ;;  %v815_v23 = vadd.f32 %v804_v2, %v770_v40  ;;  %v7548_v41 = vld [vmem:[#allocation32_spill] sm:$0xff]  ;;  %v7549_v49 = vld [vmem:[#allocation90_spill] sm:$0xff]  ;;  %v7551_v2 = vld [vmem:[#allocation91_spill] sm:$0xff] }
 0xe05   :  { %v816_v24 = vadd.f32 %v805_v57, %v771_v7  ;;  %v848_v32 = vsel %vm7223_vm11, %v7539_v18, %v7538_v36  ;;  %v849_v58 = vsel %vm7223_vm11, %v7538_v36, %v7540_v30  ;;  %v817_v62 = vadd.f32 %v806_v45, %v772_v4  ;;  %v7552_v57 = vld [vmem:[#allocation33_spill] sm:$0xff]  ;;  %v7558_v18 = vld [vmem:[#allocation35_spill] sm:$0xff] }
 0xe06   :  { %v819_v29 = vadd.f32 %v7537_v12, %v774_v8  ;;  %v850_v48 = vsel %vm7223_vm11, %v7540_v30, %v7541_v42  ;;  %v851_v37 = vsel %vm7223_vm11, %v7541_v42, %v7542_v11  ;;  %v818_v52 = vadd.f32 %v807_v0, %v773_v60  ;;  %v7553_v7 = vld [vmem:[#allocation93_spill] sm:$0xff]  ;;  %v7554_v60 = vld [vmem:[#allocation34_spill] sm:$0xff]  ;;  %v7559_v30 = vld [vmem:[#allocation99_spill] sm:$0xff] }
 0xe07   :  { %v852_v51 = vsel %vm7223_vm11, %v7542_v11, %v7543_v59  ;;  %v893_v6 = vsel %vm7223_vm11, %v7545_v27, %v7544_v26  ;;  %v894_v55 = vsel %vm7223_vm11, %v7544_v26, %v7546_v21  ;;  %v859_v14 = vadd.f32 %v848_v32, %v814_v10  ;;  %v7555_v10 = vld [vmem:[#allocation96_spill] sm:$0xff]  ;;  %v7561_v26 = vld [vmem:[#allocation102_spill] sm:$0xff] }
 0xe08   :  { %v860_v17 = vadd.f32 %v849_v58, %v815_v23  ;;  %v895_v31 = vsel %vm7223_vm11, %v7546_v21, %v7547_v47  ;;  %v861_v61 = vadd.f32 %v850_v48, %v816_v24  ;;  %v862_v13 = vadd.f32 %v851_v37, %v817_v62  ;;  %v7556_v23 = vld [vmem:[#allocation98_spill] sm:$0xff]  ;;  %v7557_v24 = vld [vmem:[#allocation97_spill] sm:$0xff]  ;;  %v5310_v62 = vpop.permute.xlu1 %1717  ;;  %v7560_v11 = vld [vmem:[#allocation36_spill] sm:$0xff] }
 0xe09   :  { %v864_v56 = vadd.f32 %v7543_v59, %v819_v29  ;;  %v896_v19 = vsel %vm7223_vm11, %v7547_v47, %v7548_v41  ;;  %v863_v46 = vadd.f32 %v852_v51, %v818_v52  ;;  %v904_v20 = vadd.f32 %v893_v6, %v859_v14  ;;  %v7562_v14 = vld [vmem:[#allocation104_spill] sm:$0xff] }
 0xe0a   :  { %v905_v33 = vadd.f32 %v894_v55, %v860_v17  ;;  %v897_v3 = vsel %vm7223_vm11, %v7548_v41, %v7549_v49  ;;  %v906_v5 = vadd.f32 %v895_v31, %v861_v61  ;;  %v942_v50 = vsel %vm7222_vm12, %v7551_v2, %v7550_v28  ;;  %v7563_v17 = vld [vmem:[#allocation103_spill] sm:$0xff]  ;;  %v7564_v61 = vld [vmem:[#allocation37_spill] sm:$0xff] }
 0xe0b   :  { %v943_v40 = vsel %vm7222_vm12, %v7550_v28, %v7552_v57  ;;  %v944_v4 = vsel %vm7222_vm12, %v7552_v57, %v7553_v7  ;;  %v907_v22 = vadd.f32 %v896_v19, %v862_v13  ;;  %v909_v45 = vadd.f32 %v7549_v49, %v864_v56  ;;  %v7565_v56 = vld [vmem:[#allocation105_spill] sm:$0xff]  ;;  %v7566_v19 = vld [vmem:[#allocation38_spill] sm:$0xff]  ;;  %v7567_v49 = vld [vmem:[#allocation108_spill] sm:$0xff] }
 0xe0c   :  { %v945_v8 = vsel %vm7222_vm12, %v7553_v7, %v7554_v60  ;;  %v946_v12 = vsel %vm7222_vm12, %v7554_v60, %v7555_v10  ;;  %v908_v0 = vadd.f32 %v897_v3, %v863_v46  ;;  %v987_v36 = vsel %vm7222_vm12, %v7557_v24, %v7556_v23  ;;  %v7569_v28 = vld [vmem:[#allocation109_spill] sm:$0xff]  ;;  %v7570_v57 = vld [vmem:[#allocation42_spill] sm:$0xff]  ;;  %v7571_v7 = vld [vmem:[#allocation111_spill] sm:$0xff] }
 0xe0d   :  { %v988_v32 = vsel %vm7222_vm12, %v7556_v23, %v7558_v18  ;;  %v989_v58 = vsel %vm7222_vm12, %v7558_v18, %v7559_v30  ;;  %v953_v29 = vadd.f32 %v942_v50, %v904_v20  ;;  %v954_v42 = vadd.f32 %v943_v40, %v905_v33 }
 0xe0e   :  { %v955_v48 = vadd.f32 %v944_v4, %v906_v5  ;;  %v990_v37 = vsel %vm7222_vm12, %v7559_v30, %v7560_v11  ;;  %v956_v52 = vadd.f32 %v945_v8, %v907_v22  ;;  %v957_v59 = vadd.f32 %v946_v12, %v908_v0  ;;  %v7568_v5 = vld [vmem:[#allocation110_spill] sm:$0xff]  ;;  %v5344_v22 = vpop.permute.xlu1 %1721 }
 0xe0f   :  { %v958_v51 = vadd.f32 %v7555_v10, %v909_v45  ;;  %v991_v27 = vsel %vm7222_vm12, %v7560_v11, %v7561_v26  ;;  %v998_v6 = vadd.f32 %v987_v36, %v953_v29  ;;  %v999_v21 = vadd.f32 %v988_v32, %v954_v42  ;;  %v7572_v10 = vld [vmem:[#allocation43_spill] sm:$0xff]  ;;  %v7573_v36 = vld [vmem:[#allocation114_spill] sm:$0xff] }
 0xe10   :  { %v1000_v55 = vadd.f32 %v989_v58, %v955_v48  ;;  %v1032_v47 = vsel %vm7222_vm12, %v7563_v17, %v7562_v14  ;;  %v1001_v31 = vadd.f32 %v990_v37, %v956_v52  ;;  %v1033_v13 = vsel %vm7222_vm12, %v7562_v14, %v7564_v61  ;;  %v7574_v58 = vld [vmem:[#allocation116_spill] sm:$0xff]  ;;  %v7575_v29 = vld [vmem:[#allocation115_spill] sm:$0xff]  ;;  %v7576_v48 = vld [vmem:[#allocation46_spill] sm:$0xff] }
 0xe11   :  { %v1034_v41 = vsel %vm7222_vm12, %v7564_v61, %v7565_v56  ;;  %v1035_v46 = vsel %vm7222_vm12, %v7565_v56, %v7566_v19  ;;  %v1002_v20 = vadd.f32 %v991_v27, %v957_v59  ;;  %v1003_v33 = vadd.f32 %v7561_v26, %v958_v51  ;;  %v7577_v59 = vld [vmem:[#allocation47_spill] sm:$0xff]  ;;  %v7579_v14 = vld [vmem:[#allocation121_spill] sm:$0xff]  ;;  %v7580_v17 = vld [vmem:[#allocation120_spill] sm:$0xff] }
 0xe12   :  { %v1036_v3 = vsel %vm7222_vm12, %v7566_v19, %v7567_v49  ;;  %v1077_v2 = vsel %vm7222_vm12, %v7569_v28, %v7568_v5  ;;  %v1043_v50 = vadd.f32 %v1032_v47, %v998_v6  ;;  %v1078_v40 = vsel %vm7222_vm12, %v7568_v5, %v7570_v57  ;;  %v7578_v26 = vld [vmem:[#allocation119_spill] sm:$0xff]  ;;  %v5368_v6 = vpop.permute.xlu1 %1756  ;;  %v7583_v19 = vld [vmem:[#allocation53_spill] sm:$0xff] }
 0xe13   :  { %v1079_v4 = vsel %vm7222_vm12, %v7570_v57, %v7571_v7  ;;  %v1044_v45 = vadd.f32 %v1033_v13, %v999_v21  ;;  %v1045_v60 = vadd.f32 %v1034_v41, %v1000_v55  ;;  %v1046_v8 = vadd.f32 %v1035_v46, %v1001_v31  ;;  %v7581_v31 = vld [vmem:[#allocation52_spill] sm:$0xff] }
 0xe14   :  { %v1080_v12 = vsel %vm7222_vm12, %v7571_v7, %v7572_v10  ;;  %v1047_v0 = vadd.f32 %v1036_v3, %v1002_v20  ;;  %v1048_v23 = vadd.f32 %v7567_v49, %v1003_v33  ;;  %v1088_v24 = vadd.f32 %v1077_v2, %v1043_v50  ;;  %v7584_v2 = vld [vmem:[#allocation123_spill] sm:$0xff]  ;;  %v7585_v57 = vld [vmem:[#allocation124_spill] sm:$0xff] }
 0xe15   :  { %v1081_v18 = vsel %vm7222_vm12, %v7572_v10, %v7573_v36  ;;  %v1089_v32 = vadd.f32 %v1078_v40, %v1044_v45  ;;  %v1090_v30 = vadd.f32 %v1079_v4, %v1045_v60  ;;  %v1126_v42 = vsel %vm7221_vm13, %v7575_v29, %v7574_v58  ;;  %v7586_v45 = vld [vmem:[#allocation58_spill] sm:$0xff]  ;;  %v7591_v29 = vld [vmem:[#allocation64_spill] sm:$0xff] }
 0xe16   :  { %v1127_v11 = vsel %vm7221_vm13, %v7574_v58, %v7576_v48  ;;  %v1091_v37 = vadd.f32 %v1080_v12, %v1046_v8  ;;  %v1128_v52 = vsel %vm7221_vm13, %v7576_v48, %v4880_v44  ;;  %v1129_v51 = vsel %vm7221_vm13, %v4880_v44, %v7577_v59  ;;  %v7582_v44 = vld [vmem:[#allocation122_spill] sm:$0xff]  ;;  %v7587_v12 = vld [vmem:[#allocation59_spill] sm:$0xff] }
 0xe17   :  { %v1130_v27 = vsel %vm7221_vm13, %v7577_v59, %v7578_v26  ;;  %v1092_v21 = vadd.f32 %v1081_v18, %v1047_v0  ;;  %v1093_v55 = vadd.f32 %v7573_v36, %v1048_v23  ;;  %v1171_v47 = vsel %vm7221_vm13, %v7580_v17, %v7579_v14  ;;  %v7588_v23 = vld [vmem:[#allocation125_spill] sm:$0xff]  ;;  %v7590_v18 = vld [vmem:[#allocation127_spill] sm:$0xff] }
 0xe18   :  { %v1172_v61 = vsel %vm7221_vm13, %v7579_v14, %v7581_v31  ;;  %v1137_v13 = vadd.f32 %v1126_v42, %v1088_v24  ;;  %v1138_v56 = vadd.f32 %v1127_v11, %v1089_v32  ;;  %v1173_v41 = vsel %vm7221_vm13, %v7581_v31, %v7582_v44  ;;  %v7589_v36 = vld [vmem:[#allocation129_spill] sm:$0xff]  ;;  %v7594_v14 = vld [vmem:[#allocation131_spill] sm:$0xff]  ;;  %v7596_v31 = vld [vmem:[#allocation132_spill] sm:$0xff] }
 0xe19   :  { %v1174_v46 = vsel %vm7221_vm13, %v7582_v44, %v7583_v19  ;;  %v1139_v20 = vadd.f32 %v1128_v52, %v1090_v30  ;;  %v1140_v33 = vadd.f32 %v1129_v51, %v1091_v37  ;;  %v1141_v49 = vadd.f32 %v1130_v27, %v1092_v21  ;;  %v5406_v30 = vpop.permute.xlu1 %1758  ;;  %v7593_v52 = vld [vmem:[#allocation65_spill] sm:$0xff] }
 0xe1a   :  { %v1142_v3 = vadd.f32 %v7578_v26, %v1093_v55  ;;  %v1182_v5 = vadd.f32 %v1171_v47, %v1137_v13  ;;  %v1183_v28 = vadd.f32 %v1172_v61, %v1138_v56  ;;  %v1175_v50 = vsel %vm7221_vm13, %v7583_v19, %v7584_v2  ;;  %v7595_v47 = vld [vmem:[#allocation133_spill] sm:$0xff]  ;;  %v7597_v13 = vld [vmem:[#allocation70_spill] sm:$0xff] }
 0xe1b   :  { %v1216_v40 = vsel %vm7221_vm13, %v7585_v57, %v4914_v16  ;;  %v1184_v7 = vadd.f32 %v1173_v41, %v1139_v20  ;;  %v1185_v4 = vadd.f32 %v1174_v46, %v1140_v33  ;;  %v1217_v60 = vsel %vm7221_vm13, %v4914_v16, %v7586_v45  ;;  %v7598_v19 = vld [vmem:[#allocation134_spill] sm:$0xff]  ;;  %v7599_v20 = vld [vmem:[#allocation71_spill] sm:$0xff]  ;;  %v7603_v57 = vld [vmem:[#allocation76_spill] sm:$0xff] }
 0xe1c   :  { %v1218_v8 = vsel %vm7221_vm13, %v7586_v45, %v4916_v9  ;;  %v1187_v10 = vadd.f32 %v7584_v2, %v1142_v3  ;;  %v1219_v0 = vsel %vm7221_vm13, %v4916_v9, %v7587_v12  ;;  %v1220_v24 = vsel %vm7221_vm13, %v7587_v12, %v7588_v23  ;;  %v7592_v9 = vld [vmem:[#allocation130_spill] sm:$0xff]  ;;  %v7600_v3 = vld [vmem:[#allocation135_spill] sm:$0xff]  ;;  %v7602_v2 = vld [vmem:[#allocation136_spill] sm:$0xff] }
 0xe1d   :  { %v1261_v32 = vsel %vm7221_vm13, %v7590_v18, %v7589_v36  ;;  %v1186_v16 = vadd.f32 %v1175_v50, %v1141_v49  ;;  %v1227_v58 = vadd.f32 %v1216_v40, %v1182_v5  ;;  %v1262_v42 = vsel %vm7221_vm13, %v7589_v36, %v7591_v29 }
 0xe1e   :  { %v1228_v48 = vadd.f32 %v1217_v60, %v1183_v28  ;;  %v1229_v11 = vadd.f32 %v1218_v8, %v1184_v7  ;;  %v1263_v37 = vsel %vm7221_vm13, %v7591_v29, %v7592_v9  ;;  %v1264_v59 = vsel %vm7221_vm13, %v7592_v9, %v7593_v52  ;;  %v7601_v28 = vld [vmem:[#allocation137_spill] sm:$0xff]  ;;  %v5443_v7 = vpop.permute.xlu1 %1762  ;;  %v7604_v8 = vld [vmem:[#allocation138_spill] sm:$0xff] }
 0xe1f   :  { %v1230_v51 = vadd.f32 %v1219_v0, %v1185_v4  ;;  %v1231_v26 = vadd.f32 %v1220_v24, %v1186_v16  ;;  %v1232_v27 = vadd.f32 %v7588_v23, %v1187_v10  ;;  %v1272_v21 = vadd.f32 %v1261_v32, %v1227_v58  ;;  %v7605_v24 = vld [vmem:[#allocation77_spill] sm:$0xff]  ;;  %v7606_v58 = vld [vmem:[#allocation139_spill] sm:$0xff] }
 0xe20   :  { %v1273_v55 = vadd.f32 %v1262_v42, %v1228_v48  ;;  %v1265_v17 = vsel %vm7221_vm13, %v7593_v52, %v7594_v14  ;;  %v1310_v61 = vsel %vm7220_vm14, %v7596_v31, %v7595_v47  ;;  %v1311_v56 = vsel %vm7220_vm14, %v7595_v47, %v7597_v13  ;;  %v7607_v48 = vld [vmem:[#allocation141_spill] sm:$0xff] }
 0xe21   :  { %v1274_v44 = vadd.f32 %v1263_v37, %v1229_v11  ;;  %v1275_v41 = vadd.f32 %v1264_v59, %v1230_v51  ;;  %v1312_v46 = vsel %vm7220_vm14, %v7597_v13, %v7598_v19  ;;  %v1313_v33 = vsel %vm7220_vm14, %v7598_v19, %v7599_v20  ;;  %v7608_v11 = vld [vmem:[#allocation140_spill] sm:$0xff]  ;;  %v7609_v37 = vld [vmem:[#allocation82_spill] sm:$0xff]  ;;  %v7613_v31 = vld [vmem:[#allocation145_spill] sm:$0xff] }
 0xe22   :  { %v1277_v49 = vadd.f32 %v7594_v14, %v1232_v27  ;;  %v1314_v5 = vsel %vm7220_vm14, %v7599_v20, %v7600_v3  ;;  %v1355_v50 = vsel %vm7220_vm14, %v7602_v2, %v7601_v28  ;;  %v1356_v40 = vsel %vm7220_vm14, %v7601_v28, %v7603_v57  ;;  %v7610_v59 = vld [vmem:[#allocation142_spill] sm:$0xff]  ;;  %v7618_v2 = vld [vmem:[#allocation147_spill] sm:$0xff] }
 0xe23   :  { %v1276_v4 = vadd.f32 %v1265_v17, %v1231_v26  ;;  %v1321_v45 = vadd.f32 %v1310_v61, %v1272_v21  ;;  %v1322_v60 = vadd.f32 %v1311_v56, %v1273_v55  ;;  %v1357_v10 = vsel %vm7220_vm14, %v7603_v57, %v7604_v8  ;;  %v7611_v21 = vld [vmem:[#allocation83_spill] sm:$0xff]  ;;  %v7614_v61 = vld [vmem:[#allocation144_spill] sm:$0xff]  ;;  %v7619_v57 = vld [vmem:[#allocation149_spill] sm:$0xff] }
 0xe24   :  { %v1323_v12 = vadd.f32 %v1312_v46, %v1274_v44  ;;  %v1324_v0 = vadd.f32 %v1313_v33, %v1275_v41  ;;  %v1326_v23 = vadd.f32 %v7600_v3, %v1277_v49  ;;  %v1358_v36 = vsel %vm7220_vm14, %v7604_v8, %v7605_v24  ;;  %v7612_v17 = vld [vmem:[#allocation143_spill] sm:$0xff]  ;;  %v7615_v56 = vld [vmem:[#allocation88_spill] sm:$0xff]  ;;  %v5477_v41 = vpop.permute.xlu1 %1766  ;;  %v7616_v33 = vld [vmem:[#allocation146_spill] sm:$0xff] }
 0xe25   :  { %v1325_v18 = vadd.f32 %v1314_v5, %v1276_v4  ;;  %v1366_v32 = vadd.f32 %v1355_v50, %v1321_v45  ;;  %v1367_v16 = vadd.f32 %v1356_v40, %v1322_v60  ;;  %v1359_v29 = vsel %vm7220_vm14, %v7605_v24, %v7606_v58  ;;  %v7617_v5 = vld [vmem:[#allocation89_spill] sm:$0xff]  ;;  %v7620_v40 = vld [vmem:[#allocation148_spill] sm:$0xff] }
 0xe26   :  { %v1368_v42 = vadd.f32 %v1357_v10, %v1323_v12  ;;  %v1400_v9 = vsel %vm7220_vm14, %v7608_v11, %v7607_v48  ;;  %v1401_v52 = vsel %vm7220_vm14, %v7607_v48, %v7609_v37  ;;  %v1402_v51 = vsel %vm7220_vm14, %v7609_v37, %v7610_v59  ;;  %v7623_v11 = vld [vmem:[#allocation152_spill] sm:$0xff] }
 0xe27   :  { %v1369_v26 = vadd.f32 %v1358_v36, %v1324_v0  ;;  %v1371_v27 = vadd.f32 %v7606_v58, %v1326_v23  ;;  %v1403_v55 = vsel %vm7220_vm14, %v7610_v59, %v7611_v21  ;;  %v1370_v14 = vadd.f32 %v1359_v29, %v1325_v18  ;;  %v7621_v0 = vld [vmem:[#allocation94_spill] sm:$0xff]  ;;  %v7622_v36 = vld [vmem:[#allocation95_spill] sm:$0xff] }
 0xe28   :  { %v1404_v47 = vsel %vm7220_vm14, %v7611_v21, %v7612_v17  ;;  %v1445_v13 = vsel %vm7220_vm14, %v7614_v61, %v7613_v31  ;;  %v1446_v44 = vsel %vm7220_vm14, %v7613_v31, %v7615_v56  ;;  %v1411_v19 = vadd.f32 %v1400_v9, %v1366_v32  ;;  %v7624_v9 = vld [vmem:[#allocation150_spill] sm:$0xff]  ;;  %v7626_v21 = vld [vmem:[#allocation101_spill] sm:$0xff]  ;;  %v7628_v31 = vld [vmem:[#allocation156_spill] sm:$0xff] }
 0xe29   :  { %v1412_v46 = vadd.f32 %v1401_v52, %v1367_v16  ;;  %v1413_v20 = vadd.f32 %v1402_v51, %v1368_v42  ;;  %v1447_v49 = vsel %vm7220_vm14, %v7615_v56, %v7616_v33  ;;  %v1414_v3 = vadd.f32 %v1403_v55, %v1369_v26  ;;  %v7625_v52 = vld [vmem:[#allocation100_spill] sm:$0xff]  ;;  %v7629_v61 = vld [vmem:[#allocation155_spill] sm:$0xff]  ;;  %v7630_v56 = vld [vmem:[#allocation106_spill] sm:$0xff] }
 0xe2a   :  { %v1448_v28 = vsel %vm7220_vm14, %v7616_v33, %v7617_v5  ;;  %v1449_v50 = vsel %vm7220_vm14, %v7617_v5, %v7618_v2  ;;  %v1494_v4 = vsel %vm7219_vm15, %v7620_v40, %v7619_v57  ;;  %v1415_v45 = vadd.f32 %v1404_v47, %v1370_v14  ;;  %v7632_v5 = vld [vmem:[#allocation107_spill] sm:$0xff] }
 0xe2b   :  { %v1416_v60 = vadd.f32 %v7612_v17, %v1371_v27  ;;  %v1456_v8 = vadd.f32 %v1445_v13, %v1411_v19  ;;  %v1457_v10 = vadd.f32 %v1446_v44, %v1412_v46  ;;  %v1458_v12 = vadd.f32 %v1447_v49, %v1413_v20  ;;  %v7627_v17 = vld [vmem:[#allocation154_spill] sm:$0xff] }
 0xe2c   :  { %v1495_v23 = vsel %vm7219_vm15, %v7619_v57, %v7621_v0  ;;  %v1496_v24 = vsel %vm7219_vm15, %v7621_v0, %v4982_v15  ;;  %v1497_v18 = vsel %vm7219_vm15, %v4982_v15, %v7622_v36  ;;  %v1459_v16 = vadd.f32 %v1448_v28, %v1414_v3 }
 0xe2d   :  { %v1460_v58 = vadd.f32 %v1449_v50, %v1415_v45  ;;  %v1461_v29 = vadd.f32 %v7618_v2, %v1416_v60  ;;  %v1505_v42 = vadd.f32 %v1494_v4, %v1456_v8  ;;  %v1498_v48 = vsel %vm7219_vm15, %v7622_v36, %v4984_v1  ;;  %v7633_v4 = vld [vmem:[#allocation158_spill] sm:$0xff]  ;;  %v7634_v60 = vld [vmem:[#allocation160_spill] sm:$0xff]  ;;  %v7635_v8 = vld [vmem:[#allocation159_spill] sm:$0xff] }
 0xe2e   :  { %v1539_v37 = vsel %vm7219_vm15, %v7624_v9, %v7623_v11  ;;  %v1540_v59 = vsel %vm7219_vm15, %v7623_v11, %v7625_v52  ;;  %v1541_v15 = vsel %vm7219_vm15, %v7625_v52, %v4994_v38  ;;  %v1506_v51 = vadd.f32 %v1495_v23, %v1457_v10 }
 0xe2f   :  { %v1507_v26 = vadd.f32 %v1496_v24, %v1458_v12  ;;  %v1508_v27 = vadd.f32 %v1497_v18, %v1459_v16  ;;  %v1542_v55 = vsel %vm7219_vm15, %v4994_v38, %v7626_v21  ;;  %v1510_v14 = vadd.f32 %v4984_v1, %v1461_v29  ;;  %v7631_v1 = vld [vmem:[#allocation157_spill] sm:$0xff]  ;;  %v7636_v12 = vld [vmem:[#allocation112_spill] sm:$0xff] }
 0xe30   :  { %v1543_v47 = vsel %vm7219_vm15, %v7626_v21, %v7627_v17  ;;  %v1584_v13 = vsel %vm7219_vm15, %v7629_v61, %v7628_v31  ;;  %v1585_v44 = vsel %vm7219_vm15, %v7628_v31, %v7630_v56  ;;  %v1509_v19 = vadd.f32 %v1498_v48, %v1460_v58  ;;  %v7637_v16 = vld [vmem:[#allocation113_spill] sm:$0xff]  ;;  %v30_v31 = vld [vmem:[%s7057_s1] sm:$0x3f]  ;;  %v7640_v61 = vld [vmem:[#allocation126_spill] sm:$0xff] }
 0xe31   :  { %v1550_v46 = vadd.f32 %v1539_v37, %v1505_v42  ;;  %v1551_v20 = vadd.f32 %v1540_v59, %v1506_v51  ;;  %v1552_v33 = vadd.f32 %v1541_v15, %v1507_v26  ;;  %v1553_v49 = vadd.f32 %v1542_v55, %v1508_v27  ;;  %v7638_v48 = vld [vmem:[#allocation117_spill] sm:$0xff]  ;;  %v7639_v26 = vld [vmem:[#allocation118_spill] sm:$0xff] }
 0xe32   :  { %v1555_v38 = vadd.f32 %v7627_v17, %v1510_v14  ;;  %v1586_v3 = vsel %vm7219_vm15, %v7630_v56, %v7631_v1  ;;  %v1587_v28 = vsel %vm7219_vm15, %v7631_v1, %v7632_v5  ;;  %v1554_v50 = vadd.f32 %v1543_v47, %v1509_v19  ;;  %v7641_v56 = vld [vmem:[#allocation128_spill] sm:$0xff] }
 0xe33   :  { %v1595_v57 = vadd.f32 %v1584_v13, %v1550_v46  ;;  %v1596_v40 = vadd.f32 %v1585_v44, %v1551_v20  ;;  %v1588_v45 = vsel %vm7219_vm15, %v7632_v5, %v7633_v4  ;;  %v1629_v10 = vsel %vm7219_vm15, %v7635_v8, %v7634_v60 }
 0xe34   :  { %v1630_v0 = vsel %vm7219_vm15, %v7634_v60, %v7636_v12  ;;  %v1631_v23 = vsel %vm7219_vm15, %v7636_v12, %v5046_v53  ;;  %v1597_v24 = vadd.f32 %v1586_v3, %v1552_v33  ;;  %v1598_v36 = vadd.f32 %v1587_v28, %v1553_v49  ;;  %v7642_v33 = vld [vmem:[#allocation151_spill] sm:$0xff] }
 0xe35   :  { %v1600_v18 = vadd.f32 %v7633_v4, %v1555_v38  ;;  %v1632_v58 = vsel %vm7219_vm15, %v5046_v53, %v7637_v16  ;;  %v1633_v29 = vsel %vm7219_vm15, %v7637_v16, %v5085_v25  ;;  %v1678_v42 = vsel %vm7218_vm1, %v5105_v34, %v5138_v39 }
 0xe36   :  { %v1679_v11 = vsel %vm7218_vm1, %v5138_v39, %v7638_v48  ;;  %v1680_v9 = vsel %vm7218_vm1, %v7638_v48, %v5173_v43  ;;  %v1599_v37 = vadd.f32 %v1588_v45, %v1554_v50  ;;  %v1640_v52 = vadd.f32 %v1629_v10, %v1595_v57  ;;  %v7643_v50 = vld [vmem:[#allocation153_spill] sm:$0xff] }
 0xe37   :  { %v1641_v59 = vadd.f32 %v1630_v0, %v1596_v40  ;;  %v1642_v53 = vadd.f32 %v1631_v23, %v1597_v24  ;;  %v1643_v15 = vadd.f32 %v1632_v58, %v1598_v36  ;;  %v1645_v51 = vadd.f32 %v5085_v25, %v1600_v18  ;;  %v7645_v58 = vld [vmem:[#allocation12_spill] sm:$0xff] }
 0xe38   :  { %v1681_v27 = vsel %vm7218_vm1, %v5173_v43, %v7639_v26  ;;  %v1682_v34 = vsel %vm7218_vm1, %v7639_v26, %v5208_v63  ;;  %v1644_v55 = vadd.f32 %v1633_v29, %v1599_v37  ;;  %v1689_v14 = vadd.f32 %v1678_v42, %v1640_v52  ;;  %v7646_v42 = vld [vmem:[#allocation14_spill] sm:$0xff]  ;;  %v7649_v26 = vld [vmem:[#allocation9_spill] sm:$0xff] }
 0xe39   :  { %v1690_v17 = vadd.f32 %v1679_v11, %v1641_v59  ;;  %v1691_v47 = vadd.f32 %v1680_v9, %v1642_v53  ;;  %v1723_v25 = vsel %vm7218_vm1, %v5236_v54, %v5273_v35  ;;  %v1724_v43 = vsel %vm7218_vm1, %v5273_v35, %v7640_v61  ;;  %v7647_v11 = vld [vmem:[#allocation8_spill] sm:$0xff] }
 0xe3a   :  { %v1725_v13 = vsel %vm7218_vm1, %v7640_v61, %v5310_v62  ;;  %v1726_v44 = vsel %vm7218_vm1, %v5310_v62, %v7641_v56  ;;  %v1692_v19 = vadd.f32 %v1681_v27, %v1643_v15  ;;  %v1693_v46 = vadd.f32 %v1682_v34, %v1644_v55 }
 0xe3b   :  { %v1694_v20 = vadd.f32 %v5208_v63, %v1645_v51  ;;  %v1727_v54 = vsel %vm7218_vm1, %v7641_v56, %v5344_v22  ;;  %v1768_v35 = vsel %vm7218_vm1, %v5368_v6, %v5406_v30  ;;  %v1769_v49 = vsel %vm7218_vm1, %v5406_v30, %v7642_v33 }
 0xe3c   :  { %v1770_v62 = vsel %vm7218_vm1, %v7642_v33, %v5443_v7  ;;  %vm31_vm2 = vcmp.gt.f32.partialorder %v30_v31, 0.5  ;;  %v1734_v38 = vadd.f32 %v1723_v25, %v1689_v14  ;;  %v1735_v1 = vadd.f32 %v1724_v43, %v1690_v17 }
 0xe3d   :  { %v1736_v63 = vadd.f32 %v1725_v13, %v1691_v47  ;;  %v1737_v3 = vadd.f32 %v1726_v44, %v1692_v19  ;;  %v1738_v5 = vadd.f32 %v1727_v54, %v1693_v46  ;;  %v1739_v28 = vadd.f32 %v5344_v22, %v1694_v20 }
 0xe3e   :  { %v1771_v6 = vsel %vm7218_vm1, %v5443_v7, %v7643_v50  ;;  %v1772_v30 = vsel %vm7218_vm1, %v7643_v50, %v5477_v41  ;;  %v1779_v4 = vadd.f32 %v1768_v35, %v1734_v38  ;;  %v1780_v45 = vadd.f32 %v1769_v49, %v1735_v1 }
 0xe3f   :  { %v1781_v60 = vadd.f32 %v1770_v62, %v1736_v63  ;;  %v7644_v8 = vmov 0   ;;  %v1782_v23 = vadd.f32 %v1771_v6, %v1737_v3  ;;  %v1783_v24 = vadd.f32 %v1772_v30, %v1738_v5 }
 0xe40   :  { %v1866_v10 = vsel %vm31_vm2, 1, %v7644_v8  ;;  %v1784_v36 = vadd.f32 %v5477_v41, %v1739_v28  ;;  %v7650_v41 = vld [vmem:[#allocation11_spill] sm:$0xff]  ;;  %v7651_v17 = vmov 0  ;;  %v7654_v47 = vmov 0 }
 0xe41   :  { %v1878_v29 = vrot.slane %v1866_v10, %v7645_v58  ;;  %v1882_v48 = vrot.slane %v1866_v10, %v7646_v42  ;;  %v1870_v9 = vrot.slane %v1866_v10, %v7647_v11  ;;  %v1886_v27 = vrot.slane %v1866_v10, %v7649_v26 }
 0xe42   :  { %v1890_v34 = vrot.slane %v1866_v10, %v7650_v41  ;;  %v7657_v61 = vmov 0  ;;  %v7660_v43 = vmov 0  ;;  %v7663_v13 = vmov 0 }
 0xe43   :  { %vm5620_vm3 = vcmp.eq.s32.totalorder %v1878_v29, 1  ;;  %vm5624_vm4 = vcmp.eq.s32.totalorder %v1882_v48, 1  ;;  %vm5628_vm7 = vcmp.eq.s32.totalorder %v1870_v9, 1  ;;  %v7666_v56 = vmov 0 }
 0xe44   :  { %v7652_v17 = vsel %vm5620_vm3, 4294967295, %v7651_v17  ;;  %v7655_v47 = vsel %vm5624_vm4, 4294967295, %v7654_v47  ;;  %v7658_v61 = vsel %vm5628_vm7, 4294967295, %v7657_v61  ;;  %vm5640_vm15 = vcmp.eq.s32.totalorder %v1890_v34, 1 }
 0xe45   :  { %v5501_v32 = vpop.permute.xlu1 %1801  ;;  %v1806_v39 = vpop.permute.xlu0 %1805  ;;  %7653 = vst [vmem:[#allocation40_spill] sm:$0xff] %v7652_v17  ;;  %7656 = vst [vmem:[#allocation39_spill] sm:$0xff] %v7655_v47  ;;  %v7667_v56 = vsel %vm5640_vm15, 4294967295, %v7666_v56 }
 0xe46   :  { %7659 = vst [vmem:[#allocation45_spill] sm:$0xff] %v7658_v61  ;;  %7668 = vst [vmem:[#allocation48_spill] sm:$0xff] %v7667_v56 }
 0xe49   :  { %v1804_v2 = vpop.permute.xlu1 %1803  ;;  %v1810_v57 = vpop.permute.xlu0 %1809 }
 0xe4a   :  { %v1813_v12 = vsel %vm7218_vm1, %v5501_v32, %v1804_v2  ;;  %v1814_v22 = vsel %vm7218_vm1, %v1804_v2, %v1806_v39  ;;  %v7648_v32 = vld [vmem:[#allocation10_spill] sm:$0xff] }
 0xe4b   :  { %v1874_v37 = vrot.slane %v1866_v10, %v7648_v32  ;;  %v1824_v2 = vadd.f32 %v1813_v12, %v1779_v4  ;;  %v1825_v52 = vadd.f32 %v1814_v22, %v1780_v45  ;;  %v7675_v10 = vmov 3   ;;  %v5688_v12 = vld [vmem:[%s7061_s5 + $0x4] sm:$0xf] }
 0xe4d   :  { %v1808_v21 = vpop.permute.xlu1 %1807  ;;  %vm5632_vm2 = vcmp.eq.s32.totalorder %v1874_v37, 1 }
 0xe4e   :  { %v1815_v0 = vsel %vm7218_vm1, %v1806_v39, %v1808_v21  ;;  %v1816_v7 = vsel %vm7218_vm1, %v1808_v21, %v1810_v57  ;;  %v7661_v43 = vsel %vm5632_vm2, 4294967295, %v7660_v43 }
 0xe4f   :  { %v1826_v59 = vadd.f32 %v1815_v0, %v1781_v60  ;;  %v1827_v53 = vadd.f32 %v1816_v7, %v1782_v23  ;;  %7662 = vst [vmem:[#allocation16_spill] sm:$0xff] %v7661_v43  ;;  %v5680_v60 = vld [vmem:[%s7061_s5] sm:$0xf] }
 0xe51   :  { %v1812_v40 = vpop.permute.xlu1 %1811 }
 0xe52   :  { %v1817_v18 = vsel %vm7218_vm1, %v1810_v57, %v1812_v40  ;;  %v1829_v51 = vadd.f32 %v1812_v40, %v1784_v36  ;;  %vm5636_vm1 = vcmp.eq.s32.totalorder %v1886_v27, 1 }
 0xe53   :  { %v1828_v15 = vadd.f32 %v1817_v18, %v1783_v24  ;;  %v7664_v13 = vsel %vm5636_vm1, 4294967295, %v7663_v13 }
 0xe54   :  { %7665 = vst [vmem:[#allocation21_spill] sm:$0xff] %v7664_v13 }
 0xe5a   :  { %v1834_v16 = vpop.permute.xlu0 %1833 }
 0xe5b   :  { %v1838_v39 = vadd.f32 %v1834_v16, %v1826_v59  ;;  %v1839_v21 = vadd.f32 %v1834_v16, %v1827_v53  ;;  %v1836_v55 = vadd.f32 %v1834_v16, %v1824_v2  ;;  %v1837_v14 = vadd.f32 %v1834_v16, %v1825_v52 }
 0xe5c   :  { %v1840_v31 = vadd.f32 %v1834_v16, %v1828_v15  ;;  %v1841_v25 = vadd.f32 %v1834_v16, %v1829_v51 }
 0xe5d   :  { %vm1844_vm14 = vcmp.ge.f32.partialorder %v1838_v39, 0.0  ;;  %vm1845_vm13 = vcmp.ge.f32.partialorder %v1839_v21, 0.0  ;;  %vm1842_vm12 = vcmp.ge.f32.partialorder %v1836_v55, 0.0  ;;  %vm1843_vm11 = vcmp.ge.f32.partialorder %v1837_v14, 0.0 }
 0xe5e   :  { %vm1846_vm10 = vcmp.ge.f32.partialorder %v1840_v31, 0.0  ;;  %vm1847_vm9 = vcmp.ge.f32.partialorder %v1841_v25, 0.0 }
 0xe62   :  { %v1852_v44 = vpop.permute.xlu1 %1851 }
 0xe63   :  { %v1856_v19 = vmul.f32 %v1852_v44, %v1838_v39  ;;  %v1857_v46 = vmul.f32 %v1852_v44, %v1839_v21  ;;  %v1854_v20 = vmul.f32 %v1852_v44, %v1836_v55  ;;  %v1855_v54 = vmul.f32 %v1852_v44, %v1837_v14 }
 0xe64   :  { %v1858_v35 = vmul.f32 %v1852_v44, %v1840_v31  ;;  %v1859_v33 = vmul.f32 %v1852_v44, %v1841_v25 }
 0xe65   :  { %v1862_v49 = vsel %vm1844_vm14, %v1838_v39, %v1856_v19  ;;  %v1863_v62 = vsel %vm1845_vm13, %v1839_v21, %v1857_v46  ;;  %v1860_v38 = vsel %vm1842_vm12, %v1836_v55, %v1854_v20  ;;  %v1861_v1 = vsel %vm1843_vm11, %v1837_v14, %v1855_v54 }
 0xe66   :  { %v5646_v63 = vsel %vm5620_vm3, %v1862_v49, 0.0  ;;  %v5650_v3 = vsel %vm5624_vm4, %v1863_v62, 0.0  ;;  %v5654_v5 = vsel %vm5628_vm7, %v1860_v38, 0.0  ;;  %v5658_v28 = vsel %vm5632_vm2, %v1861_v1, 0.0 }
 0xe67   :  { %7669 = vst [vmem:[#allocation49_spill] sm:$0xff] %v5646_v63  ;;  %7670 = vst [vmem:[#allocation17_spill] sm:$0xff] %v5650_v3  ;;  %v1910_v50 = vcombine.low %v5646_v63, %v5650_v3  ;;  %v1909_v6 = vcombine.low %v5654_v5, %v5658_v28  ;;  %v1864_v30 = vsel %vm1846_vm10, %v1840_v31, %v1858_v35  ;;  %v7684_v38 = vmov 2  }
 0xe68   :  { %7671 = vst [vmem:[#allocation50_spill] sm:$0xff] %v5654_v5  ;;  %7672 = vst [vmem:[#allocation51_spill] sm:$0xff] %v5658_v28  ;;  %v1865_v57 = vsel %vm1847_vm9, %v1841_v25, %v1859_v33  ;;  %v5666_v40 = vsel %vm5636_vm1, %v1864_v30, 0.0 }
 0xe69   :  { %7673 = vst [vmem:[#allocation18_spill] sm:$0xff] %v5666_v40  ;;  %v5670_v4 = vsel %vm5640_vm15, %v1865_v57, 0.0  ;;  %1914 = vrot.lane.b32.xlu0 %v1910_v50, %s3884_s9  ;;  %1912 = vrot.lane.b32.xlu1 %v1909_v6, %s3884_s9 }
 0xe6a   :  { %7674 = vst [vmem:[#allocation54_spill] sm:$0xff] %v5670_v4  ;;  %v1911_v45 = vcombine.low %v5666_v40, %v5670_v4 }
 0xe6d   :  { %1916 = vrot.lane.b32.xlu1 %v1911_v45, %s3884_s9 }
 0xe71   :  { %2065 = vperm.xlu1 %3826, %v5680_v60  }
 0xe75   :  { %3827 = vset.pattern.permute.xlu1 %v7675_v10 }
 0xe76   :  { %2205 = vperm.xlu1 %3827, %v5680_v60  }
 0xe7a   :  { %3828 = vset.pattern.permute.xlu1 %v7644_v8 }
 0xe7b   :  { %2224 = vperm.xlu1 %3828, %v5688_v12  }
 0xe7f   :  { %3851 = vset.pattern.permute.xlu1 %v7675_v10 }
 0xedb   :  { %v1915_v22 = vpop.permute.xlu0 %1914  ;;  %v1913_v0 = vpop.permute.xlu1 %1912 }
 0xedc   :  { %v1919_v7 = vrot.slane %v1915_v22, 4  ;;  %v1918_v23 = vrot.slane %v1913_v0, 4 }
 0xede   :  { %v1921_v24 = vsel %vm53_vm5, %v1918_v23, %v1913_v0  ;;  %v1922_v36 = vsel %vm34_vm0, %v1918_v23, %v1919_v7 }
 0xedf   :  { %v5696_v18 = vsel %vm53_vm5, %v1922_v36, %v1915_v22  ;;  %1929 = vst.msk [vmem:[#allocation2] sm:$0xff] %vm3974_vm6, %v1921_v24  ;;  %v1917_v29 = vpop.permute.xlu1 %1916 }
 0xee0   :  { %v1920_v48 = vrot.slane %v1917_v29, 4  ;;  %v1954_v27 = vrot.slane %v5696_v18, %v7649_v26  ;;  %v1950_v21 = vrot.slane %v5696_v18, %v7647_v11  ;;  %v2021_v6 = vrot.slane %v5696_v18, %v7648_v32 }
 0xee1   :  { %v2025_v36 = vrot.slane %v5696_v18, %v7650_v41 }
 0xee2   :  { %v1924_v9 = vsel %vm34_vm0, %v1919_v7, %v1920_v48  ;;  %v5729_v44 = vrot.slane %v1954_v27, %v7647_v11  ;;  %v5734_v19 = vrot.slane %v1950_v21, %v7647_v11  ;;  %v5775_v0 = vrot.slane %v2021_v6, %v7648_v32 }
 0xee3   :  { %v1925_v37 = vsel %vm53_vm5, %v1924_v9, %v1917_v29  ;;  %v5794_v2 = vrot.slane %v2025_v36, %v7648_v32  ;;  %vm7772_vm5 = vcmask 1039360  }
 0xee4   :  { %1931 = vst.msk [vmem:[#allocation2 + $0x10] sm:$0xff] %vm3982_vm8, %v1925_v37  ;;  %7681 = vst [vmem:[#allocation41_spill] sm:$0xff] %v5729_v44 }
 0xee5   :  { %7682 = vst [vmem:[#allocation56_spill] sm:$0xff] %v5734_v19  ;;  %7687 = vst [vmem:[#allocation60_spill] sm:$0xff] %v5775_v0 }
 0xee6   :  { %v5706_v59 = vld [vmem:[#allocation2] sm:$0xff]  ;;  %7689 = vst [vmem:[#allocation22_spill] sm:$0xff] %v5794_v2  ;;  %vm7773_vm6 = vmmov %vm7772_vm5 }
 0xee7   :  { %v1946_v15 = vrot.slane %v5706_v59, %v7649_v26  ;;  %v1942_v51 = vrot.slane %v5706_v59, %v7647_v11  ;;  %v2017_v57 = vrot.slane %v5706_v59, %v7650_v41  ;;  %vm7774_vm8 = vmmov %vm7772_vm5 }
 0xee8   :  { %vm7775_vm9 = vmmov %vm7772_vm5 }
 0xee9   :  { %v5717_v34 = vrot.slane %v1946_v15, %v7647_v11  ;;  %v5720_v39 = vrot.slane %v1942_v51, %v7647_v11  ;;  %v5782_v16 = vrot.slane %v2017_v57, %v7648_v32  ;;  %vm7776_vm10 = vmmov %vm7772_vm5 }
 0xeea   :  { %vm7777_vm11 = vmmov %vm7772_vm5 }
 0xeeb   :  { %7679 = vst [vmem:[#allocation19_spill] sm:$0xff] %v5717_v34  ;;  %7680 = vst [vmem:[#allocation44_spill] sm:$0xff] %v5720_v39  ;;  %v5724_v55 = vld [vmem:[#allocation2 + $0x10] sm:$0xff] }
 0xeec   :  { %v1962_v46 = vrot.slane %v5724_v55, %v7649_v26  ;;  %v1958_v20 = vrot.slane %v5724_v55, %v7647_v11  ;;  %v2029_v45 = vrot.slane %v5724_v55, %v7648_v32  ;;  %7688 = vst [vmem:[#allocation61_spill] sm:$0xff] %v5782_v16  ;;  %v2033_v37 = vrot.slane %v5724_v55, %v7650_v41  ;;  %vm7778_vm12 = vmmov %vm7772_vm5 }
 0xeed   :  { %vm7779_vm13 = vmmov %vm7772_vm5 }
 0xeee   :  { %v5745_v33 = vrot.slane %v1962_v46, %v7647_v11  ;;  %v5748_v49 = vrot.slane %v1958_v20, %v7647_v11  ;;  %v2013_v11 = vrot.slane %v5706_v59, %v7648_v32  ;;  %v5785_v29 = vrot.slane %v2029_v45, %v7648_v32  ;;  %vm7780_vm14 = vmmov %vm7772_vm5 }
 0xeef   :  { %v5800_v51 = vrot.slane %v2033_v37, %v7648_v32  ;;  %v2099_v20 = vrot.slane %v5724_v55, %v7645_v58 }
 0xef0   :  { %v5704_v52 = vpop.permute.xlu1 %2065  ;;  %7683 = vst [vmem:[#allocation57_spill] sm:$0xff] %v5745_v33  ;;  %v5772_v22 = vrot.slane %v2013_v11, %v7648_v32  ;;  %v2091_v32 = vrot.slane %v5696_v18, %v7645_v58 }
 0xef1   :  { %7690 = vst [vmem:[#allocation62_spill] sm:$0xff] %v5800_v51  ;;  %v5835_v45 = vrot.slane %v2099_v20, %v7645_v58 }
 0xef2   :  { %7686 = vst [vmem:[#allocation23_spill] sm:$0xff] %v5772_v22 }
 0xef5   :  { %v5708_v53 = vpop.permute.xlu1 %2205 }
 0xef6   :  { %7678 = vst [vmem:[#allocation55_spill] sm:$0xff] %v5708_v53 }
 0xefa   :  { %v2225_v14 = vpop.permute.xlu1 %2224 }
 0xefb   :  { %v2228_v31 = vmul.f32 %v2225_v14, %v5717_v34  ;;  %v2227_v25 = vmul.f32 %v2225_v14, %v5720_v39  ;;  %v2230_v54 = vmul.f32 %v2225_v14, %v5729_v44  ;;  %v2229_v35 = vmul.f32 %v2225_v14, %v5734_v19 }
 0xefc   :  { %v2232_v62 = vmul.f32 %v2225_v14, %v5745_v33  ;;  %v2231_v26 = vmul.f32 %v2225_v14, %v5748_v49  ;;  %v2083_v14 = vrot.slane %v5706_v59, %v7645_v58 }
 0xefd   :  { %2241 = vrot.lane.b32.xlu1 %v2228_v31, %s3890_s17  ;;  %2239 = vrot.lane.b32.xlu0 %v2227_v25, %s3890_s17  ;;  %v7691_v25 = vld [vmem:[#allocation13_spill] sm:$0xff] }
 0xefe   :  { %v2087_v46 = vrot.slane %v5706_v59, %v7691_v25  ;;  %v2095_v6 = vrot.slane %v5696_v18, %v7691_v25  ;;  %v2103_v36 = vrot.slane %v5724_v55, %v7691_v25  ;;  %v2169_v25 = vrot.slane %v5724_v55, %v7646_v42 }
 0xf00   :  { %v5832_v57 = vrot.slane %v2087_v46, %v7645_v58 }
 0xf01   :  { %2245 = vrot.lane.b32.xlu1 %v2230_v54, %s3890_s17  ;;  %2243 = vrot.lane.b32.xlu0 %v2229_v35, %s3890_s17  ;;  %v5822_v54 = vrot.slane %v2083_v14, %v7645_v58  ;;  %v5825_v35 = vrot.slane %v2091_v32, %v7645_v58 }
 0xf02   :  { %7693 = vst [vmem:[#allocation24_spill] sm:$0xff] %v5832_v57 }
 0xf03   :  { %7692 = vst [vmem:[#allocation63_spill] sm:$0xff] %v5822_v54 }
 0xf05   :  { %2249 = vrot.lane.b32.xlu1 %v2232_v62, %s3890_s17  ;;  %2247 = vrot.lane.b32.xlu0 %v2231_v26, %s3890_s17 }
 0xf09   :  { %2269 = vperm.xlu0 %3829, %v5688_v12  }
 0xf0d   :  { %3830 = vset.pattern.permute.xlu0 %v7684_v38 }
 0xf0e   :  { %2135 = vperm.xlu0 %3830, %v5680_v60  }
 0xf6f   :  { %v5757_v1 = vpop.permute.xlu0 %2239 }
 0xf70   :  { %7685 = vst [vmem:[#allocation20_spill] sm:$0xff] %v5757_v1 }
 0xf73   :  { %v5759_v50 = vpop.permute.xlu0 %2243 }
 0xf77   :  { %v5765_v30 = vpop.permute.xlu0 %2247 }
 0xf88   :  { %v2270_v7 = vpop.permute.xlu0 %2269 }
 0xf89   :  { %v2274_v23 = vmul.f32 %v2270_v7, %v5775_v0  ;;  %v2272_v24 = vmul.f32 %v2270_v7, %v5772_v22  ;;  %v2276_v48 = vmul.f32 %v2270_v7, %v5785_v29  ;;  %v2273_v9 = vmul.f32 %v2270_v7, %v5782_v16 }
 0xf8a   :  { %v2275_v15 = vmul.f32 %v2270_v7, %v5794_v2  ;;  %v2277_v27 = vmul.f32 %v2270_v7, %v5800_v51 }
 0xf8b   :  { %2288 = vrot.lane.b32.xlu0 %v2274_v23, %s3890_s17  ;;  %2284 = vrot.lane.b32.xlu1 %v2272_v24, %s3890_s17  ;;  %v5842_v24 = vrot.slane %v2095_v6, %v7645_v58 }
 0xf8d   :  { %v5807_v41 = vpop.permute.xlu0 %2135  ;;  %7694 = vst [vmem:[#allocation66_spill] sm:$0xff] %v5842_v24 }
 0xf8f   :  { %2292 = vrot.lane.b32.xlu0 %v2276_v48, %s3890_s17  ;;  %2286 = vrot.lane.b32.xlu1 %v2273_v9, %s3890_s17  ;;  %v5852_v9 = vrot.slane %v2103_v36, %v7645_v58 }
 0xf91   :  { %7695 = vst [vmem:[#allocation68_spill] sm:$0xff] %v5852_v9 }
 0xf93   :  { %2314 = vperm.xlu0 %3830, %v5688_v12   ;;  %2290 = vrot.lane.b32.xlu1 %v2275_v15, %s3890_s17 }
 0xf97   :  { %2294 = vrot.lane.b32.xlu1 %v2277_v27, %s3890_s17  ;;  %3831 = vset.pattern.permute.xlu0 %v7675_v10  ;;  %v2161_v27 = vrot.slane %v5696_v18, %v7646_v42 }
 0xf99   :  { %v5867_v58 = vrot.slane %v2161_v27, %v7646_v42 }
 0xffd   :  { %v5809_v21 = vpop.permute.xlu0 %2288 }
0x1001   :  { %v5815_v31 = vpop.permute.xlu0 %2292 }
0x1012   :  { %v2315_v62 = vpop.permute.xlu0 %2314 }
0x1013   :  { %v2319_v26 = vmul.f32 %v2315_v62, %v5825_v35  ;;  %v2317_v11 = vmul.f32 %v2315_v62, %v5822_v54  ;;  %v2321_v7 = vmul.f32 %v2315_v62, %v5835_v45  ;;  %v2318_v23 = vmul.f32 %v2315_v62, %v5832_v57 }
0x1014   :  { %v2320_v48 = vmul.f32 %v2315_v62, %v5842_v24  ;;  %v2322_v37 = vmul.f32 %v2315_v62, %v5852_v9 }
0x1015   :  { %2333 = vrot.lane.b32.xlu0 %v2319_v26, %s3890_s17  ;;  %2329 = vrot.lane.b32.xlu1 %v2317_v11, %s3890_s17  ;;  %v5881_v11 = vrot.slane %v2169_v25, %v7646_v42  ;;  %v7699_v25 = vmov 1  }
0x1019   :  { %2337 = vrot.lane.b32.xlu0 %v2321_v7, %s3890_s17  ;;  %2331 = vrot.lane.b32.xlu1 %v2318_v23, %s3890_s17 }
0x101d   :  { %2359 = vperm.xlu0 %3831, %v5688_v12   ;;  %2335 = vrot.lane.b32.xlu1 %v2320_v48, %s3890_s17  ;;  %v2153_v12 = vrot.slane %v5706_v59, %v7646_v42 }
0x101f   :  { %v5870_v32 = vrot.slane %v2153_v12, %v7646_v42 }
0x1021   :  { %3832 = vset.pattern.permute.xlu0 %v7644_v8  ;;  %2339 = vrot.lane.b32.xlu1 %v2322_v37, %s3890_s17  ;;  %7696 = vst [vmem:[#allocation67_spill] sm:$0xff] %v5870_v32  ;;  %v3772_v37 = vld [vmem:[%s7061_s5 + $0x8] sm:$0xf] }
0x1022   :  { %1995 = vperm.xlu0 %3832, %v5680_v60   ;;  %v7697_v60 = vld [vmem:[#allocation15_spill] sm:$0xff] }
0x1023   :  { %v2157_v46 = vrot.slane %v5706_v59, %v7697_v60  ;;  %v2165_v7 = vrot.slane %v5696_v18, %v7697_v60  ;;  %v2173_v48 = vrot.slane %v5724_v55, %v7697_v60 }
0x1025   :  { %v5884_v6 = vrot.slane %v2157_v46, %v7646_v42  ;;  %v5893_v36 = vrot.slane %v2165_v7, %v7646_v42  ;;  %v5903_v27 = vrot.slane %v2173_v48, %v7646_v42 }
0x1027   :  { %7698 = vst [vmem:[#allocation25_spill] sm:$0xff] %v5903_v27 }
0x1087   :  { %v5858_v15 = vpop.permute.xlu0 %2333 }
0x108b   :  { %v5864_v14 = vpop.permute.xlu0 %2337 }
0x109c   :  { %v2360_v20 = vpop.permute.xlu0 %2359 }
0x109d   :  { %v2364_v62 = vmul.f32 %v2360_v20, %v5867_v58  ;;  %v2362_v26 = vmul.f32 %v2360_v20, %v5870_v32  ;;  %v2366_v59 = vmul.f32 %v2360_v20, %v5881_v11  ;;  %v2363_v23 = vmul.f32 %v2360_v20, %v5884_v6 }
0x109e   :  { %v2365_v18 = vmul.f32 %v2360_v20, %v5893_v36  ;;  %v2367_v12 = vmul.f32 %v2360_v20, %v5903_v27 }
0x109f   :  { %2378 = vrot.lane.b32.xlu0 %v2364_v62, %s3890_s17  ;;  %2374 = vrot.lane.b32.xlu1 %v2362_v26, %s3890_s17 }
0x10a1   :  { %v5908_v46 = vpop.permute.xlu0 %1995 }
0x10a2   :  { %7700 = vst [vmem:[#allocation69_spill] sm:$0xff] %v5908_v46 }
0x10a3   :  { %2382 = vrot.lane.b32.xlu0 %v2366_v59, %s3890_s17  ;;  %2376 = vrot.lane.b32.xlu1 %v2363_v23, %s3890_s17 }
0x10a7   :  { %2407 = vperm.xlu0 %3832, %v3772_v37   ;;  %2380 = vrot.lane.b32.xlu1 %v2365_v18, %s3890_s17 }
0x10ab   :  { %2384 = vrot.lane.b32.xlu1 %v2367_v12, %s3890_s17  ;;  %3833 = vset.pattern.permute.xlu0 %v7699_v25 }
0x1111   :  { %v5910_v55 = vpop.permute.xlu0 %2378 }
0x1115   :  { %v5912_v60 = vpop.permute.xlu0 %2382 }
0x1126   :  { %v2408_v62 = vpop.permute.xlu0 %2407 }
0x1127   :  { %v2412_v26 = vmul.f32 %v2408_v62, %v5734_v19  ;;  %v2410_v7 = vmul.f32 %v2408_v62, %v5720_v39  ;;  %v2414_v42 = vmul.f32 %v2408_v62, %v5748_v49  ;;  %v2411_v20 = vmul.f32 %v2408_v62, %v5717_v34 }
0x1128   :  { %v2413_v59 = vmul.f32 %v2408_v62, %v5729_v44  ;;  %v2415_v23 = vmul.f32 %v2408_v62, %v5745_v33 }
0x1129   :  { %2426 = vrot.lane.b32.xlu0 %v2412_v26, %s3891_s18  ;;  %2422 = vrot.lane.b32.xlu1 %v2410_v7, %s3891_s18 }
0x112d   :  { %2430 = vrot.lane.b32.xlu0 %v2414_v42, %s3891_s18  ;;  %2424 = vrot.lane.b32.xlu1 %v2411_v20, %s3891_s18 }
0x1131   :  { %2452 = vperm.xlu0 %3833, %v3772_v37   ;;  %2428 = vrot.lane.b32.xlu1 %v2413_v59, %s3891_s18 }
0x1135   :  { %2432 = vrot.lane.b32.xlu1 %v2415_v23, %s3891_s18  ;;  %3834 = vset.pattern.permute.xlu0 %v7684_v38 }
0x119b   :  { %v5927_v48 = vpop.permute.xlu0 %2426 }
0x119f   :  { %v5929_v18 = vpop.permute.xlu0 %2430 }
0x11b0   :  { %v2453_v12 = vpop.permute.xlu0 %2452 }
0x11b1   :  { %v2457_v26 = vmul.f32 %v2453_v12, %v5775_v0  ;;  %v2455_v7 = vmul.f32 %v2453_v12, %v5772_v22  ;;  %v2459_v42 = vmul.f32 %v2453_v12, %v5785_v29  ;;  %v2456_v62 = vmul.f32 %v2453_v12, %v5782_v16 }
0x11b2   :  { %v2458_v20 = vmul.f32 %v2453_v12, %v5794_v2  ;;  %v2460_v59 = vmul.f32 %v2453_v12, %v5800_v51 }
0x11b3   :  { %2471 = vrot.lane.b32.xlu0 %v2457_v26, %s3891_s18  ;;  %2467 = vrot.lane.b32.xlu1 %v2455_v7, %s3891_s18 }
0x11b7   :  { %2475 = vrot.lane.b32.xlu0 %v2459_v42, %s3891_s18  ;;  %2469 = vrot.lane.b32.xlu1 %v2456_v62, %s3891_s18 }
0x11bb   :  { %2497 = vperm.xlu0 %3834, %v3772_v37   ;;  %2473 = vrot.lane.b32.xlu1 %v2458_v20, %s3891_s18 }
0x11bf   :  { %2477 = vrot.lane.b32.xlu1 %v2460_v59, %s3891_s18  ;;  %3835 = vset.pattern.permute.xlu0 %v7675_v10 }
0x1225   :  { %v5944_v23 = vpop.permute.xlu0 %2471 }
0x1229   :  { %v5946_v26 = vpop.permute.xlu0 %2475 }
0x122a   :  { %7701 = vst [vmem:[#allocation26_spill] sm:$0xff] %v5946_v26 }
0x123a   :  { %v2498_v7 = vpop.permute.xlu0 %2497 }
0x123b   :  { %v2502_v42 = vmul.f32 %v2498_v7, %v5825_v35  ;;  %v2500_v62 = vmul.f32 %v2498_v7, %v5822_v54  ;;  %v2504_v20 = vmul.f32 %v2498_v7, %v5835_v45  ;;  %v2501_v12 = vmul.f32 %v2498_v7, %v5832_v57 }
0x123c   :  { %v2503_v59 = vmul.f32 %v2498_v7, %v5842_v24  ;;  %v2505_v56 = vmul.f32 %v2498_v7, %v5852_v9 }
0x123d   :  { %2516 = vrot.lane.b32.xlu0 %v2502_v42, %s3891_s18  ;;  %2512 = vrot.lane.b32.xlu1 %v2500_v62, %s3891_s18 }
0x1241   :  { %2520 = vrot.lane.b32.xlu0 %v2504_v20, %s3891_s18  ;;  %2514 = vrot.lane.b32.xlu1 %v2501_v12, %s3891_s18 }
0x1245   :  { %2542 = vperm.xlu0 %3835, %v3772_v37   ;;  %2518 = vrot.lane.b32.xlu1 %v2503_v59, %s3891_s18 }
0x1249   :  { %2522 = vrot.lane.b32.xlu1 %v2505_v56, %s3891_s18  ;;  %3836 = vset.pattern.permute.xlu0 %v7644_v8  ;;  %v3773_v56 = vld [vmem:[%s7061_s5 + $0xc] sm:$0xf] }
0x12af   :  { %v5961_v42 = vpop.permute.xlu0 %2516 }
0x12b3   :  { %v5963_v62 = vpop.permute.xlu0 %2520 }
0x12b4   :  { %7702 = vst [vmem:[#allocation72_spill] sm:$0xff] %v5963_v62 }
0x12c4   :  { %v2543_v13 = vpop.permute.xlu0 %2542 }
0x12c5   :  { %v2547_v20 = vmul.f32 %v2543_v13, %v5867_v58  ;;  %v2545_v12 = vmul.f32 %v2543_v13, %v5870_v32  ;;  %v2549_v37 = vmul.f32 %v2543_v13, %v5881_v11  ;;  %v2546_v7 = vmul.f32 %v2543_v13, %v5884_v6 }
0x12c6   :  { %v2548_v59 = vmul.f32 %v2543_v13, %v5893_v36 }
0x12c7   :  { %2561 = vrot.lane.b32.xlu0 %v2547_v20, %s3891_s18  ;;  %2557 = vrot.lane.b32.xlu1 %v2545_v12, %s3891_s18  ;;  %v2550_v20 = vmul.f32 %v2543_v13, %v5903_v27 }
0x12cb   :  { %2565 = vrot.lane.b32.xlu0 %v2549_v37, %s3891_s18  ;;  %2559 = vrot.lane.b32.xlu1 %v2546_v7, %s3891_s18 }
0x12cf   :  { %2590 = vperm.xlu0 %3836, %v3773_v56   ;;  %2563 = vrot.lane.b32.xlu1 %v2548_v59, %s3891_s18 }
0x12d3   :  { %2567 = vrot.lane.b32.xlu1 %v2550_v20, %s3891_s18  ;;  %3837 = vset.pattern.permute.xlu0 %v7699_v25 }
0x1339   :  { %v5981_v12 = vpop.permute.xlu0 %2561 }
0x133a   :  { %7703 = vst [vmem:[#allocation74_spill] sm:$0xff] %v5981_v12 }
0x133d   :  { %v5983_v37 = vpop.permute.xlu0 %2565 }
0x133e   :  { %7704 = vst [vmem:[#allocation73_spill] sm:$0xff] %v5983_v37 }
0x134e   :  { %v2591_v7 = vpop.permute.xlu0 %2590 }
0x134f   :  { %v2595_v47 = vmul.f32 %v2591_v7, %v5734_v19  ;;  %v2593_v17 = vmul.f32 %v2591_v7, %v5720_v39  ;;  %v2597_v59 = vmul.f32 %v2591_v7, %v5748_v49  ;;  %v2594_v13 = vmul.f32 %v2591_v7, %v5717_v34 }
0x1350   :  { %v2596_v20 = vmul.f32 %v2591_v7, %v5729_v44  ;;  %v2598_v43 = vmul.f32 %v2591_v7, %v5745_v33 }
0x1351   :  { %2609 = vrot.lane.b32.xlu0 %v2595_v47, %s3892_s21  ;;  %2605 = vrot.lane.b32.xlu1 %v2593_v17, %s3892_s21 }
0x1355   :  { %2613 = vrot.lane.b32.xlu0 %v2597_v59, %s3892_s21  ;;  %2607 = vrot.lane.b32.xlu1 %v2594_v13, %s3892_s21 }
0x1359   :  { %2635 = vperm.xlu0 %3837, %v3773_v56   ;;  %2611 = vrot.lane.b32.xlu1 %v2596_v20, %s3892_s21 }
0x135d   :  { %2615 = vrot.lane.b32.xlu1 %v2598_v43, %s3892_s21  ;;  %3838 = vset.pattern.permute.xlu0 %v7684_v38 }
0x13c3   :  { %v5998_v17 = vpop.permute.xlu0 %2609 }
0x13c4   :  { %7705 = vst [vmem:[#allocation27_spill] sm:$0xff] %v5998_v17 }
0x13c7   :  { %v6000_v47 = vpop.permute.xlu0 %2613 }
0x13c8   :  { %7706 = vst [vmem:[#allocation75_spill] sm:$0xff] %v6000_v47 }
0x13d8   :  { %v2636_v61 = vpop.permute.xlu0 %2635 }
0x13d9   :  { %v2640_v59 = vmul.f32 %v2636_v61, %v5775_v0  ;;  %v2638_v13 = vmul.f32 %v2636_v61, %v5772_v22  ;;  %v2642_v20 = vmul.f32 %v2636_v61, %v5785_v29  ;;  %v2639_v7 = vmul.f32 %v2636_v61, %v5782_v16 }
0x13da   :  { %v2641_v43 = vmul.f32 %v2636_v61, %v5794_v2  ;;  %v2643_v40 = vmul.f32 %v2636_v61, %v5800_v51 }
0x13db   :  { %2654 = vrot.lane.b32.xlu0 %v2640_v59, %s3892_s21  ;;  %2650 = vrot.lane.b32.xlu1 %v2638_v13, %s3892_s21 }
0x13df   :  { %2658 = vrot.lane.b32.xlu0 %v2642_v20, %s3892_s21  ;;  %2652 = vrot.lane.b32.xlu1 %v2639_v7, %s3892_s21 }
0x13e3   :  { %2680 = vperm.xlu0 %3838, %v3773_v56   ;;  %2656 = vrot.lane.b32.xlu1 %v2641_v43, %s3892_s21 }
0x13e7   :  { %2660 = vrot.lane.b32.xlu1 %v2643_v40, %s3892_s21  ;;  %3839 = vset.pattern.permute.xlu0 %v7675_v10 }
0x144d   :  { %v6015_v59 = vpop.permute.xlu0 %2654 }
0x144e   :  { %7707 = vst [vmem:[#allocation28_spill] sm:$0xff] %v6015_v59 }
0x1451   :  { %v6017_v13 = vpop.permute.xlu0 %2658 }
0x1452   :  { %7708 = vst [vmem:[#allocation78_spill] sm:$0xff] %v6017_v13 }
0x1462   :  { %v2681_v3 = vpop.permute.xlu0 %2680 }
0x1463   :  { %v2685_v20 = vmul.f32 %v2681_v3, %v5825_v35  ;;  %v2683_v7 = vmul.f32 %v2681_v3, %v5822_v54  ;;  %v2687_v43 = vmul.f32 %v2681_v3, %v5835_v45  ;;  %v2684_v61 = vmul.f32 %v2681_v3, %v5832_v57 }
0x1464   :  { %v2686_v40 = vmul.f32 %v2681_v3, %v5842_v24  ;;  %v2688_v63 = vmul.f32 %v2681_v3, %v5852_v9 }
0x1465   :  { %2699 = vrot.lane.b32.xlu0 %v2685_v20, %s3892_s21  ;;  %2695 = vrot.lane.b32.xlu1 %v2683_v7, %s3892_s21 }
0x1469   :  { %2703 = vrot.lane.b32.xlu0 %v2687_v43, %s3892_s21  ;;  %2697 = vrot.lane.b32.xlu1 %v2684_v61, %s3892_s21 }
0x146d   :  { %2725 = vperm.xlu0 %3839, %v3773_v56   ;;  %2701 = vrot.lane.b32.xlu1 %v2686_v40, %s3892_s21 }
0x1471   :  { %2705 = vrot.lane.b32.xlu1 %v2688_v63, %s3892_s21  ;;  %3840 = vset.pattern.permute.xlu0 %v7644_v8  ;;  %v3774_v63 = vld [vmem:[%s7061_s5 + $0x10] sm:$0xf] }
0x14d7   :  { %v6032_v20 = vpop.permute.xlu0 %2699 }
0x14d8   :  { %7709 = vst [vmem:[#allocation80_spill] sm:$0xff] %v6032_v20 }
0x14db   :  { %v6034_v7 = vpop.permute.xlu0 %2703 }
0x14dc   :  { %7710 = vst [vmem:[#allocation79_spill] sm:$0xff] %v6034_v7 }
0x14ec   :  { %v2726_v28 = vpop.permute.xlu0 %2725 }
0x14ed   :  { %v2730_v43 = vmul.f32 %v2726_v28, %v5867_v58  ;;  %v2728_v61 = vmul.f32 %v2726_v28, %v5870_v32  ;;  %v2732_v56 = vmul.f32 %v2726_v28, %v5881_v11  ;;  %v2729_v3 = vmul.f32 %v2726_v28, %v5884_v6 }
0x14ee   :  { %v2731_v40 = vmul.f32 %v2726_v28, %v5893_v36 }
0x14ef   :  { %2744 = vrot.lane.b32.xlu0 %v2730_v43, %s3892_s21  ;;  %2740 = vrot.lane.b32.xlu1 %v2728_v61, %s3892_s21  ;;  %v2733_v43 = vmul.f32 %v2726_v28, %v5903_v27 }
0x14f3   :  { %2748 = vrot.lane.b32.xlu0 %v2732_v56, %s3892_s21  ;;  %2742 = vrot.lane.b32.xlu1 %v2729_v3, %s3892_s21 }
0x14f7   :  { %2773 = vperm.xlu0 %3840, %v3774_v63   ;;  %2746 = vrot.lane.b32.xlu1 %v2731_v40, %s3892_s21 }
0x14fb   :  { %2750 = vrot.lane.b32.xlu1 %v2733_v43, %s3892_s21  ;;  %3841 = vset.pattern.permute.xlu0 %v7699_v25  ;;  %v6064_v43 = vpop.permute.xlu1 %2241 }
0x1561   :  { %v6052_v61 = vpop.permute.xlu0 %2744 }
0x1562   :  { %7711 = vst [vmem:[#allocation29_spill] sm:$0xff] %v6052_v61 }
0x1565   :  { %v6054_v56 = vpop.permute.xlu0 %2748 }
0x1566   :  { %7712 = vst [vmem:[#allocation81_spill] sm:$0xff] %v6054_v56 }
0x1576   :  { %v2774_v3 = vpop.permute.xlu0 %2773 }
0x1577   :  { %v2778_v5 = vmul.f32 %v2774_v3, %v5734_v19  ;;  %v2776_v4 = vmul.f32 %v2774_v3, %v5720_v39  ;;  %v2780_v40 = vmul.f32 %v2774_v3, %v5748_v49  ;;  %v2777_v28 = vmul.f32 %v2774_v3, %v5717_v34 }
0x1578   :  { %v2779_v1 = vmul.f32 %v2774_v3, %v5729_v44  ;;  %v2781_v56 = vmul.f32 %v2774_v3, %v5745_v33 }
0x1579   :  { %2792 = vrot.lane.b32.xlu0 %v2778_v5, %s3893_s24  ;;  %2788 = vrot.lane.b32.xlu1 %v2776_v4, %s3893_s24  ;;  %v6069_v5 = vpop.permute.xlu1 %2245 }
0x157d   :  { %2796 = vrot.lane.b32.xlu0 %v2780_v40, %s3893_s24  ;;  %2790 = vrot.lane.b32.xlu1 %v2777_v28, %s3893_s24  ;;  %v6077_v28 = vpop.permute.xlu1 %2249 }
0x157e   :  { %7715 = vst [vmem:[#allocation86_spill] sm:$0xff] %v6077_v28 }
0x1581   :  { %2818 = vperm.xlu0 %3841, %v3774_v63   ;;  %2794 = vrot.lane.b32.xlu1 %v2779_v1, %s3893_s24  ;;  %v6081_v1 = vpop.permute.xlu1 %2284 }
0x1582   :  { %7716 = vst [vmem:[#allocation85_spill] sm:$0xff] %v6081_v1 }
0x1585   :  { %2798 = vrot.lane.b32.xlu1 %v2781_v56, %s3893_s24  ;;  %3842 = vset.pattern.permute.xlu0 %v7684_v38 }
0x15eb   :  { %v6073_v4 = vpop.permute.xlu0 %2792 }
0x15ec   :  { %7713 = vst [vmem:[#allocation30_spill] sm:$0xff] %v6073_v4 }
0x15ef   :  { %v6075_v40 = vpop.permute.xlu0 %2796 }
0x15f0   :  { %7714 = vst [vmem:[#allocation84_spill] sm:$0xff] %v6075_v40  ;;  %v6089_v40 = vpop.permute.xlu1 %2286 }
0x1600   :  { %v2819_v7 = vpop.permute.xlu0 %2818 }
0x1601   :  { %v2823_v61 = vmul.f32 %v2819_v7, %v5775_v0  ;;  %v2821_v13 = vmul.f32 %v2819_v7, %v5772_v22  ;;  %v2825_v56 = vmul.f32 %v2819_v7, %v5785_v29  ;;  %v2822_v3 = vmul.f32 %v2819_v7, %v5782_v16 }
0x1602   :  { %v2824_v4 = vmul.f32 %v2819_v7, %v5794_v2  ;;  %v2826_v1 = vmul.f32 %v2819_v7, %v5800_v51 }
0x1603   :  { %2837 = vrot.lane.b32.xlu0 %v2823_v61, %s3893_s24  ;;  %2833 = vrot.lane.b32.xlu1 %v2821_v13, %s3893_s24  ;;  %v6094_v61 = vpop.permute.xlu1 %2290 }
0x1607   :  { %2841 = vrot.lane.b32.xlu0 %v2825_v56, %s3893_s24  ;;  %2835 = vrot.lane.b32.xlu1 %v2822_v3, %s3893_s24  ;;  %v6102_v3 = vpop.permute.xlu1 %2294 }
0x1608   :  { %7719 = vst [vmem:[#allocation32_spill] sm:$0xff] %v6102_v3 }
0x160b   :  { %2863 = vperm.xlu0 %3842, %v3774_v63   ;;  %2839 = vrot.lane.b32.xlu1 %v2824_v4, %s3893_s24  ;;  %v6106_v4 = vpop.permute.xlu1 %2329 }
0x160c   :  { %7720 = vst [vmem:[#allocation90_spill] sm:$0xff] %v6106_v4 }
0x160f   :  { %2843 = vrot.lane.b32.xlu1 %v2826_v1, %s3893_s24  ;;  %3843 = vset.pattern.permute.xlu0 %v7675_v10 }
0x1675   :  { %v6098_v13 = vpop.permute.xlu0 %2837 }
0x1676   :  { %7717 = vst [vmem:[#allocation31_spill] sm:$0xff] %v6098_v13 }
0x1679   :  { %v6100_v56 = vpop.permute.xlu0 %2841 }
0x167a   :  { %7718 = vst [vmem:[#allocation87_spill] sm:$0xff] %v6100_v56  ;;  %v6114_v56 = vpop.permute.xlu1 %2331 }
0x168a   :  { %v2864_v20 = vpop.permute.xlu0 %2863 }
0x168b   :  { %v2868_v47 = vmul.f32 %v2864_v20, %v5825_v35  ;;  %v2866_v59 = vmul.f32 %v2864_v20, %v5822_v54  ;;  %v2870_v7 = vmul.f32 %v2864_v20, %v5835_v45  ;;  %v2867_v1 = vmul.f32 %v2864_v20, %v5832_v57 }
0x168c   :  { %v2869_v13 = vmul.f32 %v2864_v20, %v5842_v24  ;;  %v2871_v4 = vmul.f32 %v2864_v20, %v5852_v9 }
0x168d   :  { %2882 = vrot.lane.b32.xlu0 %v2868_v47, %s3893_s24  ;;  %2878 = vrot.lane.b32.xlu1 %v2866_v59, %s3893_s24  ;;  %v6119_v47 = vpop.permute.xlu1 %2335 }
0x1691   :  { %2886 = vrot.lane.b32.xlu0 %v2870_v7, %s3893_s24  ;;  %2880 = vrot.lane.b32.xlu1 %v2867_v1, %s3893_s24  ;;  %v6127_v1 = vpop.permute.xlu1 %2339 }
0x1692   :  { %7723 = vst [vmem:[#allocation33_spill] sm:$0xff] %v6127_v1 }
0x1695   :  { %2908 = vperm.xlu0 %3843, %v3774_v63   ;;  %2884 = vrot.lane.b32.xlu1 %v2869_v13, %s3893_s24  ;;  %v6131_v13 = vpop.permute.xlu1 %2374 }
0x1696   :  { %7724 = vst [vmem:[#allocation93_spill] sm:$0xff] %v6131_v13 }
0x1699   :  { %2888 = vrot.lane.b32.xlu1 %v2871_v4, %s3893_s24  ;;  %3844 = vset.pattern.permute.xlu0 %v7644_v8 }
0x16ff   :  { %v6123_v59 = vpop.permute.xlu0 %2882 }
0x1700   :  { %7721 = vst [vmem:[#allocation92_spill] sm:$0xff] %v6123_v59 }
0x1703   :  { %v6125_v7 = vpop.permute.xlu0 %2886 }
0x1704   :  { %7722 = vst [vmem:[#allocation91_spill] sm:$0xff] %v6125_v7  ;;  %v6142_v7 = vld [vmem:[%s7061_s5 + $0x14] sm:$0xf] }
0x1714   :  { %v2909_v37 = vpop.permute.xlu0 %2908 }
0x1715   :  { %v2913_v17 = vmul.f32 %v2909_v37, %v5867_v58  ;;  %v2911_v63 = vmul.f32 %v2909_v37, %v5870_v32  ;;  %v2915_v20 = vmul.f32 %v2909_v37, %v5881_v11  ;;  %v2912_v4 = vmul.f32 %v2909_v37, %v5884_v6  ;;  %v6144_v32 = vpop.permute.xlu1 %2376 }
0x1716   :  { %v2914_v13 = vmul.f32 %v2909_v37, %v5893_v36 }
0x1717   :  { %2927 = vrot.lane.b32.xlu0 %v2913_v17, %s3893_s24  ;;  %2923 = vrot.lane.b32.xlu1 %v2911_v63, %s3893_s24  ;;  %v2916_v17 = vmul.f32 %v2909_v37, %v5903_v27 }
0x1719   :  { %v6150_v63 = vpop.permute.xlu1 %2380 }
0x171b   :  { %2931 = vrot.lane.b32.xlu0 %v2915_v20, %s3893_s24  ;;  %2925 = vrot.lane.b32.xlu1 %v2912_v4, %s3893_s24 }
0x171d   :  { %v6158_v59 = vpop.permute.xlu1 %2384 }
0x171e   :  { %7727 = vst [vmem:[#allocation98_spill] sm:$0xff] %v6158_v59 }
0x171f   :  { %2956 = vperm.xlu0 %3844, %v6142_v7   ;;  %2929 = vrot.lane.b32.xlu1 %v2914_v13, %s3893_s24 }
0x1721   :  { %v6162_v13 = vpop.permute.xlu1 %2422 }
0x1722   :  { %7728 = vst [vmem:[#allocation97_spill] sm:$0xff] %v6162_v13 }
0x1723   :  { %2933 = vrot.lane.b32.xlu1 %v2916_v17, %s3893_s24  ;;  %3845 = vset.pattern.permute.xlu0 %v7699_v25 }
0x1725   :  { %v6170_v25 = vpop.permute.xlu1 %2424 }
0x1729   :  { %v6176_v13 = vpop.permute.xlu1 %2428 }
0x1789   :  { %v6154_v20 = vpop.permute.xlu0 %2927 }
0x178a   :  { %7725 = vst [vmem:[#allocation34_spill] sm:$0xff] %v6154_v20 }
0x178d   :  { %v6156_v4 = vpop.permute.xlu0 %2931 }
0x178e   :  { %7726 = vst [vmem:[#allocation96_spill] sm:$0xff] %v6156_v4 }
0x179e   :  { %v2957_v62 = vpop.permute.xlu0 %2956 }
0x179f   :  { %v2961_v12 = vmul.f32 %v2957_v62, %v5734_v19  ;;  %v2959_v26 = vmul.f32 %v2957_v62, %v5720_v39  ;;  %v2963_v37 = vmul.f32 %v2957_v62, %v5748_v49  ;;  %v2960_v17 = vmul.f32 %v2957_v62, %v5717_v34 }
0x17a0   :  { %v2962_v27 = vmul.f32 %v2957_v62, %v5729_v44 }
0x17a1   :  { %2975 = vrot.lane.b32.xlu0 %v2961_v12, %s3894_s27  ;;  %2971 = vrot.lane.b32.xlu1 %v2959_v26, %s3894_s27  ;;  %v2964_v12 = vmul.f32 %v2957_v62, %v5745_v33  ;;  %v6180_v26 = vpop.permute.xlu1 %2432 }
0x17a2   :  { %7729 = vst [vmem:[#allocation35_spill] sm:$0xff] %v6180_v26 }
0x17a5   :  { %2979 = vrot.lane.b32.xlu0 %v2963_v37, %s3894_s27  ;;  %2973 = vrot.lane.b32.xlu1 %v2960_v17, %s3894_s27  ;;  %v6182_v37 = vpop.permute.xlu1 %2467 }
0x17a6   :  { %7730 = vst [vmem:[#allocation99_spill] sm:$0xff] %v6182_v37 }
0x17a9   :  { %3001 = vperm.xlu0 %3845, %v6142_v7   ;;  %2977 = vrot.lane.b32.xlu1 %v2962_v27, %s3894_s27  ;;  %v6184_v17 = vpop.permute.xlu1 %2469 }
0x17ad   :  { %2981 = vrot.lane.b32.xlu1 %v2964_v12, %s3894_s27  ;;  %3846 = vset.pattern.permute.xlu0 %v7684_v38  ;;  %v6186_v39 = vpop.permute.xlu1 %2473 }
0x17ae   :  { %7731 = vst [vmem:[#allocation36_spill] sm:$0xff] %v6186_v39 }
0x17b1   :  { %v6188_v4 = vpop.permute.xlu1 %2477 }
0x17b2   :  { %7732 = vst [vmem:[#allocation102_spill] sm:$0xff] %v6188_v4 }
0x17b5   :  { %v6192_v27 = vpop.permute.xlu1 %2512 }
0x17b6   :  { %7734 = vst [vmem:[#allocation103_spill] sm:$0xff] %v6192_v27 }
0x17b9   :  { %v6196_v33 = vpop.permute.xlu1 %2514 }
0x17bd   :  { %v6200_v37 = vpop.permute.xlu1 %2518 }
0x17be   :  { %7736 = vst [vmem:[#allocation105_spill] sm:$0xff] %v6200_v37 }
0x17c1   :  { %v6208_v27 = vpop.permute.xlu1 %2522 }
0x17c2   :  { %7737 = vst [vmem:[#allocation38_spill] sm:$0xff] %v6208_v27 }
0x1813   :  { %v6190_v20 = vpop.permute.xlu0 %2975 }
0x1814   :  { %7733 = vst [vmem:[#allocation104_spill] sm:$0xff] %v6190_v20 }
0x1817   :  { %v6194_v62 = vpop.permute.xlu0 %2979 }
0x1818   :  { %7735 = vst [vmem:[#allocation37_spill] sm:$0xff] %v6194_v62 }
0x1828   :  { %v3002_v12 = vpop.permute.xlu0 %3001 }
0x1829   :  { %v3006_v38 = vmul.f32 %v3002_v12, %v5775_v0  ;;  %v3004_v26 = vmul.f32 %v3002_v12, %v5772_v22  ;;  %v3008_v4 = vmul.f32 %v3002_v12, %v5785_v29  ;;  %v3005_v20 = vmul.f32 %v3002_v12, %v5782_v16  ;;  %v6213_v22 = vpop.permute.xlu1 %2557 }
0x182a   :  { %v3007_v62 = vmul.f32 %v3002_v12, %v5794_v2  ;;  %7738 = vst [vmem:[#allocation108_spill] sm:$0xff] %v6213_v22 }
0x182b   :  { %3020 = vrot.lane.b32.xlu0 %v3006_v38, %s3894_s27  ;;  %3016 = vrot.lane.b32.xlu1 %v3004_v26, %s3894_s27  ;;  %v3009_v38 = vmul.f32 %v3002_v12, %v5800_v51 }
0x182d   :  { %v6218_v26 = vpop.permute.xlu1 %2559 }
0x182f   :  { %3024 = vrot.lane.b32.xlu0 %v3008_v4, %s3894_s27  ;;  %3018 = vrot.lane.b32.xlu1 %v3005_v20, %s3894_s27 }
0x1831   :  { %v6220_v4 = vpop.permute.xlu1 %2563 }
0x1832   :  { %7739 = vst [vmem:[#allocation110_spill] sm:$0xff] %v6220_v4 }
0x1833   :  { %3046 = vperm.xlu0 %3846, %v6142_v7   ;;  %3022 = vrot.lane.b32.xlu1 %v3007_v62, %s3894_s27 }
0x1835   :  { %v6222_v20 = vpop.permute.xlu1 %2567 }
0x1836   :  { %7740 = vst [vmem:[#allocation109_spill] sm:$0xff] %v6222_v20 }
0x1837   :  { %3026 = vrot.lane.b32.xlu1 %v3009_v38, %s3894_s27  ;;  %3847 = vset.pattern.permute.xlu0 %v7675_v10 }
0x1839   :  { %v6224_v27 = vpop.permute.xlu1 %2605 }
0x183a   :  { %7741 = vst [vmem:[#allocation42_spill] sm:$0xff] %v6224_v27 }
0x183d   :  { %v6226_v37 = vpop.permute.xlu1 %2607 }
0x183e   :  { %7742 = vst [vmem:[#allocation111_spill] sm:$0xff] %v6226_v37 }
0x1841   :  { %v6228_v39 = vpop.permute.xlu1 %2611 }
0x1842   :  { %7743 = vst [vmem:[#allocation43_spill] sm:$0xff] %v6228_v39 }
0x1845   :  { %v6230_v62 = vpop.permute.xlu1 %2615 }
0x1846   :  { %7744 = vst [vmem:[#allocation114_spill] sm:$0xff] %v6230_v62 }
0x1849   :  { %v6232_v22 = vpop.permute.xlu1 %2650 }
0x184a   :  { %7745 = vst [vmem:[#allocation116_spill] sm:$0xff] %v6232_v22 }
0x184d   :  { %v6234_v12 = vpop.permute.xlu1 %2652 }
0x184e   :  { %7746 = vst [vmem:[#allocation115_spill] sm:$0xff] %v6234_v12 }
0x1851   :  { %v6236_v38 = vpop.permute.xlu1 %2656 }
0x1852   :  { %7747 = vst [vmem:[#allocation46_spill] sm:$0xff] %v6236_v38 }
0x1855   :  { %v6238_v10 = vpop.permute.xlu1 %2660 }
0x1856   :  { %7748 = vst [vmem:[#allocation47_spill] sm:$0xff] %v6238_v10 }
0x1859   :  { %v6240_v51 = vpop.permute.xlu1 %2695 }
0x185a   :  { %7749 = vst [vmem:[#allocation119_spill] sm:$0xff] %v6240_v51 }
0x185d   :  { %v6242_v4 = vpop.permute.xlu1 %2697 }
0x185e   :  { %7750 = vst [vmem:[#allocation121_spill] sm:$0xff] %v6242_v4 }
0x1861   :  { %v6244_v20 = vpop.permute.xlu1 %2701 }
0x1862   :  { %7751 = vst [vmem:[#allocation120_spill] sm:$0xff] %v6244_v20 }
0x1865   :  { %v6246_v27 = vpop.permute.xlu1 %2705 }
0x1866   :  { %7752 = vst [vmem:[#allocation52_spill] sm:$0xff] %v6246_v27 }
0x1869   :  { %v6248_v37 = vpop.permute.xlu1 %2740 }
0x186a   :  { %7753 = vst [vmem:[#allocation122_spill] sm:$0xff] %v6248_v37 }
0x186d   :  { %v6250_v39 = vpop.permute.xlu1 %2742 }
0x186e   :  { %7754 = vst [vmem:[#allocation53_spill] sm:$0xff] %v6250_v39 }
0x1871   :  { %v6252_v62 = vpop.permute.xlu1 %2746 }
0x1875   :  { %v6254_v22 = vpop.permute.xlu1 %2750 }
0x1876   :  { %7755 = vst [vmem:[#allocation123_spill] sm:$0xff] %v6254_v22 }
0x1879   :  { %v6256_v12 = vpop.permute.xlu1 %2788 }
0x187a   :  { %7756 = vst [vmem:[#allocation124_spill] sm:$0xff] %v6256_v12 }
0x187d   :  { %v6260_v10 = vpop.permute.xlu1 %2790 }
0x1881   :  { %v6264_v4 = vpop.permute.xlu1 %2794 }
0x1882   :  { %7759 = vst [vmem:[#allocation125_spill] sm:$0xff] %v6264_v4 }
0x1885   :  { %v6268_v39 = vpop.permute.xlu1 %2798 }
0x1886   :  { %7760 = vst [vmem:[#allocation129_spill] sm:$0xff] %v6268_v39 }
0x1889   :  { %v6274_v22 = vpop.permute.xlu1 %2833 }
0x188a   :  { %7761 = vst [vmem:[#allocation127_spill] sm:$0xff] %v6274_v22 }
0x189d   :  { %v6258_v38 = vpop.permute.xlu0 %3020 }
0x189e   :  { %7757 = vst [vmem:[#allocation58_spill] sm:$0xff] %v6258_v38 }
0x18a1   :  { %v6262_v51 = vpop.permute.xlu0 %3024 }
0x18a2   :  { %7758 = vst [vmem:[#allocation59_spill] sm:$0xff] %v6262_v51 }
0x18b2   :  { %v3047_v20 = vpop.permute.xlu0 %3046 }
0x18b3   :  { %v3051_v27 = vmul.f32 %v3047_v20, %v5825_v35  ;;  %v3049_v37 = vmul.f32 %v3047_v20, %v5822_v54  ;;  %v3053_v12 = vmul.f32 %v3047_v20, %v5835_v45  ;;  %v3050_v38 = vmul.f32 %v3047_v20, %v5832_v57  ;;  %v6281_v54 = vpop.permute.xlu1 %2835 }
0x18b4   :  { %v3052_v51 = vmul.f32 %v3047_v20, %v5842_v24 }
0x18b5   :  { %3065 = vrot.lane.b32.xlu0 %v3051_v27, %s3894_s27  ;;  %3061 = vrot.lane.b32.xlu1 %v3049_v37, %s3894_s27  ;;  %v3054_v37 = vmul.f32 %v3047_v20, %v5852_v9  ;;  %v2069_v9 = vmul.f32 %v5704_v52, %v5782_v16  ;;  %v2002_v16 = vmul.f32 %v5908_v46, %v5748_v49 }
0x18b7   :  { %v6286_v27 = vpop.permute.xlu1 %2839 }
0x18b8   :  { %7762 = vst [vmem:[#allocation64_spill] sm:$0xff] %v6286_v27 }
0x18b9   :  { %3069 = vrot.lane.b32.xlu0 %v3053_v12, %s3894_s27  ;;  %3063 = vrot.lane.b32.xlu1 %v3050_v38, %s3894_s27 }
0x18bb   :  { %v6288_v22 = vpop.permute.xlu1 %2843 }
0x18bc   :  { %7763 = vst [vmem:[#allocation130_spill] sm:$0xff] %v6288_v22 }
0x18bd   :  { %3091 = vperm.xlu0 %3847, %v6142_v7   ;;  %3067 = vrot.lane.b32.xlu1 %v3052_v51, %s3894_s27 }
0x18bf   :  { %v6290_v12 = vpop.permute.xlu1 %2878 }
0x18c0   :  { %7764 = vst [vmem:[#allocation65_spill] sm:$0xff] %v6290_v12  ;;  %v2000_v12 = vmul.f32 %v5908_v46, %v5734_v19 }
0x18c1   :  { %3071 = vrot.lane.b32.xlu1 %v3054_v37, %s3894_s27  ;;  %3848 = vset.pattern.permute.xlu0 %v7644_v8  ;;  %v1999_v37 = vmul.f32 %v5908_v46, %v5717_v34  ;;  %v2139_v34 = vmul.f32 %v5807_v41, %v5832_v57  ;;  %v2209_v57 = vmul.f32 %v5708_v53, %v5884_v6 }
0x18c3   :  { %v6292_v38 = vpop.permute.xlu1 %2880  ;;  %v2075_v22 = vadd.f32 %v2069_v9, %v1999_v37  ;;  %v2072_v9 = vmul.f32 %v5704_v52, %v5785_v29  ;;  %v2140_v37 = vmul.f32 %v5807_v41, %v5825_v35 }
0x18c5   :  { %v2078_v27 = vadd.f32 %v2072_v9, %v2002_v16  ;;  %v2212_v16 = vmul.f32 %v5708_v53, %v5881_v11 }
0x18c7   :  { %v6294_v39 = vpop.permute.xlu1 %2884 }
0x18c8   :  { %7765 = vst [vmem:[#allocation131_spill] sm:$0xff] %v6294_v39 }
0x18cb   :  { %v6296_v7 = vpop.permute.xlu1 %2888 }
0x18cc   :  { %7766 = vst [vmem:[#allocation133_spill] sm:$0xff] %v6296_v7  ;;  %v2001_v7 = vmul.f32 %v5908_v46, %v5729_v44 }
0x18cf   :  { %v6298_v51 = vpop.permute.xlu1 %2923 }
0x18d0   :  { %7767 = vst [vmem:[#allocation132_spill] sm:$0xff] %v6298_v51  ;;  %v2070_v51 = vmul.f32 %v5704_v52, %v5775_v0 }
0x18d2   :  { %v2076_v19 = vadd.f32 %v2070_v51, %v2000_v12  ;;  %v2211_v12 = vmul.f32 %v5708_v53, %v5893_v36 }
0x18d3   :  { %v6300_v4 = vpop.permute.xlu1 %2925 }
0x18d4   :  { %7768 = vst [vmem:[#allocation70_spill] sm:$0xff] %v6300_v4 }
0x18d7   :  { %v6302_v20 = vpop.permute.xlu1 %2929 }
0x18d8   :  { %7769 = vst [vmem:[#allocation134_spill] sm:$0xff] %v6302_v20  ;;  %v2071_v20 = vmul.f32 %v5704_v52, %v5794_v2  ;;  %v2141_v2 = vmul.f32 %v5807_v41, %v5842_v24 }
0x18da   :  { %v2077_v4 = vadd.f32 %v2071_v20, %v2001_v7  ;;  %v2252_v7 = vsel %vm7772_vm5, %v6064_v43, %v5759_v50  ;;  %v2254_v20 = vsel %vm7774_vm8, %v6069_v5, %v5765_v30  ;;  %vm7782_vm5 = vcmask 1031168   ;;  %vm7783_vm8 = vmmov %vm7773_vm6 }
0x18db   :  { %v6308_v8 = vpop.permute.xlu1 %2933 }
0x18dc   :  { %7770 = vst [vmem:[#allocation71_spill] sm:$0xff] %v6308_v8  ;;  %v2145_v8 = vadd.f32 %v2139_v34, %v2075_v22  ;;  %v2147_v44 = vadd.f32 %v2141_v2, %v2077_v4  ;;  %v2142_v34 = vmul.f32 %v5807_v41, %v5835_v45  ;;  %v2210_v22 = vmul.f32 %v5708_v53, %v5867_v58 }
0x18dd   :  { %v2253_v4 = vsel %vm7773_vm6, %v5759_v50, %v6069_v5  ;;  %v2298_v50 = vsel %vm7777_vm11, %v5809_v21, %v6094_v61  ;;  %v2299_v5 = vsel %vm7778_vm12, %v6094_v61, %v5815_v31  ;;  %v2300_v61 = vsel %vm7773_vm6, %v5815_v31, %v6102_v3  ;;  %vm7786_vm11 = vmmov %vm7773_vm6 }
0x18de   :  { %v2215_v0 = vadd.f32 %v2209_v57, %v2145_v8  ;;  %v2148_v2 = vadd.f32 %v2142_v34, %v2078_v27  ;;  %v2342_v34 = vsel %vm7779_vm13, %v6114_v56, %v5858_v15  ;;  %vm7787_vm12 = vmmov %vm7782_vm5 }
0x18df   :  { %v6320_v39 = vpop.permute.xlu1 %2971  ;;  %v2480_v31 = vsel %vm7787_vm12, %v6184_v17, %v5944_v23  ;;  %vm7788_vm13 = vmmov %vm7782_vm5 }
0x18e0   :  { %7771 = vst [vmem:[#allocation135_spill] sm:$0xff] %v6320_v39  ;;  %v2146_v39 = vadd.f32 %v2140_v37, %v2076_v19  ;;  %v2263_v51 = vadd.f32 %v2252_v7, %v2215_v0  ;;  %v2217_v19 = vadd.f32 %v2211_v12, %v2147_v44  ;;  %v2297_v0 = vsel %vm7775_vm9, %v6089_v40, %v5809_v21  ;;  %vm7784_vm9 = vmmov %vm7773_vm6 }
0x18e1   :  { %v2218_v9 = vadd.f32 %v2212_v16, %v2148_v2  ;;  %v2255_v37 = vsel %vm7776_vm10, %v5765_v30, %v6077_v28  ;;  %v2435_v21 = vsel %vm7782_vm5, %v6170_v25, %v5927_v48  ;;  %v2344_v16 = vsel %vm7784_vm9, %v6119_v47, %v5864_v14  ;;  %vm7785_vm10 = vmmov %vm7773_vm6 }
0x18e2   :  { %v2216_v8 = vadd.f32 %v2210_v22, %v2146_v39  ;;  %v2308_v39 = vadd.f32 %v2297_v0, %v2263_v51  ;;  %v2265_v27 = vadd.f32 %v2254_v20, %v2217_v19  ;;  %v2387_v22 = vsel %vm7780_vm14, %v6144_v32, %v5910_v55  ;;  %vm7789_vm14 = vmmov %vm7782_vm5 }
0x18e3   :  { %v6332_v46 = vpop.permute.xlu1 %2973  ;;  %v2266_v30 = vadd.f32 %v2255_v37, %v2218_v9  ;;  %v2343_v19 = vsel %vm7783_vm8, %v5858_v15, %v6119_v47  ;;  %v2389_v20 = vsel %vm7786_vm11, %v6150_v63, %v5912_v60  ;;  %v2436_v47 = vsel %vm7788_vm13, %v5927_v48, %v6176_v13  ;;  %vm7790_vm8 = vmmov %vm7773_vm6  ;;  %v7791_v48 = vld [vmem:[#allocation36_spill] sm:$0xff] }
0x18e4   :  { %v2264_v44 = vadd.f32 %v2253_v4, %v2216_v8  ;;  %v2353_v12 = vadd.f32 %v2342_v34, %v2308_v39  ;;  %v2310_v51 = vadd.f32 %v2299_v5, %v2265_v27  ;;  %v2388_v4 = vsel %vm7785_vm10, %v5910_v55, %v6150_v63  ;;  %vm7792_vm9 = vmmov %vm7782_vm5 }
0x18e5   :  { %v2311_v15 = vadd.f32 %v2300_v61, %v2266_v30  ;;  %v2437_v55 = vsel %vm7789_vm14, %v6176_v13, %v5929_v18  ;;  %v2525_v63 = vsel %vm7782_vm5, %v6196_v33, %v5961_v42  ;;  %v2345_v9 = vsel %vm7773_vm6, %v5864_v14, %v6127_v1  ;;  %v7793_v13 = vld [vmem:[#allocation26_spill] sm:$0xff]  ;;  %vm7794_vm10 = vmmov %vm7782_vm5 }
0x18e6   :  { %v2309_v7 = vadd.f32 %v2298_v50, %v2264_v44  ;;  %v2398_v2 = vadd.f32 %v2387_v22, %v2353_v12  ;;  %v2355_v39 = vadd.f32 %v2344_v16, %v2310_v51  ;;  %v2390_v34 = vsel %vm7790_vm8, %v5912_v60, %v6158_v59  ;;  %vm7796_vm11 = vmmov %vm7782_vm5  ;;  %v7801_v16 = vld [vmem:[#allocation72_spill] sm:$0xff]  ;;  %v7864_v1 = vld [vmem:[#allocation70_spill] sm:$0xff] }
0x18e7   :  { %v6345_v57 = vpop.permute.xlu1 %2977  ;;  %v2481_v22 = vsel %vm7792_vm9, %v5944_v23, %v7791_v48  ;;  %v2482_v12 = vsel %vm7794_vm10, %v7791_v48, %v7793_v13  ;;  %v2356_v14 = vadd.f32 %v2345_v9, %v2311_v15  ;;  %vm7798_vm12 = vmmov %vm7782_vm5  ;;  %v7808_v9 = vld [vmem:[#allocation110_spill] sm:$0xff]  ;;  %v7813_v48 = vld [vmem:[#allocation115_spill] sm:$0xff] }
0x18e8   :  { %v2354_v0 = vadd.f32 %v2343_v19, %v2309_v7  ;;  %v2446_v44 = vadd.f32 %v2435_v21, %v2398_v2  ;;  %v2400_v50 = vadd.f32 %v2389_v20, %v2355_v39  ;;  %v7795_v7 = vld [vmem:[#allocation74_spill] sm:$0xff]  ;;  %v7797_v19 = vld [vmem:[#allocation35_spill] sm:$0xff]  ;;  %v7799_v2 = vld [vmem:[#allocation105_spill] sm:$0xff] }
0x18e9   :  { %v2570_v51 = vsel %vm7796_vm11, %v6218_v26, %v7795_v7  ;;  %v2438_v60 = vsel %vm7798_vm12, %v5929_v18, %v7797_v19  ;;  %vm7800_vm13 = vmmov %vm7782_vm5  ;;  %v7803_v20 = vld [vmem:[#allocation27_spill] sm:$0xff]  ;;  %v2401_v39 = vadd.f32 %v2390_v34, %v2356_v14 }
0x18ea   :  { %v2399_v37 = vadd.f32 %v2388_v4, %v2354_v0  ;;  %v2491_v5 = vadd.f32 %v2480_v31, %v2446_v44  ;;  %v2448_v21 = vadd.f32 %v2437_v55, %v2400_v50  ;;  %v2526_v23 = vsel %vm7800_vm13, %v5961_v42, %v7799_v2  ;;  %vm7802_vm14 = vmmov %vm7782_vm5  ;;  %v7804_v31 = vld [vmem:[#allocation111_spill] sm:$0xff] }
0x18eb   :  { %v6371_v8 = vpop.permute.xlu1 %2981  ;;  %v2527_v4 = vsel %vm7802_vm14, %v7799_v2, %v7801_v16  ;;  %vm7805_vm5 = vcmask 900096   ;;  %vm7807_vm6 = vmmov %vm7792_vm9 }
0x18ec   :  { %7781 = vst [vmem:[#allocation137_spill] sm:$0xff] %v6371_v8  ;;  %v2447_v30 = vadd.f32 %v2436_v47, %v2399_v37  ;;  %v2536_v61 = vadd.f32 %v2525_v63, %v2491_v5  ;;  %v2618_v0 = vsel %vm7805_vm5, %v7804_v31, %v7803_v20  ;;  %v2493_v44 = vadd.f32 %v2482_v12, %v2448_v21  ;;  %v7806_v63 = vld [vmem:[#allocation102_spill] sm:$0xff]  ;;  %vm7809_vm8 = vmmov %vm7807_vm6  ;;  %v7810_v37 = vld [vmem:[#allocation73_spill] sm:$0xff] }
0x18ed   :  { %v2483_v18 = vsel %vm7807_vm6, %v7793_v13, %v7806_v63  ;;  %v2571_v42 = vsel %vm7809_vm8, %v7795_v7, %v7808_v9  ;;  %vm7811_vm9 = vmmov %vm7807_vm6  ;;  %v7812_v5 = vld [vmem:[#allocation28_spill] sm:$0xff]  ;;  %v7817_v21 = vld [vmem:[#allocation43_spill] sm:$0xff] }
0x18ee   :  { %v2492_v15 = vadd.f32 %v2481_v22, %v2447_v30  ;;  %v2581_v47 = vadd.f32 %v2570_v51, %v2536_v61  ;;  %v2572_v50 = vsel %vm7811_vm9, %v7808_v9, %v7810_v37  ;;  %vm7814_vm10 = vmmov %vm7805_vm5  ;;  %v2449_v22 = vadd.f32 %v2438_v60, %v2401_v39  ;;  %v7815_v30 = vld [vmem:[#allocation38_spill] sm:$0xff]  ;;  %v7819_v61 = vld [vmem:[#allocation75_spill] sm:$0xff] }
0x18ef   :  { %v6394_v27 = vpop.permute.xlu1 %3016  ;;  %v2663_v34 = vsel %vm7814_vm10, %v7813_v48, %v7812_v5  ;;  %v2538_v51 = vadd.f32 %v2527_v4, %v2493_v44  ;;  %vm7816_vm11 = vmmov %vm7807_vm6  ;;  %v7821_v9 = vld [vmem:[#allocation80_spill] sm:$0xff]  ;;  %v7822_v63 = vld [vmem:[#allocation121_spill] sm:$0xff] }
0x18f0   :  { %v2537_v12 = vadd.f32 %v2526_v23, %v2492_v15  ;;  %v2629_v14 = vadd.f32 %v2618_v0, %v2581_v47  ;;  %v2528_v13 = vsel %vm7816_vm11, %v7801_v16, %v7815_v30  ;;  %vm7818_vm12 = vmmov %vm7805_vm5  ;;  %v2494_v60 = vadd.f32 %v2483_v18, %v2449_v22  ;;  %v7824_v39 = vld [vmem:[#allocation109_spill] sm:$0xff]  ;;  %v7826_v15 = vld [vmem:[#allocation46_spill] sm:$0xff] }
0x18f1   :  { %v2619_v7 = vsel %vm7818_vm12, %v7803_v20, %v7817_v21  ;;  %vm7820_vm13 = vmmov %vm7805_vm5  ;;  %v2583_v4 = vadd.f32 %v2572_v50, %v2538_v51  ;;  %v7828_v44 = vld [vmem:[#allocation78_spill] sm:$0xff]  ;;  %v7831_v30 = vld [vmem:[#allocation53_spill] sm:$0xff] }
0x18f2   :  { %v2620_v2 = vsel %vm7820_vm13, %v7817_v21, %v7819_v61  ;;  %vm7823_vm14 = vmmov %vm7805_vm5  ;;  %v2582_v23 = vadd.f32 %v2571_v42, %v2537_v12  ;;  %v2674_v0 = vadd.f32 %v2663_v34, %v2629_v14  ;;  %v7830_v21 = vld [vmem:[#allocation29_spill] sm:$0xff]  ;;  %v2539_v18 = vadd.f32 %v2528_v13, %v2494_v60  ;;  %v7833_v12 = vld [vmem:[#allocation114_spill] sm:$0xff] }
0x18f3   :  { %v6432_v55 = vpop.permute.xlu1 %3018  ;;  %v2708_v19 = vsel %vm7823_vm14, %v7822_v63, %v7821_v9  ;;  %vm7825_vm5 = vmmov %vm7807_vm6  ;;  %v2631_v50 = vadd.f32 %v2620_v2, %v2583_v4  ;;  %v7835_v51 = vld [vmem:[#allocation120_spill] sm:$0xff]  ;;  %v7837_v14 = vld [vmem:[#allocation79_spill] sm:$0xff]  ;;  %vm7840_vm13 = vcmask 891904  }
0x18f4   :  { %v2573_v16 = vsel %vm7825_vm5, %v7810_v37, %v7824_v39  ;;  %vm7827_vm6 = vmmov %vm7814_vm10  ;;  %v2630_v42 = vadd.f32 %v2619_v7, %v2582_v23  ;;  %v2719_v34 = vadd.f32 %v2708_v19, %v2674_v0  ;;  %v7839_v39 = vld [vmem:[#allocation30_spill] sm:$0xff]  ;;  %v7841_v23 = vld [vmem:[#allocation47_spill] sm:$0xff] }
0x18f5   :  { %v2664_v20 = vsel %vm7827_vm6, %v7812_v5, %v7826_v15  ;;  %vm7829_vm8 = vmmov %vm7827_vm6  ;;  %v2801_v13 = vsel %vm7840_vm13, %v6260_v10, %v7839_v39  ;;  %v2584_v7 = vadd.f32 %v2573_v16, %v2539_v18  ;;  %v7844_v4 = vld [vmem:[#allocation81_spill] sm:$0xff]  ;;  %v7848_v18 = vld [vmem:[#allocation52_spill] sm:$0xff] }
0x18f6   :  { %v2665_v47 = vsel %vm7829_vm8, %v7826_v15, %v7828_v44  ;;  %vm7832_vm9 = vmmov %vm7827_vm6  ;;  %v2675_v19 = vadd.f32 %v2664_v20, %v2630_v42  ;;  %v7850_v42 = vld [vmem:[#allocation125_spill] sm:$0xff] }
0x18f7   :  { %v2753_v59 = vsel %vm7832_vm9, %v7831_v30, %v7830_v21  ;;  %v6470_v22 = vpop.permute.xlu1 %3022  ;;  %vm7834_vm10 = vmmov %vm7827_vm6  ;;  %v2676_v2 = vadd.f32 %v2665_v47, %v2631_v50  ;;  %v7852_v50 = vld [vmem:[#allocation84_spill] sm:$0xff] }
0x18f8   :  { %v2621_v37 = vsel %vm7834_vm10, %v7819_v61, %v7833_v12  ;;  %vm7836_vm11 = vmmov %vm7827_vm6  ;;  %v2764_v60 = vadd.f32 %v2753_v59, %v2719_v34  ;;  %v7854_v34 = vld [vmem:[#allocation92_spill] sm:$0xff] }
0x18f9   :  { %v2709_v5 = vsel %vm7836_vm11, %v7821_v9, %v7835_v51  ;;  %vm7838_vm12 = vmmov %vm7827_vm6  ;;  %v2632_v16 = vadd.f32 %v2621_v37, %v2584_v7 }
0x18fa   :  { %v2710_v15 = vsel %vm7838_vm12, %v7835_v51, %v7837_v14  ;;  %vm7842_vm14 = vmmov %vm7827_vm6  ;;  %v7846_v51 = vld [vmem:[#allocation31_spill] sm:$0xff]  ;;  %v2720_v20 = vadd.f32 %v2709_v5, %v2675_v19  ;;  %v2812_v59 = vadd.f32 %v2801_v13, %v2764_v60 }
0x18fb   :  { %v2666_v61 = vsel %vm7842_vm14, %v7828_v44, %v7841_v23  ;;  %vm7843_vm5 = vmmov %vm7827_vm6  ;;  %v2721_v47 = vadd.f32 %v2710_v15, %v2676_v2  ;;  %v6508_v7 = vpop.permute.xlu1 %3026  ;;  %v7857_v19 = vld [vmem:[#allocation123_spill] sm:$0xff]  ;;  %v7859_v2 = vld [vmem:[#allocation64_spill] sm:$0xff] }
0x18fc   :  { %v2754_v9 = vsel %vm7843_vm5, %v7830_v21, %v6252_v62  ;;  %vm7845_vm6 = vmmov %vm7843_vm5  ;;  %v2677_v37 = vadd.f32 %v2666_v61, %v2632_v16  ;;  %7856 = vst [vmem:[#allocation136_spill] sm:$0xff] %v6508_v7  ;;  %v7861_v60 = vld [vmem:[#allocation87_spill] sm:$0xff] }
0x18fd   :  { %v2755_v0 = vsel %vm7845_vm6, %v6252_v62, %v7844_v4  ;;  %vm7847_vm8 = vmmov %vm7840_vm13  ;;  %v2765_v5 = vadd.f32 %v2754_v9, %v2720_v20  ;;  %v7866_v20 = vld [vmem:[#allocation129_spill] sm:$0xff] }
0x18fe   :  { %v2846_v12 = vsel %vm7847_vm8, %v6281_v54, %v7846_v51  ;;  %vm7849_vm9 = vmmov %vm7843_vm5  ;;  %v2766_v15 = vadd.f32 %v2755_v0, %v2721_v47  ;;  %v7868_v47 = vld [vmem:[#allocation131_spill] sm:$0xff] }
0x18ff   :  { %v2711_v44 = vsel %vm7849_vm9, %v7837_v14, %v7848_v18  ;;  %vm7851_vm10 = vmmov %vm7847_vm8  ;;  %v2857_v13 = vadd.f32 %v2846_v12, %v2812_v59  ;;  %v7863_v18 = vld [vmem:[#allocation34_spill] sm:$0xff]  ;;  %v7870_v59 = vld [vmem:[#allocation91_spill] sm:$0xff] }
0x1900   :  { %v2802_v21 = vsel %vm7851_vm10, %v7839_v39, %v7850_v42  ;;  %vm7853_vm11 = vmmov %vm7847_vm8  ;;  %v2722_v9 = vadd.f32 %v2711_v44, %v2677_v37 }
0x1901   :  { %v2803_v62 = vsel %vm7853_vm11, %v7850_v42, %v7852_v50  ;;  %vm7855_vm12 = vmmov %vm7847_vm8  ;;  %v2813_v12 = vadd.f32 %v2802_v21, %v2765_v5  ;;  %vm7873_vm11 = vcmask 883712   ;;  %v7874_v5 = vld [vmem:[#allocation130_spill] sm:$0xff] }
0x1902   :  { %v2891_v23 = vsel %vm7855_vm12, %v6292_v38, %v7854_v34  ;;  %vm7858_vm13 = vmmov %vm7843_vm5  ;;  %v2814_v0 = vadd.f32 %v2803_v62, %v2766_v15  ;;  %v7876_v15 = vld [vmem:[#allocation134_spill] sm:$0xff] }
0x1903   :  { %v2756_v14 = vsel %vm7858_vm13, %v7844_v4, %v7857_v19  ;;  %vm7860_vm14 = vmmov %vm7847_vm8  ;;  %v2902_v16 = vadd.f32 %v2891_v23, %v2857_v13  ;;  %v7872_v19 = vld [vmem:[#allocation104_spill] sm:$0xff] }
0x1904   :  { %v2847_v39 = vsel %vm7860_vm14, %v7846_v51, %v7859_v2  ;;  %vm7862_vm5 = vmmov %vm7847_vm8  ;;  %v2984_v3 = vsel %vm7873_vm11, %v6332_v46, %v7872_v19  ;;  %v2767_v44 = vadd.f32 %v2756_v14, %v2722_v9  ;;  %v7878_v13 = vld [vmem:[#allocation96_spill] sm:$0xff] }
0x1905   :  { %v2848_v42 = vsel %vm7862_vm5, %v7859_v2, %v7861_v60  ;;  %vm7865_vm6 = vmmov %vm7862_vm5  ;;  %v2858_v21 = vadd.f32 %v2847_v39, %v2813_v12 }
0x1906   :  { %v2936_v61 = vsel %vm7865_vm6, %v7864_v1, %v7863_v18  ;;  %vm7867_vm8 = vmmov %vm7862_vm5  ;;  %v2859_v62 = vadd.f32 %v2848_v42, %v2814_v0  ;;  %v7882_v0 = vld [vmem:[#allocation133_spill] sm:$0xff] }
0x1907   :  { %v2804_v4 = vsel %vm7867_vm8, %v7852_v50, %v7866_v20  ;;  %vm7869_vm9 = vmmov %vm7862_vm5  ;;  %v2947_v23 = vadd.f32 %v2936_v61, %v2902_v16  ;;  %v7880_v20 = vld [vmem:[#allocation58_spill] sm:$0xff]  ;;  %v7884_v16 = vld [vmem:[#allocation37_spill] sm:$0xff] }
0x1908   :  { %v2892_v51 = vsel %vm7869_vm9, %v7854_v34, %v7868_v47  ;;  %vm7871_vm10 = vmmov %vm7862_vm5  ;;  %v2815_v39 = vadd.f32 %v2804_v4, %v2767_v44  ;;  %v7889_v44 = vld [vmem:[#allocation59_spill] sm:$0xff] }
0x1909   :  { %v2893_v2 = vsel %vm7871_vm10, %v7868_v47, %v7870_v59  ;;  %vm7875_vm12 = vmmov %vm7862_vm5  ;;  %v2903_v42 = vadd.f32 %v2892_v51, %v2858_v21  ;;  %v2995_v9 = vadd.f32 %v2984_v3, %v2947_v23  ;;  %v7886_v3 = vld [vmem:[#allocation71_spill] sm:$0xff] }
0x190a   :  { %v2849_v50 = vsel %vm7875_vm12, %v7861_v60, %v7874_v5  ;;  %vm7877_vm13 = vmmov %vm7862_vm5  ;;  %v2904_v61 = vadd.f32 %v2893_v2, %v2859_v62  ;;  %v2894_v60 = vsel %vm7865_vm6, %v7870_v59, %v7882_v0 }
0x190b   :  { %v2937_v34 = vsel %vm7877_vm13, %v7863_v18, %v7876_v15  ;;  %vm7879_vm14 = vmmov %vm7862_vm5  ;;  %v2860_v5 = vadd.f32 %v2849_v50, %v2815_v39 }
0x190c   :  { %v2938_v47 = vsel %vm7879_vm14, %v7876_v15, %v7878_v13  ;;  %vm7881_vm5 = vmmov %vm7873_vm11  ;;  %v2948_v28 = vadd.f32 %v2937_v34, %v2903_v42 }
0x190d   :  { %v3029_v14 = vsel %vm7881_vm5, %v6432_v55, %v7880_v20  ;;  %vm7883_vm8 = vmmov %vm7881_vm5  ;;  %v2949_v24 = vadd.f32 %v2938_v47, %v2904_v61  ;;  %v2905_v21 = vadd.f32 %v2894_v60, %v2860_v5 }
0x190e   :  { %v2985_v18 = vsel %vm7883_vm8, %v7872_v19, %v6345_v57  ;;  %vm7885_vm9 = vmmov %vm7881_vm5  ;;  %v3040_v4 = vadd.f32 %v3029_v14, %v2995_v9 }
0x190f   :  { %v2986_v15 = vsel %vm7885_vm9, %v6345_v57, %v7884_v16  ;;  %vm7887_vm10 = vmmov %vm7865_vm6  ;;  %v2996_v62 = vadd.f32 %v2985_v18, %v2948_v28 }
0x1910   :  { %v2939_v2 = vsel %vm7887_vm10, %v7878_v13, %v7886_v3  ;;  %vm7888_vm11 = vmmov %vm7881_vm5  ;;  %v2997_v23 = vadd.f32 %v2986_v15, %v2949_v24 }
0x1911   :  { %v3030_v59 = vsel %vm7888_vm11, %v7880_v20, %v6470_v22  ;;  %vm7890_vm12 = vmmov %vm7881_vm5  ;;  %v2950_v13 = vadd.f32 %v2939_v2, %v2905_v21  ;;  %v7897_v2 = vld [vmem:[#allocation67_spill] sm:$0xff]  ;;  %v7898_v21 = vld [vmem:[#allocation25_spill] sm:$0xff] }
0x1912   :  { %v3031_v19 = vsel %vm7890_vm12, %v6470_v22, %v7889_v44  ;;  %vm7891_vm13 = vmmov %vm7881_vm5  ;;  %v3041_v47 = vadd.f32 %v3030_v59, %v2996_v62  ;;  %v3032_v22 = vsel %vm7881_vm5, %v7889_v44, %v6508_v7 }
0x1913   :  { %vm7892_vm14 = vmmov %vm7881_vm5  ;;  %v3042_v14 = vadd.f32 %v3031_v19, %v2997_v23  ;;  %v6593_v19 = vld [vmem:[%s7061_s5 + $0x18] sm:$0xf]  ;;  %v7899_v23 = vmov 1  }
0x1914   :  { %v2987_v34 = vsel %vm7892_vm14, %v7884_v16, %v6371_v8  ;;  %vm7893_vm6 = vmmov %vm7881_vm5  ;;  %vm7915_vm14 = vcmask 1039360   ;;  %v7916_v8 = vld [vmem:[#allocation85_spill] sm:$0xff] }
0x1915   :  { %vm7894_vm8 = vmmov %vm7881_vm5  ;;  %v2998_v28 = vadd.f32 %v2987_v34, %v2950_v13 }
0x1916   :  { %vm7896_vm9 = vmmov %vm7881_vm5 }
0x1917   :  { %v3043_v9 = vadd.f32 %v3032_v22, %v2998_v28  ;;  %vm7900_vm10 = vmmov %vm7881_vm5 }
0x1918   :  { %vm7901_vm11 = vmmov %vm7881_vm5 }
0x1919   :  { %vm7902_vm12 = vmmov %vm7881_vm5 }
0x1927   :  { %v6534_v37 = vpop.permute.xlu1 %3061  ;;  %v3066_v12 = vpop.permute.xlu0 %3065 }
0x192b   :  { %v6557_v51 = vpop.permute.xlu1 %3063  ;;  %v3070_v39 = vpop.permute.xlu0 %3069 }
0x192c   :  { %v3074_v57 = vsel %vm7891_vm13, %v6557_v51, %v3066_v12  ;;  %vm7904_vm13 = vmmov %vm7881_vm5 }
0x192d   :  { %v3085_v50 = vadd.f32 %v3074_v57, %v3040_v4  ;;  %vm7917_vm5 = vmmov %vm7915_vm14 }
0x192e   :  { %v2296_v3 = vsel %vm7917_vm5, %v7916_v8, %v6089_v40  ;;  %v7926_v8 = vld [vmem:[#allocation103_spill] sm:$0xff] }
0x192f   :  { %v3068_v20 = vpop.permute.xlu1 %3067 }
0x1930   :  { %v3075_v42 = vsel %vm7893_vm6, %v3066_v12, %v3068_v20  ;;  %v3076_v5 = vsel %vm7894_vm8, %v3068_v20, %v3070_v39  ;;  %vm7919_vm6 = vmmov %vm7917_vm5 }
0x1931   :  { %v3086_v24 = vadd.f32 %v3075_v42, %v3041_v47  ;;  %v3087_v61 = vadd.f32 %v3076_v5, %v3042_v14  ;;  %vm7921_vm8 = vmmov %vm7917_vm5 }
0x1933   :  { %v6578_v60 = vpop.permute.xlu1 %3071 }
0x1934   :  { %7895 = vst [vmem:[#allocation76_spill] sm:$0xff] %v6578_v60  ;;  %v3077_v18 = vsel %vm7896_vm9, %v3070_v39, %v6578_v60  ;;  %vm7923_vm9 = vcmask 1031168  }
0x1935   :  { %v3088_v16 = vadd.f32 %v3077_v18, %v3043_v9 }
0x193c   :  { %v3092_v15 = vpop.permute.xlu0 %3091 }
0x193d   :  { %v3096_v4 = vmul.f32 %v3092_v15, %v5867_v58  ;;  %v3094_v59 = vmul.f32 %v3092_v15, %v7897_v2  ;;  %v3098_v12 = vmul.f32 %v3092_v15, %v5881_v11  ;;  %v3095_v44 = vmul.f32 %v3092_v15, %v5884_v6 }
0x193e   :  { %v3097_v57 = vmul.f32 %v3092_v15, %v5893_v36  ;;  %v3099_v62 = vmul.f32 %v3092_v15, %v7898_v21 }
0x193f   :  { %3110 = vrot.lane.b32.xlu0 %v3096_v4, %s3894_s27  ;;  %3106 = vrot.lane.b32.xlu1 %v3094_v59, %s3894_s27 }
0x1943   :  { %3114 = vrot.lane.b32.xlu0 %v3098_v12, %s3894_s27  ;;  %3108 = vrot.lane.b32.xlu1 %v3095_v44, %s3894_s27  ;;  %v7906_v44 = vld [vmem:[#allocation44_spill] sm:$0xff] }
0x1947   :  { %3139 = vperm.xlu0 %3848, %v6593_v19   ;;  %3112 = vrot.lane.b32.xlu1 %v3097_v57, %s3894_s27 }
0x194b   :  { %3116 = vrot.lane.b32.xlu1 %v3099_v62, %s3894_s27  ;;  %3849 = vset.pattern.permute.xlu0 %v7899_v23 }
0x19b1   :  { %v6601_v34 = vpop.permute.xlu1 %3106  ;;  %v3111_v13 = vpop.permute.xlu0 %3110 }
0x19b5   :  { %v6603_v47 = vpop.permute.xlu1 %3108  ;;  %v3115_v20 = vpop.permute.xlu0 %3114 }
0x19b6   :  { %v3119_v14 = vsel %vm7900_vm10, %v6603_v47, %v3111_v13  ;;  %vm7925_vm10 = vmmov %vm7923_vm9 }
0x19b7   :  { %v6607_v39 = vadd.f32 %v3119_v14, %v3085_v50  ;;  %v7905_v50 = vld [vmem:[#allocation56_spill] sm:$0xff]  ;;  %v7909_v14 = vld [vmem:[#allocation57_spill] sm:$0xff] }
0x19b9   :  { %v3113_v22 = vpop.permute.xlu1 %3112 }
0x19ba   :  { %v3120_v42 = vsel %vm7901_vm11, %v3111_v13, %v3113_v22  ;;  %v3121_v5 = vsel %vm7902_vm12, %v3113_v22, %v3115_v20  ;;  %v7908_v13 = vld [vmem:[#allocation41_spill] sm:$0xff]  ;;  %v7910_v22 = vmov 2   ;;  %vm7927_vm11 = vmmov %vm7923_vm9 }
0x19bb   :  { %v6611_v28 = vadd.f32 %v3120_v42, %v3086_v24  ;;  %v6613_v9 = vadd.f32 %v3121_v5, %v3087_v61  ;;  %v7907_v61 = vld [vmem:[#allocation19_spill] sm:$0xff]  ;;  %v7911_v42 = vld [vmem:[#allocation69_spill] sm:$0xff]  ;;  %vm7929_vm12 = vmmov %vm7923_vm9 }
0x19bc   :  { %v1998_v5 = vmul.f32 %v7911_v42, %v7906_v44 }
0x19bd   :  { %v6615_v18 = vpop.permute.xlu1 %3116 }
0x19be   :  { %7903 = vst [vmem:[#allocation138_spill] sm:$0xff] %v6615_v18  ;;  %v3122_v15 = vsel %vm7904_vm13, %v3115_v20, %v6615_v18  ;;  %vm7931_vm13 = vcmask 900096  }
0x19bf   :  { %v6619_v4 = vadd.f32 %v3122_v15, %v3088_v16  ;;  %v7912_v15 = vld [vmem:[#allocation23_spill] sm:$0xff]  ;;  %vm7935_vm5 = vmmov %vm7931_vm13 }
0x19c6   :  { %v3140_v59 = vpop.permute.xlu0 %3139 }
0x19c7   :  { %v3144_v12 = vmul.f32 %v3140_v59, %v7905_v50  ;;  %v3142_v57 = vmul.f32 %v3140_v59, %v7906_v44  ;;  %v3146_v24 = vmul.f32 %v3140_v59, %v5748_v49  ;;  %v3143_v62 = vmul.f32 %v3140_v59, %v7907_v61 }
0x19c8   :  { %v3145_v16 = vmul.f32 %v3140_v59, %v7908_v13  ;;  %v3147_v20 = vmul.f32 %v3140_v59, %v7909_v14  ;;  %v7914_v59 = vld [vmem:[#allocation20_spill] sm:$0xff] }
0x19c9   :  { %3158 = vrot.lane.b32.xlu0 %v3144_v12, %s3895_s30  ;;  %3154 = vrot.lane.b32.xlu1 %v3142_v57, %s3895_s30  ;;  %v2068_v12 = vmul.f32 %v5704_v52, %v7912_v15 }
0x19cb   :  { %v2074_v57 = vadd.f32 %v2068_v12, %v1998_v5  ;;  %v7918_v5 = vld [vmem:[#allocation90_spill] sm:$0xff] }
0x19cc   :  { %v2341_v12 = vsel %vm7919_vm6, %v7918_v5, %v6114_v56  ;;  %v7932_v5 = vld [vmem:[#allocation116_spill] sm:$0xff]  ;;  %vm7937_vm6 = vmmov %vm7935_vm5 }
0x19cd   :  { %3162 = vrot.lane.b32.xlu0 %v3146_v24, %s3895_s30  ;;  %3156 = vrot.lane.b32.xlu1 %v3143_v62, %s3895_s30  ;;  %v7913_v24 = vld [vmem:[#allocation63_spill] sm:$0xff] }
0x19ce   :  { %v2138_v62 = vmul.f32 %v5807_v41, %v7913_v24 }
0x19d0   :  { %v2144_v18 = vadd.f32 %v2138_v62, %v2074_v57  ;;  %v7920_v57 = vld [vmem:[#allocation93_spill] sm:$0xff] }
0x19d1   :  { %3184 = vperm.xlu0 %3849, %v6593_v19   ;;  %3160 = vrot.lane.b32.xlu1 %v3145_v16, %s3895_s30  ;;  %v2208_v16 = vmul.f32 %v5708_v53, %v7897_v2  ;;  %v2386_v62 = vsel %vm7921_vm8, %v7920_v57, %v6144_v32  ;;  %v7934_v57 = vld [vmem:[#allocation119_spill] sm:$0xff]  ;;  %vm7939_vm8 = vcmask 891904  }
0x19d3   :  { %v2214_v60 = vadd.f32 %v2208_v16, %v2144_v18  ;;  %v7922_v18 = vld [vmem:[#allocation97_spill] sm:$0xff] }
0x19d4   :  { %v2434_v16 = vsel %vm7923_vm9, %v7922_v18, %v6170_v25  ;;  %v7936_v18 = vld [vmem:[#allocation122_spill] sm:$0xff]  ;;  %vm7941_vm9 = vmmov %vm7939_vm8 }
0x19d5   :  { %3164 = vrot.lane.b32.xlu1 %v3147_v20, %s3895_s30  ;;  %3850 = vset.pattern.permute.xlu0 %v7910_v22  ;;  %v2251_v20 = vsel %vm7915_vm14, %v7914_v59, %v6064_v43  ;;  %vm7933_vm14 = vmmov %vm7931_vm13 }
0x19d6   :  { %v2262_v7 = vadd.f32 %v2251_v20, %v2214_v60  ;;  %v7924_v60 = vld [vmem:[#allocation99_spill] sm:$0xff]  ;;  %v7930_v20 = vld [vmem:[#allocation42_spill] sm:$0xff] }
0x19d7   :  { %v2479_v59 = vsel %vm7925_vm10, %v7924_v60, %v6184_v17  ;;  %v2617_v25 = vsel %vm7931_vm13, %v7930_v20, %v7804_v31  ;;  %v2662_v17 = vsel %vm7933_vm14, %v7932_v5, %v7813_v48  ;;  %vm7943_vm10 = vmmov %vm7939_vm8 }
0x19d8   :  { %v2307_v0 = vadd.f32 %v2296_v3, %v2262_v7  ;;  %v2524_v7 = vsel %vm7927_vm11, %v7926_v8, %v6196_v33  ;;  %v7928_v3 = vld [vmem:[#allocation108_spill] sm:$0xff]  ;;  %v2707_v33 = vsel %vm7935_vm5, %v7934_v57, %v7822_v63  ;;  %v7942_v8 = vld [vmem:[#allocation65_spill] sm:$0xff]  ;;  %vm7945_vm11 = vmmov %vm7939_vm8 }
0x19d9   :  { %v2569_v32 = vsel %vm7929_vm12, %v7928_v3, %v6218_v26  ;;  %v2752_v26 = vsel %vm7937_vm6, %v7936_v18, %v7831_v30  ;;  %v2890_v63 = vsel %vm7943_vm10, %v7942_v8, %v6292_v38  ;;  %vm7947_vm12 = vcmask 883712  }
0x19da   :  { %v2352_v53 = vadd.f32 %v2341_v12, %v2307_v0  ;;  %vm7948_vm13 = vmmov %vm7947_vm12  ;;  %vm7951_vm6 = vcmask 752640  }
0x19db   :  { %vm7949_vm14 = vmmov %vm7947_vm12 }
0x19dc   :  { %v2397_v43 = vadd.f32 %v2386_v62, %v2352_v53  ;;  %v3073_v38 = vsel %vm7949_vm14, %v6534_v37, %v6557_v51  ;;  %vm7950_vm5 = vmmov %vm7947_vm12 }
0x19dd   :  { %vm7954_vm10 = vmmov %vm7951_vm6 }
0x19de   :  { %v2445_v40 = vadd.f32 %v2434_v16, %v2397_v43  ;;  %v7938_v43 = vld [vmem:[#allocation124_spill] sm:$0xff]  ;;  %vm7963_vm14 = vmmov %vm7951_vm6 }
0x19df   :  { %v2800_v31 = vsel %vm7939_vm8, %v7938_v43, %v6260_v10  ;;  %vm7952_vm8 = vmmov %vm7951_vm6 }
0x19e0   :  { %v2490_v56 = vadd.f32 %v2479_v59, %v2445_v40  ;;  %v7940_v59 = vld [vmem:[#allocation127_spill] sm:$0xff] }
0x19e1   :  { %v2845_v48 = vsel %vm7941_vm9, %v7940_v59, %v6281_v54  ;;  %v3028_v54 = vsel %vm7948_vm13, %v6394_v27, %v6432_v55  ;;  %vm7953_vm9 = vmmov %vm7951_vm6 }
0x19e2   :  { %v2535_v0 = vadd.f32 %v2524_v7, %v2490_v56  ;;  %v7944_v56 = vld [vmem:[#allocation132_spill] sm:$0xff]  ;;  %vm7962_vm13 = vmmov %vm7951_vm6 }
0x19e3   :  { %v2935_v30 = vsel %vm7945_vm11, %v7944_v56, %v7864_v1  ;;  %v3118_v1 = vsel %vm7950_vm5, %v6601_v34, %v6603_v47  ;;  %vm7955_vm11 = vmmov %vm7951_vm6 }
0x19e4   :  { %v2580_v53 = vadd.f32 %v2569_v32, %v2535_v0  ;;  %v7946_v32 = vld [vmem:[#allocation135_spill] sm:$0xff]  ;;  %vm7964_vm5 = vmmov %vm7951_vm6 }
0x19e5   :  { %v2983_v10 = vsel %vm7947_vm12, %v7946_v32, %v6332_v46  ;;  %vm7961_vm12 = vmmov %vm7951_vm6 }
0x19e6   :  { %v2628_v12 = vadd.f32 %v2617_v25, %v2580_v53 }
0x19e8   :  { %v2673_v62 = vadd.f32 %v2662_v17, %v2628_v12 }
0x19ea   :  { %v2718_v16 = vadd.f32 %v2707_v33, %v2673_v62 }
0x19ec   :  { %v2763_v60 = vadd.f32 %v2752_v26, %v2718_v16 }
0x19ee   :  { %v2811_v40 = vadd.f32 %v2800_v31, %v2763_v60  ;;  %v7956_v60 = vld [vmem:[#allocation60_spill] sm:$0xff] }
0x19f0   :  { %v2856_v7 = vadd.f32 %v2845_v48, %v2811_v40  ;;  %v7957_v48 = vld [vmem:[#allocation61_spill] sm:$0xff]  ;;  %v7958_v40 = vld [vmem:[#allocation22_spill] sm:$0xff] }
0x19f2   :  { %v2901_v3 = vadd.f32 %v2890_v63, %v2856_v7  ;;  %v7960_v7 = vmov 3  }
0x19f4   :  { %v2946_v0 = vadd.f32 %v2935_v30, %v2901_v3 }
0x19f6   :  { %v2994_v20 = vadd.f32 %v2983_v10, %v2946_v0 }
0x19f8   :  { %v3039_v25 = vadd.f32 %v3028_v54, %v2994_v20 }
0x19fa   :  { %v3084_v5 = vadd.f32 %v3073_v38, %v3039_v25 }
0x19fc   :  { %v3129_v12 = vadd.f32 %v3118_v1, %v3084_v5 }
0x1a3b   :  { %v3155_v53 = vpop.permute.xlu1 %3154  ;;  %v3159_v17 = vpop.permute.xlu0 %3158 }
0x1a3f   :  { %v3157_v46 = vpop.permute.xlu1 %3156  ;;  %v3163_v62 = vpop.permute.xlu0 %3162 }
0x1a40   :  { %v3166_v57 = vsel %vm7951_vm6, %v3155_v53, %v3157_v46  ;;  %v3167_v33 = vsel %vm7952_vm8, %v3157_v46, %v3159_v17  ;;  %vm7965_vm6 = vmmov %vm7964_vm5 }
0x1a41   :  { %v3177_v27 = vadd.f32 %v3166_v57, %v3129_v12  ;;  %v3178_v55 = vadd.f32 %v3167_v33, %v6607_v39  ;;  %vm7970_vm8 = vmmov %vm7964_vm5 }
0x1a43   :  { %v3161_v18 = vpop.permute.xlu1 %3160 }
0x1a44   :  { %v3168_v37 = vsel %vm7953_vm9, %v3159_v17, %v3161_v18  ;;  %v3169_v51 = vsel %vm7954_vm10, %v3161_v18, %v3163_v62  ;;  %vm7971_vm9 = vmmov %vm7964_vm5 }
0x1a45   :  { %v3179_v26 = vadd.f32 %v3168_v37, %v6611_v28  ;;  %v3180_v34 = vadd.f32 %v3169_v51, %v6613_v9  ;;  %v3777_v37 = vld [vmem:[%s7061_s5 + $0x1c] sm:$0xf]  ;;  %v7967_v51 = vld [vmem:[#allocation66_spill] sm:$0xff]  ;;  %vm7972_vm10 = vmmov %vm7964_vm5 }
0x1a47   :  { %v6710_v47 = vpop.permute.xlu1 %3164 }
0x1a48   :  { %v3170_v16 = vsel %vm7955_vm11, %v3163_v62, %v6710_v47  ;;  %v7966_v62 = vld [vmem:[#allocation24_spill] sm:$0xff]  ;;  %vm7973_vm11 = vmmov %vm7964_vm5 }
0x1a49   :  { %v3181_v43 = vadd.f32 %v3170_v16, %v6619_v4  ;;  %v7959_v4 = vld [vmem:[#allocation62_spill] sm:$0xff]  ;;  %v7968_v16 = vmov 0  }
0x1a50   :  { %v3185_v31 = vpop.permute.xlu0 %3184 }
0x1a51   :  { %v3189_v39 = vmul.f32 %v3185_v31, %v7956_v60  ;;  %v3187_v59 = vmul.f32 %v3185_v31, %v7912_v15  ;;  %v3191_v28 = vmul.f32 %v3185_v31, %v5785_v29  ;;  %v3188_v9 = vmul.f32 %v3185_v31, %v7957_v48 }
0x1a52   :  { %v3190_v8 = vmul.f32 %v3185_v31, %v7958_v40  ;;  %v3192_v63 = vmul.f32 %v3185_v31, %v7959_v4 }
0x1a53   :  { %3203 = vrot.lane.b32.xlu0 %v3189_v39, %s3895_s30  ;;  %3199 = vrot.lane.b32.xlu1 %v3187_v59, %s3895_s30 }
0x1a57   :  { %3207 = vrot.lane.b32.xlu0 %v3191_v28, %s3895_s30  ;;  %3201 = vrot.lane.b32.xlu1 %v3188_v9, %s3895_s30 }
0x1a5b   :  { %3229 = vperm.xlu0 %3850, %v6593_v19   ;;  %3205 = vrot.lane.b32.xlu1 %v3190_v8, %s3895_s30 }
0x1a5f   :  { %3209 = vrot.lane.b32.xlu1 %v3192_v63, %s3895_s30  ;;  %3854 = vset.pattern.permute.xlu0 %v7960_v7 }
0x1ac5   :  { %v3200_v56 = vpop.permute.xlu1 %3199  ;;  %v3204_v30 = vpop.permute.xlu0 %3203 }
0x1ac9   :  { %v3202_v3 = vpop.permute.xlu1 %3201  ;;  %v3208_v20 = vpop.permute.xlu0 %3207 }
0x1aca   :  { %v3211_v32 = vsel %vm7961_vm12, %v3200_v56, %v3202_v3  ;;  %v3212_v10 = vsel %vm7962_vm13, %v3202_v3, %v3204_v30  ;;  %vm7974_vm12 = vmmov %vm7964_vm5 }
0x1acb   :  { %v3222_v0 = vadd.f32 %v3211_v32, %v3177_v27  ;;  %v3223_v54 = vadd.f32 %v3212_v10, %v3178_v55  ;;  %vm7991_vm13 = vmmov %vm7964_vm5 }
0x1acd   :  { %v3206_v38 = vpop.permute.xlu1 %3205 }
0x1ace   :  { %v3213_v25 = vsel %vm7963_vm14, %v3204_v30, %v3206_v38  ;;  %v3214_v53 = vsel %vm7964_vm5, %v3206_v38, %v3208_v20  ;;  %vm7994_vm14 = vmmov %vm7964_vm5 }
0x1acf   :  { %v3224_v1 = vadd.f32 %v3213_v25, %v3179_v26  ;;  %v3225_v5 = vadd.f32 %v3214_v53, %v3180_v34  ;;  %v3778_v34 = vld [vmem:[%s7061_s5 + $0x20] sm:$0xf] }
0x1ad1   :  { %v6733_v17 = vpop.permute.xlu1 %3209 }
0x1ad2   :  { %v3215_v12 = vsel %vm7965_vm6, %v3208_v20, %v6733_v17  ;;  %vm7997_vm6 = vmmov %vm7964_vm5 }
0x1ad3   :  { %v6737_v46 = vadd.f32 %v3215_v12, %v3181_v43 }
0x1ada   :  { %v3230_v57 = vpop.permute.xlu0 %3229 }
0x1adb   :  { %v3234_v33 = vmul.f32 %v3230_v57, %v5825_v35  ;;  %v3232_v27 = vmul.f32 %v3230_v57, %v7913_v24  ;;  %v3236_v55 = vmul.f32 %v3230_v57, %v5835_v45  ;;  %v3233_v18 = vmul.f32 %v3230_v57, %v7966_v62 }
0x1adc   :  { %v3235_v26 = vmul.f32 %v3230_v57, %v7967_v51 }
0x1add   :  { %3248 = vrot.lane.b32.xlu0 %v3234_v33, %s3895_s30  ;;  %3244 = vrot.lane.b32.xlu1 %v3232_v27, %s3895_s30 }
0x1ae1   :  { %3252 = vrot.lane.b32.xlu0 %v3236_v55, %s3895_s30  ;;  %3246 = vrot.lane.b32.xlu1 %v3233_v18, %s3895_s30 }
0x1ae5   :  { %3457 = vperm.xlu0 %3854, %v3777_v37   ;;  %3250 = vrot.lane.b32.xlu1 %v3235_v26, %s3895_s30 }
0x1ae9   :  { %3857 = vset.pattern.permute.xlu0 %v7910_v22  ;;  %3274 = vperm.xlu1 %3851, %v6593_v19   ;;  %v7969_v19 = vld [vmem:[#allocation68_spill] sm:$0xff] }
0x1aea   :  { %3595 = vperm.xlu0 %3857, %v3778_v34   ;;  %v3237_v43 = vmul.f32 %v3230_v57, %v7969_v19 }
0x1aed   :  { %3852 = vset.pattern.permute.xlu1 %v7899_v23 }
0x1aee   :  { %3858 = vset.pattern.permute.xlu0 %v7968_v16  ;;  %3367 = vperm.xlu1 %3852, %v3777_v37  }
0x1aef   :  { %3322 = vperm.xlu0 %3858, %v3777_v37  }
0x1af2   :  { %3853 = vset.pattern.permute.xlu1 %v7910_v22 }
0x1af3   :  { %3412 = vperm.xlu1 %3853, %v3777_v37  }
0x1af7   :  { %3855 = vset.pattern.permute.xlu1 %v7968_v16 }
0x1af8   :  { %3505 = vperm.xlu1 %3855, %v3778_v34  }
0x1afc   :  { %3856 = vset.pattern.permute.xlu1 %v7899_v23 }
0x1afd   :  { %3550 = vperm.xlu1 %3856, %v3778_v34  }
0x1b01   :  { %3859 = vset.pattern.permute.xlu1 %v7960_v7 }
0x1b02   :  { %3640 = vperm.xlu1 %3859, %v3778_v34  }
0x1b06   :  { %3254 = vrot.lane.b32.xlu1 %v3237_v43, %s3895_s30 }
0x1b4f   :  { %v3245_v31 = vpop.permute.xlu1 %3244  ;;  %v3249_v39 = vpop.permute.xlu0 %3248 }
0x1b53   :  { %v3247_v59 = vpop.permute.xlu1 %3246  ;;  %v3253_v23 = vpop.permute.xlu0 %3252 }
0x1b54   :  { %v3256_v28 = vsel %vm7970_vm8, %v3245_v31, %v3247_v59  ;;  %v3257_v22 = vsel %vm7971_vm9, %v3247_v59, %v3249_v39  ;;  %vm7998_vm8 = vmmov %vm7964_vm5  ;;  %vm8000_vm9 = vcmask 744448  }
0x1b55   :  { %v6767_v9 = vadd.f32 %v3256_v28, %v3222_v0  ;;  %v6769_v8 = vadd.f32 %v3257_v22, %v3223_v54 }
0x1b57   :  { %v3251_v63 = vpop.permute.xlu1 %3250 }
0x1b58   :  { %v3258_v7 = vsel %vm7972_vm10, %v3249_v39, %v3251_v63  ;;  %v3259_v56 = vsel %vm7973_vm11, %v3251_v63, %v3253_v23  ;;  %vm8001_vm10 = vmmov %vm8000_vm9 }
0x1b59   :  { %v6773_v30 = vadd.f32 %v3258_v7, %v3224_v1  ;;  %v6775_v3 = vadd.f32 %v3259_v56, %v3225_v5  ;;  %vm8002_vm11 = vmmov %vm8000_vm9 }
0x1b64   :  { %v6777_v32 = vpop.permute.xlu0 %3457 }
0x1b68   :  { %v3275_v10 = vpop.permute.xlu1 %3274 }
0x1b69   :  { %v3278_v20 = vmul.f32 %v3275_v10, %v5884_v6  ;;  %v3277_v0 = vmul.f32 %v3275_v10, %v7897_v2  ;;  %v6783_v54 = vpop.permute.xlu0 %3595  ;;  %v3280_v25 = vmul.f32 %v3275_v10, %v5893_v36  ;;  %v3279_v53 = vmul.f32 %v3275_v10, %v5867_v58 }
0x1b6a   :  { %v3282_v1 = vmul.f32 %v3275_v10, %v7898_v21  ;;  %v3281_v5 = vmul.f32 %v3275_v10, %v5881_v11 }
0x1b6b   :  { %3291 = vrot.lane.b32.xlu1 %v3278_v20, %s3895_s30  ;;  %3289 = vrot.lane.b32.xlu0 %v3277_v0, %s3895_s30 }
0x1b6d   :  { %v3368_v38 = vpop.permute.xlu1 %3367 }
0x1b6e   :  { %v3323_v12 = vpop.permute.xlu0 %3322  ;;  %v3371_v31 = vmul.f32 %v3368_v38, %v7957_v48  ;;  %v3370_v39 = vmul.f32 %v3368_v38, %v7912_v15  ;;  %v3373_v28 = vmul.f32 %v3368_v38, %v7958_v40  ;;  %v3372_v22 = vmul.f32 %v3368_v38, %v7956_v60 }
0x1b6f   :  { %3295 = vrot.lane.b32.xlu1 %v3280_v25, %s3895_s30  ;;  %3293 = vrot.lane.b32.xlu0 %v3279_v53, %s3895_s30  ;;  %v3326_v33 = vmul.f32 %v3323_v12, %v7907_v61  ;;  %v3325_v27 = vmul.f32 %v3323_v12, %v7906_v44  ;;  %v3328_v18 = vmul.f32 %v3323_v12, %v7908_v13 }
0x1b70   :  { %v3327_v37 = vmul.f32 %v3323_v12, %v7905_v50  ;;  %v3330_v34 = vmul.f32 %v3323_v12, %v7909_v14  ;;  %v3329_v16 = vmul.f32 %v3323_v12, %v5748_v49  ;;  %v3375_v56 = vmul.f32 %v3368_v38, %v7959_v4 }
0x1b71   :  { %v3374_v10 = vmul.f32 %v3368_v38, %v5785_v29  ;;  %v3461_v53 = vmul.f32 %v6777_v32, %v5884_v6  ;;  %v3462_v12 = vmul.f32 %v6777_v32, %v5867_v58 }
0x1b72   :  { %v3413_v57 = vpop.permute.xlu1 %3412 }
0x1b73   :  { %3299 = vrot.lane.b32.xlu1 %v3282_v1, %s3895_s30  ;;  %3297 = vrot.lane.b32.xlu0 %v3281_v5, %s3895_s30  ;;  %v3416_v20 = vmul.f32 %v3413_v57, %v7966_v62  ;;  %v3415_v0 = vmul.f32 %v3413_v57, %v7913_v24  ;;  %v3420_v38 = vmul.f32 %v3413_v57, %v7969_v19 }
0x1b74   :  { %v3419_v25 = vmul.f32 %v3413_v57, %v5835_v45  ;;  %v3460_v1 = vmul.f32 %v6777_v32, %v7897_v2  ;;  %v3463_v5 = vmul.f32 %v6777_v32, %v5893_v36 }
0x1b77   :  { %3339 = vrot.lane.b32.xlu1 %v3326_v33, %s3896_s12  ;;  %3337 = vrot.lane.b32.xlu0 %v3325_v27, %s3896_s12  ;;  %v3506_v55 = vpop.permute.xlu1 %3505  ;;  %v3464_v33 = vmul.f32 %v6777_v32, %v5881_v11 }
0x1b78   :  { %v3509_v27 = vmul.f32 %v3506_v55, %v7907_v61  ;;  %v2003_v61 = vmul.f32 %v7911_v42, %v7909_v14 }
0x1b7b   :  { %3343 = vrot.lane.b32.xlu1 %v3328_v18, %s3896_s12  ;;  %3341 = vrot.lane.b32.xlu0 %v3327_v37, %s3896_s12  ;;  %v3508_v18 = vmul.f32 %v3506_v55, %v7906_v44  ;;  %v3511_v37 = vmul.f32 %v3506_v55, %v7908_v13  ;;  %v2073_v44 = vmul.f32 %v5704_v52, %v7959_v4 }
0x1b7c   :  { %v6801_v26 = vpop.permute.xlu1 %3550 }
0x1b7d   :  { %v3553_v13 = vmul.f32 %v6801_v26, %v7912_v15  ;;  %v3555_v52 = vmul.f32 %v6801_v26, %v7956_v60  ;;  %v7975_v15 = vld [vmem:[#allocation55_spill] sm:$0xff]  ;;  %v3684_v60 = vld [vmem:[%s7062_s6] sm:$0xf] }
0x1b7f   :  { %3347 = vrot.lane.b32.xlu1 %v3330_v34, %s3896_s12  ;;  %3345 = vrot.lane.b32.xlu0 %v3329_v16, %s3896_s12  ;;  %v3510_v34 = vmul.f32 %v3506_v55, %v7905_v50  ;;  %v3512_v16 = vmul.f32 %v3506_v55, %v5748_v49  ;;  %v3554_v50 = vmul.f32 %v6801_v26, %v7957_v48 }
0x1b80   :  { %v2143_v49 = vmul.f32 %v5807_v41, %v7969_v19  ;;  %v2213_v48 = vmul.f32 %v7975_v15, %v7898_v21  ;;  %v3557_v41 = vmul.f32 %v6801_v26, %v5785_v29  ;;  %v3599_v29 = vmul.f32 %v6783_v54, %v7966_v62  ;;  %v7979_v62 = vld [vmem:[#allocation98_spill] sm:$0xff] }
0x1b81   :  { %v6807_v43 = vpop.permute.xlu1 %3640 }
0x1b83   :  { %3384 = vrot.lane.b32.xlu1 %v3371_v31, %s3896_s12  ;;  %3382 = vrot.lane.b32.xlu0 %v3370_v39, %s3896_s12  ;;  %v2079_v31 = vadd.f32 %v2073_v44, %v2003_v61  ;;  %v7989_v61 = vld [vmem:[#allocation130_spill] sm:$0xff] }
0x1b85   :  { %v6813_v59 = vpop.permute.xlu1 %3254  ;;  %v2149_v42 = vadd.f32 %v2143_v49, %v2079_v31  ;;  %v7990_v31 = vld [vmem:[#allocation133_spill] sm:$0xff] }
0x1b86   :  { %v3260_v63 = vsel %vm7974_vm12, %v3253_v23, %v6813_v59  ;;  %v3417_v23 = vmul.f32 %v3413_v57, %v5825_v35  ;;  %vm8003_vm12 = vmmov %vm8000_vm9 }
0x1b87   :  { %v6820_v7 = vadd.f32 %v3260_v63, %v6737_v46  ;;  %3388 = vrot.lane.b32.xlu1 %v3373_v28, %s3896_s12  ;;  %3386 = vrot.lane.b32.xlu0 %v3372_v22, %s3896_s12  ;;  %v3418_v46 = vmul.f32 %v3413_v57, %v7967_v51  ;;  %v3465_v57 = vmul.f32 %v6777_v32, %v7898_v21  ;;  %v7976_v28 = vld [vmem:[#allocation86_spill] sm:$0xff] }
0x1b88   :  { %v3513_v32 = vmul.f32 %v3506_v55, %v7909_v14  ;;  %v3556_v14 = vmul.f32 %v6801_v26, %v7958_v40  ;;  %v3558_v55 = vmul.f32 %v6801_v26, %v7959_v4  ;;  %v2219_v39 = vadd.f32 %v2213_v48, %v2149_v42  ;;  %v7977_v26 = vld [vmem:[#allocation32_spill] sm:$0xff]  ;;  %v7993_v48 = vld [vmem:[#allocation137_spill] sm:$0xff] }
0x1b89   :  { %v3598_v40 = vmul.f32 %v6783_v54, %v7913_v24  ;;  %v3600_v4 = vmul.f32 %v6783_v54, %v5825_v35  ;;  %v3601_v24 = vmul.f32 %v6783_v54, %v7967_v51 }
0x1b8a   :  { %v2267_v22 = vadd.f32 %v7976_v28, %v2219_v39  ;;  %v7995_v28 = vld [vmem:[#allocation136_spill] sm:$0xff] }
0x1b8b   :  { %3392 = vrot.lane.b32.xlu1 %v3375_v56, %s3896_s12  ;;  %3390 = vrot.lane.b32.xlu0 %v3374_v10, %s3896_s12  ;;  %v3602_v56 = vmul.f32 %v6783_v54, %v5835_v45  ;;  %v7978_v10 = vld [vmem:[#allocation33_spill] sm:$0xff]  ;;  %v7981_v45 = vld [vmem:[#allocation102_spill] sm:$0xff] }
0x1b8c   :  { %v2312_v63 = vadd.f32 %v7977_v26, %v2267_v22  ;;  %v7996_v26 = vld [vmem:[#allocation76_spill] sm:$0xff] }
0x1b8f   :  { %3429 = vrot.lane.b32.xlu1 %v3416_v20, %s3896_s12  ;;  %3427 = vrot.lane.b32.xlu0 %v3415_v0, %s3896_s12  ;;  %v2357_v20 = vadd.f32 %v7978_v10, %v2312_v63  ;;  %v3603_v0 = vmul.f32 %v6783_v54, %v7969_v19  ;;  %v3646_v54 = vmul.f32 %v6807_v43, %v5893_v36 }
0x1b91   :  { %v2402_v35 = vadd.f32 %v7979_v62, %v2357_v20  ;;  %v7999_v20 = vld [vmem:[#allocation138_spill] sm:$0xff] }
0x1b93   :  { %3433 = vrot.lane.b32.xlu1 %v3418_v46, %s3896_s12  ;;  %3431 = vrot.lane.b32.xlu0 %v3417_v23, %s3896_s12  ;;  %v3643_v46 = vmul.f32 %v6807_v43, %v7897_v2  ;;  %v7980_v23 = vld [vmem:[#allocation35_spill] sm:$0xff]  ;;  %v7983_v2 = vld [vmem:[#allocation109_spill] sm:$0xff] }
0x1b97   :  { %3437 = vrot.lane.b32.xlu1 %v3420_v38, %s3896_s12  ;;  %3435 = vrot.lane.b32.xlu0 %v3419_v25, %s3896_s12  ;;  %v2450_v38 = vadd.f32 %v7980_v23, %v2402_v35  ;;  %v3644_v25 = vmul.f32 %v6807_v43, %v5884_v6 }
0x1b99   :  { %v2495_v51 = vadd.f32 %v7981_v45, %v2450_v38 }
0x1b9b   :  { %3474 = vrot.lane.b32.xlu1 %v3461_v53, %s3896_s12  ;;  %3472 = vrot.lane.b32.xlu0 %v3460_v1, %s3896_s12  ;;  %v3645_v53 = vmul.f32 %v6807_v43, %v5867_v58  ;;  %v7982_v1 = vld [vmem:[#allocation38_spill] sm:$0xff]  ;;  %v7985_v58 = vld [vmem:[#allocation47_spill] sm:$0xff] }
0x1b9f   :  { %3478 = vrot.lane.b32.xlu1 %v3463_v5, %s3896_s12  ;;  %3476 = vrot.lane.b32.xlu0 %v3462_v12, %s3896_s12  ;;  %v2540_v5 = vadd.f32 %v7982_v1, %v2495_v51  ;;  %v3647_v12 = vmul.f32 %v6807_v43, %v5881_v11  ;;  %v7987_v11 = vld [vmem:[#allocation123_spill] sm:$0xff] }
0x1ba1   :  { %v2585_v19 = vadd.f32 %v7983_v2, %v2540_v5 }
0x1ba3   :  { %3482 = vrot.lane.b32.xlu1 %v3465_v57, %s3896_s12  ;;  %3480 = vrot.lane.b32.xlu0 %v3464_v33, %s3896_s12  ;;  %v7984_v57 = vld [vmem:[#allocation114_spill] sm:$0xff] }
0x1ba4   :  { %v2633_v33 = vadd.f32 %v7984_v57, %v2585_v19 }
0x1ba6   :  { %v2678_v6 = vadd.f32 %v7985_v58, %v2633_v33 }
0x1ba7   :  { %3522 = vrot.lane.b32.xlu1 %v3509_v27, %s3897_s2  ;;  %3520 = vrot.lane.b32.xlu0 %v3508_v18, %s3897_s2  ;;  %v3708_v27 = vld [vmem:[%s7063_s7] sm:$0xf]  ;;  %v3648_v18 = vmul.f32 %v6807_v43, %v7898_v21  ;;  %v7992_v21 = vld [vmem:[#allocation71_spill] sm:$0xff]  ;;  %s3898_s7 = smov [#allocation3]  }
0x1bab   :  { %3526 = vrot.lane.b32.xlu1 %v3511_v37, %s3897_s2  ;;  %3524 = vrot.lane.b32.xlu0 %v3510_v34, %s3897_s2  ;;  %v7986_v37 = vld [vmem:[#allocation52_spill] sm:$0xff] }
0x1bac   :  { %v2723_v36 = vadd.f32 %v7986_v37, %v2678_v6 }
0x1bae   :  { %v2768_v34 = vadd.f32 %v7987_v11, %v2723_v36 }
0x1baf   :  { %3530 = vrot.lane.b32.xlu1 %v3513_v32, %s3897_s2  ;;  %3528 = vrot.lane.b32.xlu0 %v3512_v16, %s3897_s2  ;;  %v7988_v32 = vld [vmem:[#allocation129_spill] sm:$0xff] }
0x1bb0   :  { %v2816_v16 = vadd.f32 %v7988_v32, %v2768_v34 }
0x1bb2   :  { %v2861_v44 = vadd.f32 %v7989_v61, %v2816_v16 }
0x1bb3   :  { %3567 = vrot.lane.b32.xlu1 %v3554_v50, %s3897_s2  ;;  %3565 = vrot.lane.b32.xlu0 %v3553_v13, %s3897_s2 }
0x1bb4   :  { %v2906_v49 = vadd.f32 %v7990_v31, %v2861_v44 }
0x1bb6   :  { %v2951_v43 = vadd.f32 %v7992_v21, %v2906_v49 }
0x1bb7   :  { %3571 = vrot.lane.b32.xlu1 %v3556_v14, %s3897_s2  ;;  %3569 = vrot.lane.b32.xlu0 %v3555_v52, %s3897_s2 }
0x1bbb   :  { %3575 = vrot.lane.b32.xlu1 %v3558_v55, %s3897_s2  ;;  %3573 = vrot.lane.b32.xlu0 %v3557_v41, %s3897_s2  ;;  %v2999_v55 = vadd.f32 %v7993_v48, %v2951_v43 }
0x1bbd   :  { %v3044_v22 = vadd.f32 %v7995_v28, %v2999_v55 }
0x1bbf   :  { %3610 = vrot.lane.b32.xlu1 %v3598_v40, %s3897_s2  ;;  %3687 = vperm.xlu0 %3858, %v3684_v60  }
0x1bc3   :  { %3612 = vrot.lane.b32.xlu1 %v3599_v29, %s3897_s2  ;;  %3614 = vrot.lane.b32.xlu0 %v3600_v4, %s3897_s2 }
0x1bc7   :  { %3616 = vrot.lane.b32.xlu1 %v3601_v24, %s3897_s2  ;;  %3618 = vrot.lane.b32.xlu0 %v3602_v56, %s3897_s2 }
0x1bcb   :  { %3620 = vrot.lane.b32.xlu1 %v3603_v0, %s3897_s2  ;;  %3655 = vrot.lane.b32.xlu0 %v3643_v46, %s3897_s2 }
0x1bcf   :  { %3657 = vrot.lane.b32.xlu1 %v3644_v25, %s3897_s2  ;;  %3659 = vrot.lane.b32.xlu0 %v3645_v53, %s3897_s2 }
0x1bd3   :  { %3661 = vrot.lane.b32.xlu1 %v3646_v54, %s3897_s2  ;;  %3663 = vrot.lane.b32.xlu0 %v3647_v12, %s3897_s2 }
0x1bd7   :  { %3665 = vrot.lane.b32.xlu1 %v3648_v18, %s3897_s2  ;;  %3711 = vperm.xlu0 %3858, %v3708_v27   ;;  %s3755_s2 = sshll.u32 %s3898_s7, 4  ;;  %s3756_s2 = int_to_ptr.vmem [resolvable:$true] %s3755_s2 }
0x1bd8   :  { %s3860_s14 = scalar_lea.vmem %s3756_s2, 384  ;;  %p3865_p1 = scmp.lt.s32.totalorder %s3756_s2, %s3756_s2 }
0x1bd9   :  { %p3861_p0 = scmp.ne.s32.totalorder %s3756_s2, %s3860_s14  ;;  %p3866_p2 = scmp.lt.s32.totalorder %s3860_s14, %s3860_s14 }
0x1bdb   :  { %p3867_p3 = por %p3866_p2, %p3865_p1 }
0x1bdd   :  { %v3290_v50 = vpop.permute.xlu0 %3289  ;;  %v3292_v13 = vpop.permute.xlu1 %3291  ;;  %p3868_p4 = pnand %p3867_p3, %p3861_p0 }
0x1bde   :  { %v3301_v14 = vsel %vm7991_vm13, %v3290_v50, %v3292_v13  ;;  %vm8004_vm13 = vmmov %vm8000_vm9 }
0x1bdf   :  { %v3312_v52 = vadd.f32 %v3301_v14, %v6767_v9  ;;  %v3089_v9 = vadd.f32 %v7996_v26, %v3044_v22 }
0x1be1   :  { %v3294_v42 = vpop.permute.xlu0 %3293  ;;  %v3296_v15 = vpop.permute.xlu1 %3295  ;;  %v3134_v62 = vadd.f32 %v7999_v20, %v3089_v9 }
0x1be2   :  { %v3302_v41 = vsel %vm7994_vm14, %v3292_v13, %v3294_v42  ;;  %v3303_v39 = vsel %vm7964_vm5, %v3294_v42, %v3296_v15  ;;  %vm8005_vm14 = vmmov %vm8000_vm9 }
0x1be3   :  { %v3313_v60 = vadd.f32 %v3302_v41, %v6769_v8  ;;  %v3314_v40 = vadd.f32 %v3303_v39, %v6773_v30  ;;  %v3182_v30 = vadd.f32 %v6710_v47, %v3134_v62  ;;  %vm8006_vm5 = vmmov %vm8000_vm9 }
0x1be5   :  { %v3298_v29 = vpop.permute.xlu0 %3297  ;;  %v3300_v4 = vpop.permute.xlu1 %3299  ;;  %v3227_v23 = vadd.f32 %v6733_v17, %v3182_v30 }
0x1be6   :  { %v3304_v63 = vsel %vm7997_vm6, %v3296_v15, %v3298_v29  ;;  %v3305_v24 = vsel %vm7998_vm8, %v3298_v29, %v3300_v4  ;;  %vm8007_vm6 = vmmov %vm8006_vm5 }
0x1be7   :  { %v3315_v56 = vadd.f32 %v3304_v63, %v6775_v3  ;;  %v3316_v10 = vadd.f32 %v3305_v24, %v6820_v7  ;;  %v3272_v51 = vadd.f32 %v6813_v59, %v3227_v23  ;;  %vm8008_vm8 = vmmov %vm8006_vm5 }
0x1be9   :  { %v3338_v35 = vpop.permute.xlu0 %3337  ;;  %v3340_v8 = vpop.permute.xlu1 %3339  ;;  %v3317_v1 = vadd.f32 %v3300_v4, %v3272_v51 }
0x1bea   :  { %v3349_v0 = vsel %vm8000_vm9, %v3338_v35, %v3340_v8  ;;  %vm8009_vm9 = vmmov %vm8006_vm5 }
0x1beb   :  { %v3360_v46 = vadd.f32 %v3349_v0, %v3312_v52 }
0x1bed   :  { %v3342_v38 = vpop.permute.xlu0 %3341  ;;  %v3344_v45 = vpop.permute.xlu1 %3343 }
0x1bee   :  { %v3350_v25 = vsel %vm8001_vm10, %v3340_v8, %v3342_v38  ;;  %v3351_v3 = vsel %vm8002_vm11, %v3342_v38, %v3344_v45  ;;  %vm8010_vm10 = vmmov %vm8006_vm5 }
0x1bef   :  { %v3361_v7 = vadd.f32 %v3350_v25, %v3313_v60  ;;  %v3362_v53 = vadd.f32 %v3351_v3, %v3314_v40  ;;  %vm8011_vm11 = vmmov %vm8006_vm5 }
0x1bf1   :  { %v3346_v5 = vpop.permute.xlu0 %3345  ;;  %v3348_v2 = vpop.permute.xlu1 %3347 }
0x1bf2   :  { %v3352_v47 = vsel %vm8003_vm12, %v3344_v45, %v3346_v5  ;;  %v3353_v19 = vsel %vm8004_vm13, %v3346_v5, %v3348_v2  ;;  %v3365_v54 = vadd.f32 %v3348_v2, %v3317_v1  ;;  %vm8012_vm12 = vmmov %vm8006_vm5 }
0x1bf3   :  { %v3363_v12 = vadd.f32 %v3352_v47, %v3315_v56  ;;  %v3364_v17 = vadd.f32 %v3353_v19, %v3316_v10  ;;  %vm8013_vm13 = vmmov %vm8006_vm5 }
0x1bf5   :  { %v3383_v57 = vpop.permute.xlu0 %3382  ;;  %v3385_v33 = vpop.permute.xlu1 %3384 }
0x1bf6   :  { %v3394_v59 = vsel %vm8005_vm14, %v3383_v57, %v3385_v33  ;;  %vm8014_vm14 = vmmov %vm8006_vm5 }
0x1bf7   :  { %v3405_v58 = vadd.f32 %v3394_v59, %v3360_v46 }
0x1bf9   :  { %v3387_v6 = vpop.permute.xlu0 %3386  ;;  %v3389_v27 = vpop.permute.xlu1 %3388 }
0x1bfa   :  { %v3395_v18 = vsel %vm8006_vm5, %v3385_v33, %v3387_v6  ;;  %v3396_v37 = vsel %vm8007_vm6, %v3387_v6, %v3389_v27  ;;  %vm8015_vm6 = vmmov %vm8006_vm5 }
0x1bfb   :  { %v3406_v36 = vadd.f32 %v3395_v18, %v3361_v7  ;;  %v3407_v11 = vadd.f32 %v3396_v37, %v3362_v53 }
0x1bfd   :  { %v3391_v34 = vpop.permute.xlu0 %3390  ;;  %v3393_v32 = vpop.permute.xlu1 %3392 }
0x1bfe   :  { %v3397_v16 = vsel %vm8008_vm8, %v3389_v27, %v3391_v34  ;;  %v3398_v61 = vsel %vm8009_vm9, %v3391_v34, %v3393_v32  ;;  %v3410_v44 = vadd.f32 %v3393_v32, %v3365_v54  ;;  %vm8016_vm8 = vcmask 736256   ;;  %vm8017_vm9 = vmmov %vm8006_vm5 }
0x1bff   :  { %v3408_v50 = vadd.f32 %v3397_v16, %v3363_v12  ;;  %v3409_v13 = vadd.f32 %v3398_v61, %v3364_v17 }
0x1c01   :  { %v3428_v31 = vpop.permute.xlu0 %3427  ;;  %v3430_v49 = vpop.permute.xlu1 %3429 }
0x1c02   :  { %v3439_v30 = vsel %vm8010_vm10, %v3428_v31, %v3430_v49  ;;  %vm8018_vm10 = vmmov %vm8006_vm5 }
0x1c03   :  { %v3450_v45 = vadd.f32 %v3439_v30, %v3405_v58 }
0x1c05   :  { %v3432_v14 = vpop.permute.xlu0 %3431  ;;  %v3434_v52 = vpop.permute.xlu1 %3433 }
0x1c06   :  { %v3440_v46 = vsel %vm8011_vm11, %v3430_v49, %v3432_v14  ;;  %v3441_v23 = vsel %vm8012_vm12, %v3432_v14, %v3434_v52  ;;  %vm8019_vm11 = vmmov %vm8016_vm8 }
0x1c07   :  { %v3451_v2 = vadd.f32 %v3440_v46, %v3406_v36  ;;  %v3452_v47 = vadd.f32 %v3441_v23, %v3407_v11  ;;  %vm8020_vm12 = vmmov %vm8016_vm8 }
0x1c09   :  { %v3436_v21 = vpop.permute.xlu0 %3435  ;;  %v3438_v43 = vpop.permute.xlu1 %3437 }
0x1c0a   :  { %v3455_v38 = vadd.f32 %v3438_v43, %v3410_v44  ;;  %v3442_v3 = vsel %vm8014_vm14, %v3434_v52, %v3436_v21  ;;  %v3443_v7 = vsel %vm8006_vm5, %v3436_v21, %v3438_v43  ;;  %vm8022_vm14 = vmmov %vm8006_vm5 }
0x1c0b   :  { %v3453_v33 = vadd.f32 %v3442_v3, %v3408_v50  ;;  %v3454_v59 = vadd.f32 %v3443_v7, %v3409_v13  ;;  %vm8023_vm5 = vmmov %vm8016_vm8 }
0x1c0d   :  { %v3473_v42 = vpop.permute.xlu0 %3472  ;;  %v3475_v15 = vpop.permute.xlu1 %3474 }
0x1c0e   :  { %v3484_v51 = vsel %vm8013_vm13, %v3473_v42, %v3475_v15  ;;  %vm8021_vm13 = vmmov %vm8016_vm8 }
0x1c0f   :  { %v3495_v54 = vadd.f32 %v3484_v51, %v3450_v45 }
0x1c11   :  { %v3477_v48 = vpop.permute.xlu0 %3476  ;;  %v3479_v55 = vpop.permute.xlu1 %3478 }
0x1c12   :  { %v3485_v53 = vsel %vm8015_vm6, %v3475_v15, %v3477_v48  ;;  %v3486_v12 = vsel %vm8017_vm9, %v3477_v48, %v3479_v55  ;;  %vm8024_vm6 = vmmov %vm8023_vm5 }
0x1c13   :  { %v3496_v58 = vadd.f32 %v3485_v53, %v3451_v2  ;;  %v3497_v32 = vadd.f32 %v3486_v12, %v3452_v47  ;;  %vm8026_vm9 = vmmov %vm8023_vm5 }
0x1c15   :  { %v3483_v41 = vpop.permute.xlu1 %3482  ;;  %v3481_v39 = vpop.permute.xlu0 %3480 }
0x1c16   :  { %v3500_v1 = vadd.f32 %v3483_v41, %v3455_v38  ;;  %v3487_v17 = vsel %vm8018_vm10, %v3479_v55, %v3481_v39  ;;  %v3488_v61 = vsel %vm8022_vm14, %v3481_v39, %v3483_v41  ;;  %vm8027_vm10 = vmmov %vm8023_vm5 }
0x1c17   :  { %v3498_v16 = vadd.f32 %v3487_v17, %v3453_v33  ;;  %vm8031_vm14 = vmmov %vm8023_vm5  ;;  %v8041_v33 = vld [vmem:[#allocation49_spill] sm:$0xff] }
0x1c19   :  { %v3523_v60 = vpop.permute.xlu1 %3522  ;;  %v3521_v40 = vpop.permute.xlu0 %3520 }
0x1c1a   :  { %v3532_v19 = vsel %vm8016_vm8, %v3521_v40, %v3523_v60  ;;  %vm8025_vm8 = vmmov %vm8023_vm5 }
0x1c1b   :  { %v3543_v18 = vadd.f32 %v3532_v19, %v3495_v54 }
0x1c1d   :  { %v3527_v28 = vpop.permute.xlu1 %3526  ;;  %v3525_v29 = vpop.permute.xlu0 %3524 }
0x1c1e   :  { %v3533_v37 = vsel %vm8020_vm12, %v3523_v60, %v3525_v29  ;;  %v3534_v36 = vsel %vm8021_vm13, %v3525_v29, %v3527_v28  ;;  %vm8029_vm12 = vmmov %vm8023_vm5  ;;  %v3499_v60 = vadd.f32 %v3488_v61, %v3454_v59 }
0x1c1f   :  { %v3544_v14 = vadd.f32 %v3533_v37, %v3496_v58  ;;  %v3545_v52 = vadd.f32 %v3534_v36, %v3497_v32  ;;  %vm8030_vm13 = vmmov %vm8023_vm5 }
0x1c21   :  { %v3531_v22 = vpop.permute.xlu1 %3530  ;;  %v3529_v26 = vpop.permute.xlu0 %3528 }
0x1c22   :  { %v3548_v57 = vadd.f32 %v3531_v22, %v3500_v1  ;;  %v3535_v21 = vsel %vm8026_vm9, %v3527_v28, %v3529_v26  ;;  %v3536_v43 = vsel %vm8027_vm10, %v3529_v26, %v3531_v22  ;;  %vm8034_vm9 = vmmov %vm8023_vm5 }
0x1c23   :  { %v3546_v22 = vadd.f32 %v3535_v21, %v3498_v16  ;;  %v3547_v26 = vadd.f32 %v3536_v43, %v3499_v60  ;;  %vm8035_vm10 = vmmov %vm8023_vm5  ;;  %v8042_v16 = vld [vmem:[#allocation17_spill] sm:$0xff] }
0x1c25   :  { %v3568_v4 = vpop.permute.xlu1 %3567  ;;  %v3566_v24 = vpop.permute.xlu0 %3565 }
0x1c26   :  { %v3577_v6 = vsel %vm8019_vm11, %v3566_v24, %v3568_v4  ;;  %vm8028_vm11 = vmmov %vm8023_vm5 }
0x1c27   :  { %v3588_v31 = vadd.f32 %v3577_v6, %v3543_v18 }
0x1c29   :  { %v3572_v9 = vpop.permute.xlu1 %3571  ;;  %v3570_v10 = vpop.permute.xlu0 %3569 }
0x1c2a   :  { %v3578_v50 = vsel %vm8024_vm6, %v3568_v4, %v3570_v10  ;;  %v3579_v13 = vsel %vm8025_vm8, %v3570_v10, %v3572_v9  ;;  %vm8032_vm6 = vmmov %vm8023_vm5 }
0x1c2b   :  { %v3589_v40 = vadd.f32 %v3578_v50, %v3544_v14  ;;  %v3590_v29 = vadd.f32 %v3579_v13, %v3545_v52  ;;  %vm8033_vm8 = vmmov %vm8023_vm5 }
0x1c2d   :  { %v3576_v63 = vpop.permute.xlu1 %3575  ;;  %v3574_v35 = vpop.permute.xlu0 %3573 }
0x1c2e   :  { %v3593_v11 = vadd.f32 %v3576_v63, %v3548_v57  ;;  %v3580_v24 = vsel %vm8031_vm14, %v3572_v9, %v3574_v35  ;;  %v3581_v28 = vsel %vm8023_vm5, %v3574_v35, %v3576_v63 }
0x1c2f   :  { %v3591_v51 = vadd.f32 %v3580_v24, %v3546_v22  ;;  %v3592_v3 = vadd.f32 %v3581_v28, %v3547_v26 }
0x1c31   :  { %v3611_v56 = vpop.permute.xlu1 %3610 }
0x1c35   :  { %v3613_v20 = vpop.permute.xlu1 %3612 }
0x1c36   :  { %v3622_v44 = vsel %vm8023_vm5, %v3611_v56, %v3613_v20 }
0x1c37   :  { %v3633_v15 = vadd.f32 %v3622_v44, %v3588_v31  ;;  %v8043_v44 = vld [vmem:[#allocation18_spill] sm:$0xff] }
0x1c39   :  { %v6981_v62 = vpop.permute.xlu1 %3616 }
0x1c3d   :  { %v3621_v8 = vpop.permute.xlu1 %3620 }
0x1c3e   :  { %v6984_v0 = vpop.permute.xlu0 %3687  ;;  %v3638_v49 = vadd.f32 %v3621_v8, %v3593_v11 }
0x1c41   :  { %v3658_v25 = vpop.permute.xlu1 %3657 }
0x1c42   :  { %v3615_v5 = vpop.permute.xlu0 %3614 }
0x1c43   :  { %v3623_v48 = vsel %vm8028_vm11, %v3613_v20, %v3615_v5  ;;  %v3624_v55 = vsel %vm8029_vm12, %v3615_v5, %v6981_v62  ;;  %v8036_v5 = vld [vmem:[#allocation54_spill] sm:$0xff]  ;;  %vm8038_vm11 = vmmov %vm8023_vm5 }
0x1c44   :  { %v3634_v10 = vadd.f32 %v3623_v48, %v3589_v40  ;;  %v3635_v30 = vadd.f32 %v3624_v55, %v3590_v29  ;;  %vm8039_vm12 = vmmov %vm8023_vm5 }
0x1c45   :  { %v3662_v27 = vpop.permute.xlu1 %3661 }
0x1c46   :  { %v3619_v34 = vpop.permute.xlu0 %3618 }
0x1c47   :  { %v3625_v20 = vsel %vm8032_vm6, %v6981_v62, %v3619_v34  ;;  %v3626_v46 = vsel %vm8033_vm8, %v3619_v34, %v3621_v8  ;;  %v8037_v62 = vld [vmem:[#allocation50_spill] sm:$0xff] }
0x1c48   :  { %v3636_v53 = vadd.f32 %v3625_v20, %v3591_v51  ;;  %v3637_v1 = vadd.f32 %v3626_v46, %v3592_v3 }
0x1c49   :  { %v3666_v42 = vpop.permute.xlu1 %3665 }
0x1c4a   :  { %v3683_v41 = vadd.f32 %v3666_v42, %v3638_v49  ;;  %v3656_v39 = vpop.permute.xlu0 %3655 }
0x1c4b   :  { %v3667_v4 = vsel %vm8030_vm13, %v3656_v39, %v3658_v25  ;;  %vm3746_vm13 = vcmask 64516  }
0x1c4c   :  { %v3678_v56 = vadd.f32 %v3667_v4, %v3633_v15  ;;  %v3695_v23 = vadd.f32 %v6984_v0, %v3683_v41 }
0x1c4e   :  { %v3690_v38 = vadd.f32 %v6984_v0, %v3678_v56  ;;  %v3660_v45 = vpop.permute.xlu0 %3659  ;;  %v3701_v2 = vadd.f32 %v3695_v23, %v8036_v5 }
0x1c4f   :  { %v3668_v9 = vsel %vm8034_vm9, %v3658_v25, %v3660_v45  ;;  %v3669_v63 = vsel %vm8035_vm10, %v3660_v45, %v3662_v27  ;;  %v8040_v25 = vld [vmem:[#allocation51_spill] sm:$0xff] }
0x1c50   :  { %v3679_v35 = vadd.f32 %v3668_v9, %v3634_v10  ;;  %v3680_v7 = vadd.f32 %v3669_v63, %v3635_v30  ;;  %v3696_v47 = vadd.f32 %v3690_v38, %v8037_v62  ;;  %vm3707_vm14 = vcmp.ge.f32.partialorder %v3701_v2, 0.0 }
0x1c52   :  { %v3691_v8 = vadd.f32 %v6984_v0, %v3679_v35  ;;  %v3692_v19 = vadd.f32 %v6984_v0, %v3680_v7  ;;  %v3664_v54 = vpop.permute.xlu0 %3663  ;;  %vm3702_vm5 = vcmp.ge.f32.partialorder %v3696_v47, 0.0 }
0x1c53   :  { %v3670_v12 = vsel %vm8038_vm11, %v3662_v27, %v3664_v54  ;;  %v3671_v17 = vsel %vm8039_vm12, %v3664_v54, %v3666_v42 }
0x1c54   :  { %v3697_v57 = vadd.f32 %v3691_v8, %v8040_v25  ;;  %v3698_v59 = vadd.f32 %v3692_v19, %v8041_v33  ;;  %v3681_v58 = vadd.f32 %v3670_v12, %v3636_v53  ;;  %v3682_v6 = vadd.f32 %v3671_v17, %v3637_v1 }
0x1c56   :  { %v3693_v18 = vadd.f32 %v6984_v0, %v3681_v58  ;;  %v3694_v37 = vadd.f32 %v6984_v0, %v3682_v6  ;;  %v3712_v36 = vpop.permute.xlu0 %3711  ;;  %vm3703_vm6 = vcmp.ge.f32.partialorder %v3697_v57, 0.0  ;;  %vm3704_vm8 = vcmp.ge.f32.partialorder %v3698_v59, 0.0 }
0x1c57   :  { %v3714_v11 = vmul.f32 %v3712_v36, %v3696_v47  ;;  %v3715_v34 = vmul.f32 %v3712_v36, %v3697_v57  ;;  %v3716_v32 = vmul.f32 %v3712_v36, %v3698_v59  ;;  %v3719_v27 = vmul.f32 %v3712_v36, %v3701_v2 }
0x1c58   :  { %v3699_v61 = vadd.f32 %v3693_v18, %v8042_v16  ;;  %v3700_v31 = vadd.f32 %v3694_v37, %v8043_v44 }
0x1c59   :  { %v3720_v50 = vsel %vm3702_vm5, %v3696_v47, %v3714_v11  ;;  %v3721_v13 = vsel %vm3703_vm6, %v3697_v57, %v3715_v34  ;;  %v3722_v49 = vsel %vm3704_vm8, %v3698_v59, %v3716_v32  ;;  %v3725_v14 = vsel %vm3707_vm14, %v3701_v2, %v3719_v27 }
0x1c5a   :  { %vm3706_vm9 = vcmp.ge.f32.partialorder %v3700_v31, 0.0  ;;  %v3717_v52 = vmul.f32 %v3712_v36, %v3699_v61  ;;  %v3718_v0 = vmul.f32 %v3712_v36, %v3700_v31  ;;  %vm3705_vm10 = vcmp.ge.f32.partialorder %v3699_v61, 0.0 }
0x1c5b   :  { %v3726_v43 = vsel %vm5628_vm7, %v3720_v50, 0.0  ;;  %v3727_v15 = vsel %vm5632_vm2, %v3721_v13, 0.0  ;;  %v3728_v60 = vsel %vm5620_vm3, %v3722_v49, 0.0  ;;  %v3731_v56 = vsel %vm5640_vm15, %v3725_v14, 0.0  ;;  %vm3747_vm7 = vmor %vm3746_vm13, %vm34_vm0 }
0x1c5c   :  { %v3723_v48 = vsel %vm3705_vm10, %v3699_v61, %v3717_v52  ;;  %v3724_v55 = vsel %vm3706_vm9, %v3700_v31, %v3718_v0  ;;  %v3738_v41 = vcombine.low %v3726_v43, %v3727_v15 }
0x1c5d   :  { %v3729_v29 = vsel %vm5624_vm4, %v3723_v48, 0.0  ;;  %v3730_v24 = vsel %vm5636_vm1, %v3724_v55, 0.0 }
0x1c5e   :  { %v3739_v22 = vcombine.low %v3728_v60, %v3729_v29  ;;  %v3740_v26 = vcombine.low %v3730_v24, %v3731_v56  ;;  %3744 = vst [vmem:[#allocation3] sm:$0xff] %v3738_v41 }
0x1c60   :  { %3745 = vst [vmem:[#allocation3 + $0x8] sm:$0xff] %v3739_v22  ;;  %3748 = vst.msk [vmem:[#allocation3 + $0x10] sm:$0xff] %vm3747_vm7, %v3740_v26 }
0x1c61   :  { %3871 = shalt.err (!%p3868_p4)
}
0x1c62   :  { %s3872_s19 = scalar_lea.hbm %s7064_s8, 384 }
0x1c63   :  { %p3873_p5 = scmp.ne.s32.totalorder %s7064_s8, %s3872_s19  ;;  %p3876_p6 = scmp.lt.u32.totalorder %s3872_s19, %s7064_s8 }
0x1c65   :  { %p3878_p7 = pnand %p3876_p6, %p3873_p5 }
0x1c67   :  { %3881 = shalt.err (!%p3878_p7)
}
0x1c68   :  { %3758 = dma.vmem_to_hbm [thread:$0]  %s3756_s2, 384, %s7064_s8, [#allocation4]  }
0x1c69   :  { %3882 = dma.done.wait [#allocation4], 384  }
0x1c6a   :  { %3883 = vsyncadd [#allocation4], 4294966912 }
0x1c6b   :  { %3762 = vsyncpa [#allocation4], 1 }

</bundles_post_ra>
